<compile_context>
chip_gen: v7x
topology: tpu7x:2x2x1
jax: 0.10.0
libtpu: 0.0.40
codegen_flags: <defaults>
</compile_context>

<pallas_src>
import math

import numpy as np
import jax
import jax.numpy as jnp
from jax import lax
from jax.experimental import pallas as pl

HIDDEN = 32          # model.config.hidden_size (small synthetic BERT)
HEADS = 4
HEAD_DIM = HIDDEN // HEADS
FFN = 64
VOCAB = 100
LAYERS = 2
MAX_POS = 64
LN_EPS = 1e-12       # BERT LayerNorm eps
NEG_INF = -1e9


# ----------------------------------------------------------------------------- helpers
def _layernorm(x, g, b):
    mu = jnp.mean(x, axis=-1, keepdims=True)
    var = jnp.mean(jnp.square(x - mu), axis=-1, keepdims=True)
    return (x - mu) * lax.rsqrt(var + LN_EPS) * g + b


# ----------------------------------------------------------------------------- fused forward kernel
def _fused_forward_kernel(idx_ref, bias_ref, postype_ref, wemb_ref, vecs_ref,
                          wqkv_ref, bqkv_ref, wow1_ref, b1_ref, w2_ref, o_ref):
    N = bias_ref.shape[0]        # B*S flattened sub-word tokens
    M = o_ref.shape[0]           # B*T flattened word slots

    # ---- embedding lookup as a one-hot matmul on the MXU (+ pos/type emb + LN)
    ids = idx_ref[0:N, :]                                                  # (N, 1) int32
    vcols = lax.broadcasted_iota(jnp.int32, (N, VOCAB), 1)
    onehot = (vcols == ids).astype(jnp.float32)                            # (N, VOCAB)
    x = jnp.dot(onehot, wemb_ref[...], preferred_element_type=jnp.float32)
    x = x + postype_ref[...]                                               # pos + token-type
    x = _layernorm(x, vecs_ref[0:1, :], vecs_ref[1:2, :])                  # (N, H)

    bias = bias_ref[...]          # (N, N) block-diagonal additive key mask (0 / -1e9)

    # ---- LAYERS encoder layers, statically unrolled; all weights resident in VMEM
    for l in range(LAYERS):
        base = 2 + 6 * l
        bo   = vecs_ref[base + 0:base + 1, :]
        ln1g = vecs_ref[base + 1:base + 2, :]
        ln1b = vecs_ref[base + 2:base + 3, :]
        b2   = vecs_ref[base + 3:base + 4, :]
        ln2g = vecs_ref[base + 4:base + 5, :]
        ln2b = vecs_ref[base + 5:base + 6, :]

        # single (N,H)@(H,3H) QKV matmul; 1/sqrt(HEAD_DIM) pre-folded into Q cols/bias
        qkv = jnp.dot(x, wqkv_ref[l], preferred_element_type=jnp.float32) + bqkv_ref[l]

        ctx_heads = []
        for h in range(HEADS):                                   # static per-head slices
            q = qkv[:, h * HEAD_DIM:(h + 1) * HEAD_DIM]
            k = qkv[:, HIDDEN + h * HEAD_DIM:HIDDEN + (h + 1) * HEAD_DIM]
            v = qkv[:, 2 * HIDDEN + h * HEAD_DIM:2 * HIDDEN + (h + 1) * HEAD_DIM]
            s = lax.dot_general(q, k, (((1,), (1,)), ((), ())),
                                preferred_element_type=jnp.float32)        # q @ k^T
            s = s + bias
            s = s - jnp.max(s, axis=-1, keepdims=True)
            p = jnp.exp(s)
            # EUP approximate reciprocal instead of a VALU division
            p = p * pl.reciprocal(jnp.sum(p, axis=-1, keepdims=True), approx=True)
            ctx_heads.append(jnp.dot(p, v, preferred_element_type=jnp.float32))

        # one K=HIDDEN output projection on the concatenated heads (no head-sum adds)
        ctx = jnp.concatenate(ctx_heads, axis=-1)                          # (N, H)
        wow1 = wow1_ref[l]                                                 # (H, H+FFN) = [Wo | W1]
        attn = jnp.dot(ctx, wow1[:, :HIDDEN],
                       preferred_element_type=jnp.float32) + bo

        h1 = _layernorm(x + attn, ln1g, ln1b)

        hid = jnp.dot(h1, wow1[:, HIDDEN:], preferred_element_type=jnp.float32) + b1_ref[l]
        # TODO(synk): HF BERT uses exact erf GELU; tanh approximation kept for a
        # guaranteed Mosaic lowering (tiny numeric mismatch vs the PyTorch reference).
        hid = jax.nn.gelu(hid, approximate=True)
        ffn = jnp.dot(hid, w2_ref[l], preferred_element_type=jnp.float32) + b2

        x = _layernorm(h1 + ffn, ln2g, ln2b)

    # ---- first-subword index_select + pad_sequence as a one-hot matmul (fused store)
    # padded word slots carry index -1 -> all-zero one-hot rows -> exact 0.0 padding
    first = idx_ref[N:N + M, :]                                            # (M, 1) int32
    scols = lax.broadcasted_iota(jnp.int32, (M, N), 1)
    gather = (scols == first).astype(jnp.float32)                          # (M, N)
    o_ref[...] = jnp.dot(gather, x, preferred_element_type=jnp.float32)


# ----------------------------------------------------------------------------- parameters (deterministic, synthetic BERT)
def init_params(key):
    def dense(k, fan_in, fan_out):
        return 0.02 * jax.random.normal(k, (fan_in, fan_out), jnp.float32)

    keys = iter(jax.random.split(key, 8 + 8 * LAYERS))
    params = {
        "word_emb": 0.02 * jax.random.normal(next(keys), (VOCAB, HIDDEN), jnp.float32),
        "pos_emb": 0.02 * jax.random.normal(next(keys), (MAX_POS, HIDDEN), jnp.float32),
        "type_emb": 0.02 * jax.random.normal(next(keys), (2, HIDDEN), jnp.float32),
        "emb_ln_g": jnp.ones((1, HIDDEN), jnp.float32),
        "emb_ln_b": jnp.zeros((1, HIDDEN), jnp.float32),
        "layers": [],
    }
    for _ in range(LAYERS):
        lp = {
            "wq": dense(next(keys), HIDDEN, HIDDEN), "bq": jnp.zeros((1, HIDDEN), jnp.float32),
            "wk": dense(next(keys), HIDDEN, HIDDEN), "bk": jnp.zeros((1, HIDDEN), jnp.float32),
            "wv": dense(next(keys), HIDDEN, HIDDEN), "bv": jnp.zeros((1, HIDDEN), jnp.float32),
            "wo": dense(next(keys), HIDDEN, HIDDEN), "bo": jnp.zeros((1, HIDDEN), jnp.float32),
            "ln1_g": jnp.ones((1, HIDDEN), jnp.float32), "ln1_b": jnp.zeros((1, HIDDEN), jnp.float32),
            "w1": dense(next(keys), HIDDEN, FFN), "b1": jnp.zeros((1, FFN), jnp.float32),
            "w2": dense(next(keys), FFN, HIDDEN), "b2": jnp.zeros((1, HIDDEN), jnp.float32),
            "ln2_g": jnp.ones((1, HIDDEN), jnp.float32), "ln2_b": jnp.zeros((1, HIDDEN), jnp.float32),
        }
        params["layers"].append(lp)
    return params


def pack_params(params):
    """Pack weights into few wide arrays: scale-folded QKV, [Wo|W1], stacked vectors."""
    scale = 1.0 / math.sqrt(HEAD_DIM)

    def stack(name):
        return jnp.stack([lp[name] for lp in params["layers"]], axis=0)

    wqkv = jnp.concatenate([stack("wq") * scale, stack("wk"), stack("wv")], axis=-1)  # (L,H,3H)
    bqkv = jnp.concatenate([stack("bq") * scale, stack("bk"), stack("bv")], axis=-1)  # (L,1,3H)
    wow1 = jnp.concatenate([stack("wo"), stack("w1")], axis=-1)                       # (L,H,H+FFN)

    vec_rows = [params["emb_ln_g"], params["emb_ln_b"]]
    for lp in params["layers"]:
        vec_rows += [lp["bo"], lp["ln1_g"], lp["ln1_b"], lp["b2"], lp["ln2_g"], lp["ln2_b"]]
    vecs = jnp.concatenate(vec_rows, axis=0)                                          # (2+6L, H)

    return dict(wqkv=wqkv, bqkv=bqkv, wow1=wow1, b1=stack("b1"), w2=stack("w2"), vecs=vecs)


# ----------------------------------------------------------------------------- fused forward (mirrors TransfomerFeatures.forward)
def transformer_features(params, packed, input_ids, mask, first_idx, valid):
    B, S = input_ids.shape
    T = first_idx.shape[1]
    N, M = B * S, B * T

    # pack token ids + flat first-subword positions into one int32 slab
    ids_flat = input_ids.astype(jnp.int32).reshape(N)
    sent_off = (jnp.arange(B, dtype=jnp.int32) * S)[:, None]
    first_flat = jnp.where(valid > 0, first_idx.astype(jnp.int32) + sent_off, -1).reshape(M)
    idx_pack = jnp.concatenate([ids_flat, first_flat])[:, None]            # (N+M, 1)

    # block-diagonal additive attention bias: same sentence AND valid key, else -1e9
    sent_id = jnp.arange(N, dtype=jnp.int32) // S
    key_ok = mask.reshape(N) > 0
    allowed = (sent_id[:, None] == sent_id[None, :]) & key_ok[None, :]
    attn_bias = jnp.where(allowed, 0.0, NEG_INF).astype(jnp.float32)       # (N, N)

    # position + token-type embeddings per flattened position (positions restart per sentence)
    postype = jnp.tile(params["pos_emb"][:S] + params["type_emb"][0][None, :], (B, 1))  # (N, H)

    # single kernel invocation (no grid): whole batch folded along sublanes,
    # every input DMA'd to VMEM exactly once (weights are single-buffered by construction)
    out_flat = pl.pallas_call(
        _fused_forward_kernel,
        out_shape=jax.ShapeDtypeStruct((M, HIDDEN), jnp.float32),
    )(idx_pack, attn_bias, postype, params["word_emb"], packed["vecs"],
      packed["wqkv"], packed["bqkv"], packed["wow1"], packed["b1"], packed["w2"])

    return out_flat.reshape(B, T, HIDDEN)


# ----------------------------------------------------------------------------- pure-JAX reference (for correctness check)
def reference_forward(params, input_ids, mask, first_idx, valid):
    B, S = input_ids.shape
    x = (params["word_emb"][input_ids]
         + params["pos_emb"][:S][None, :, :]
         + params["type_emb"][0][None, None, :])
    x = _layernorm(x, params["emb_ln_g"], params["emb_ln_b"])
    bias = ((1.0 - mask.astype(jnp.float32)) * NEG_INF)[:, None, None, :]

    for lp in params["layers"]:
        q = x @ lp["wq"] + lp["bq"]
        k = x @ lp["wk"] + lp["bk"]
        v = x @ lp["wv"] + lp["bv"]

        def split(t):
            return t.reshape(B, S, HEADS, HEAD_DIM).transpose(0, 2, 1, 3)

        qh, kh, vh = split(q), split(k), split(v)
        s = jnp.einsum('bnqd,bnkd->bnqk', qh, kh) / math.sqrt(HEAD_DIM) + bias
        p = jax.nn.softmax(s, axis=-1)
        ctx = jnp.einsum('bnqk,bnkd->bnqd', p, vh)
        ctx = ctx.transpose(0, 2, 1, 3).reshape(B, S, HIDDEN)
        attn = ctx @ lp["wo"] + lp["bo"]
        h1 = _layernorm(x + attn, lp["ln1_g"], lp["ln1_b"])
        hid = jax.nn.gelu(h1 @ lp["w1"] + lp["b1"], approximate=True)
        x = _layernorm(h1 + hid @ lp["w2"] + lp["b2"], lp["ln2_g"], lp["ln2_b"])

    feats = jnp.take_along_axis(x, first_idx[..., None].astype(jnp.int32), axis=1)
    return feats * valid[..., None]


# ----------------------------------------------------------------------------- main
if __name__ == "__main__":
    # Deterministic synthetic "tokenizer output" (HF tokenizer has no Pallas equivalent).
    # sentence 0: 6 words, sub-word counts [1,2,1,1,2,1] -> 8 subwords (+CLS+SEP = 10)
    # sentence 1: 8 words, sub-word counts [1,1,2,1,1,1,2,1] -> 10 subwords (+CLS+SEP = 12)
    sub_counts = [[1, 2, 1, 1, 2, 1], [1, 1, 2, 1, 1, 1, 2, 1]]
    lengths = [2 + sum(c) for c in sub_counts]
    B = len(sub_counts)
    S = max(lengths)                       # max_len over the batch (as in forward)
    T = max(len(c) for c in sub_counts)    # max number of words (pad_sequence length)

    key = jax.random.PRNGKey(0)
    id_key, param_key = jax.random.split(key)
    rnd_ids = np.array(jax.random.randint(id_key, (B, S), 5, VOCAB), dtype=np.int32)

    input_ids = np.zeros((B, S), np.int32)
    mask = np.zeros((B, S), np.int32)
    first_idx = np.zeros((B, T), np.int32)
    valid = np.zeros((B, T), np.float32)
    for b, counts in enumerate(sub_counts):
        L = lengths[b]
        input_ids[b, :L] = rnd_ids[b, :L]
        input_ids[b, 0] = 2               # [CLS]
        input_ids[b, L - 1] = 3           # [SEP]
        mask[b, :L] = 1
        pos = 1                           # first sub-word positions start after [CLS]
        for w, c in enumerate(counts):
            first_idx[b, w] = pos
            valid[b, w] = 1.0
            pos += c

    params = init_params(param_key)
    packed = pack_params(params)

    input_ids_j = jnp.asarray(input_ids)
    mask_j = jnp.asarray(mask)
    first_idx_j = jnp.asarray(first_idx)
    valid_j = jnp.asarray(valid)

    out = transformer_features(params, packed, input_ids_j, mask_j,
                               first_idx_j, valid_j)
    out = jax.block_until_ready(out)

    assert out.shape == (B, T, HIDDEN), out.shape
    assert bool(jnp.all(jnp.isfinite(out)))
    # padded word slots must be exactly 0.0 (pad_sequence padding_value=0.0)
    assert bool(jnp.all(out[0, len(sub_counts[0]):, :] == 0.0))

    # correctness vs pure-JAX reference (approx reciprocal in softmax -> loose tol)
    ref = reference_forward(params, input_ids_j, mask_j, first_idx_j, valid_j)
    err = float(jnp.max(jnp.abs(out - ref)))
    assert err < 2e-2, f"max abs diff vs reference: {err}"

    print("KERNEL_OK")
</pallas_src>

<mosaic_0001>
module attributes {stable_mosaic.version = 11 : i64} {
  func.func @_fused_forward_kernel(%arg0: memref<40x1xi32, #tpu.memory_space<vmem>>, %arg1: memref<24x24xf32, #tpu.memory_space<vmem>>, %arg2: memref<24x32xf32, #tpu.memory_space<vmem>>, %arg3: memref<100x32xf32, #tpu.memory_space<vmem>>, %arg4: memref<14x32xf32, #tpu.memory_space<vmem>>, %arg5: memref<2x32x96xf32, #tpu.memory_space<vmem>>, %arg6: memref<2x1x96xf32, #tpu.memory_space<vmem>>, %arg7: memref<2x32x96xf32, #tpu.memory_space<vmem>>, %arg8: memref<2x1x64xf32, #tpu.memory_space<vmem>>, %arg9: memref<2x64x32xf32, #tpu.memory_space<vmem>>, %arg10: memref<16x32xf32, #tpu.memory_space<vmem>>) attributes {dimension_semantics = [], scalar_prefetch = 0 : i64, scratch_operands = 0 : i64, tpu.core_type = #tpu.core_type<tc>} {
    %c0 = arith.constant 0 : index
    %c0_0 = arith.constant 0 : index
    %0 = vector.load %arg0[%c0, %c0_0] : memref<40x1xi32, #tpu.memory_space<vmem>>, vector<24x1xi32>
    %1 = tpu.iota {dimensions = array<i32: 1>} : vector<24x100xi32>
    %2 = vector.broadcast %0 : vector<24x1xi32> to vector<24x100xi32>
    %3 = arith.cmpi eq, %1, %2 : vector<24x100xi32>
    %4 = arith.extui %3 : vector<24x100xi1> to vector<24x100xi32>
    %5 = arith.sitofp %4 : vector<24x100xi32> to vector<24x100xf32>
    %c0_1 = arith.constant 0 : index
    %c0_2 = arith.constant 0 : index
    %6 = vector.load %arg3[%c0_1, %c0_2] : memref<100x32xf32, #tpu.memory_space<vmem>>, vector<100x32xf32>
    %cst = arith.constant dense<0.000000e+00> : vector<24x32xf32>
    %7 = tpu.matmul %5, %6, %cst {dimension_numbers = #tpu.dot_dimension_numbers<[1], [0], [0], [1], [0, 0, 1, 1], [], []>} : vector<24x100xf32>, vector<100x32xf32>, vector<24x32xf32> -> vector<24x32xf32>
    %c0_3 = arith.constant 0 : index
    %c0_4 = arith.constant 0 : index
    %8 = vector.load %arg2[%c0_3, %c0_4] : memref<24x32xf32, #tpu.memory_space<vmem>>, vector<24x32xf32>
    %9 = arith.addf %7, %8 : vector<24x32xf32>
    %c0_5 = arith.constant 0 : index
    %c0_6 = arith.constant 0 : index
    %10 = vector.load %arg4[%c0_5, %c0_6] : memref<14x32xf32, #tpu.memory_space<vmem>>, vector<1x32xf32>
    %c1 = arith.constant 1 : index
    %c0_7 = arith.constant 0 : index
    %11 = vector.load %arg4[%c1, %c0_7] : memref<14x32xf32, #tpu.memory_space<vmem>>, vector<1x32xf32>
    %cst_8 = arith.constant dense<0.000000e+00> : vector<24xf32>
    %12 = vector.multi_reduction <add>, %9, %cst_8 [1] : vector<24x32xf32> to vector<24xf32>
    %13 = vector.shape_cast %12 : vector<24xf32> to vector<24x1xf32>
    %cst_9 = arith.constant 3.200000e+01 : f32
    %14 = vector.broadcast %cst_9 : f32 to vector<24x1xf32>
    %15 = arith.divf %13, %14 : vector<24x1xf32>
    %16 = vector.broadcast %15 : vector<24x1xf32> to vector<24x32xf32>
    %17 = arith.subf %9, %16 : vector<24x32xf32>
    %18 = arith.mulf %17, %17 : vector<24x32xf32>
    %cst_10 = arith.constant dense<0.000000e+00> : vector<24xf32>
    %19 = vector.multi_reduction <add>, %18, %cst_10 [1] : vector<24x32xf32> to vector<24xf32>
    %20 = vector.shape_cast %19 : vector<24xf32> to vector<24x1xf32>
    %cst_11 = arith.constant 3.200000e+01 : f32
    %21 = vector.broadcast %cst_11 : f32 to vector<24x1xf32>
    %22 = arith.divf %20, %21 : vector<24x1xf32>
    %23 = vector.broadcast %15 : vector<24x1xf32> to vector<24x32xf32>
    %24 = arith.subf %9, %23 : vector<24x32xf32>
    %cst_12 = arith.constant 9.99999996E-13 : f32
    %25 = vector.broadcast %cst_12 : f32 to vector<24x1xf32>
    %26 = arith.addf %22, %25 : vector<24x1xf32>
    %27 = math.rsqrt %26 : vector<24x1xf32>
    %28 = vector.broadcast %27 : vector<24x1xf32> to vector<24x32xf32>
    %29 = arith.mulf %24, %28 : vector<24x32xf32>
    %30 = vector.broadcast %10 : vector<1x32xf32> to vector<24x32xf32>
    %31 = arith.mulf %29, %30 : vector<24x32xf32>
    %32 = vector.broadcast %11 : vector<1x32xf32> to vector<24x32xf32>
    %33 = arith.addf %31, %32 : vector<24x32xf32>
    %c0_13 = arith.constant 0 : index
    %c0_14 = arith.constant 0 : index
    %34 = vector.load %arg1[%c0_13, %c0_14] : memref<24x24xf32, #tpu.memory_space<vmem>>, vector<24x24xf32>
    %c2 = arith.constant 2 : index
    %c0_15 = arith.constant 0 : index
    %35 = vector.load %arg4[%c2, %c0_15] : memref<14x32xf32, #tpu.memory_space<vmem>>, vector<1x32xf32>
    %c3 = arith.constant 3 : index
    %c0_16 = arith.constant 0 : index
    %36 = vector.load %arg4[%c3, %c0_16] : memref<14x32xf32, #tpu.memory_space<vmem>>, vector<1x32xf32>
    %c4 = arith.constant 4 : index
    %c0_17 = arith.constant 0 : index
    %37 = vector.load %arg4[%c4, %c0_17] : memref<14x32xf32, #tpu.memory_space<vmem>>, vector<1x32xf32>
    %c5 = arith.constant 5 : index
    %c0_18 = arith.constant 0 : index
    %38 = vector.load %arg4[%c5, %c0_18] : memref<14x32xf32, #tpu.memory_space<vmem>>, vector<1x32xf32>
    %c6 = arith.constant 6 : index
    %c0_19 = arith.constant 0 : index
    %39 = vector.load %arg4[%c6, %c0_19] : memref<14x32xf32, #tpu.memory_space<vmem>>, vector<1x32xf32>
    %c7 = arith.constant 7 : index
    %c0_20 = arith.constant 0 : index
    %40 = vector.load %arg4[%c7, %c0_20] : memref<14x32xf32, #tpu.memory_space<vmem>>, vector<1x32xf32>
    %c0_21 = arith.constant 0 : index
    %c0_22 = arith.constant 0 : index
    %c0_23 = arith.constant 0 : index
    %41 = vector.load %arg5[%c0_21, %c0_22, %c0_23] : memref<2x32x96xf32, #tpu.memory_space<vmem>>, vector<1x32x96xf32>
    %42 = vector.shape_cast %41 : vector<1x32x96xf32> to vector<32x96xf32>
    %cst_24 = arith.constant dense<0.000000e+00> : vector<24x96xf32>
    %43 = tpu.matmul %33, %42, %cst_24 {dimension_numbers = #tpu.dot_dimension_numbers<[1], [0], [0], [1], [0, 0, 1, 1], [], []>} : vector<24x32xf32>, vector<32x96xf32>, vector<24x96xf32> -> vector<24x96xf32>
    %c0_25 = arith.constant 0 : index
    %c0_26 = arith.constant 0 : index
    %c0_27 = arith.constant 0 : index
    %44 = vector.load %arg6[%c0_25, %c0_26, %c0_27] : memref<2x1x96xf32, #tpu.memory_space<vmem>>, vector<1x1x96xf32>
    %45 = vector.shape_cast %44 : vector<1x1x96xf32> to vector<1x96xf32>
    %46 = vector.broadcast %45 : vector<1x96xf32> to vector<24x96xf32>
    %47 = arith.addf %43, %46 : vector<24x96xf32>
    %48 = vector.extract_strided_slice %47 {offsets = [0, 0], sizes = [24, 8], strides = [1, 1]} : vector<24x96xf32> to vector<24x8xf32>
    %49 = vector.extract_strided_slice %47 {offsets = [0, 32], sizes = [24, 8], strides = [1, 1]} : vector<24x96xf32> to vector<24x8xf32>
    %50 = vector.extract_strided_slice %47 {offsets = [0, 64], sizes = [24, 8], strides = [1, 1]} : vector<24x96xf32> to vector<24x8xf32>
    %cst_28 = arith.constant dense<0.000000e+00> : vector<24x24xf32>
    %51 = tpu.matmul %48, %49, %cst_28 {dimension_numbers = #tpu.dot_dimension_numbers<[1], [1], [0], [0], [0, 0, 1, 0], [], []>} : vector<24x8xf32>, vector<24x8xf32>, vector<24x24xf32> -> vector<24x24xf32>
    %52 = arith.addf %51, %34 : vector<24x24xf32>
    %cst_29 = arith.constant dense<0xFF800000> : vector<24xf32>
    %53 = vector.multi_reduction <maximumf>, %52, %cst_29 [1] : vector<24x24xf32> to vector<24xf32>
    %54 = vector.shape_cast %53 : vector<24xf32> to vector<24x1xf32>
    %55 = vector.broadcast %54 : vector<24x1xf32> to vector<24x24xf32>
    %56 = arith.subf %52, %55 : vector<24x24xf32>
    %57 = math.exp %56 : vector<24x24xf32>
    %cst_30 = arith.constant dense<0.000000e+00> : vector<24xf32>
    %58 = vector.multi_reduction <add>, %57, %cst_30 [1] : vector<24x24xf32> to vector<24xf32>
    %59 = vector.shape_cast %58 : vector<24xf32> to vector<24x1xf32>
    %60 = tpu.reciprocal %59 {approx = true} : vector<24x1xf32> -> vector<24x1xf32>
    %61 = vector.broadcast %60 : vector<24x1xf32> to vector<24x24xf32>
    %62 = arith.mulf %57, %61 : vector<24x24xf32>
    %cst_31 = arith.constant dense<0.000000e+00> : vector<24x8xf32>
    %63 = tpu.matmul %62, %50, %cst_31 {dimension_numbers = #tpu.dot_dimension_numbers<[1], [0], [0], [1], [0, 0, 1, 1], [], []>} : vector<24x24xf32>, vector<24x8xf32>, vector<24x8xf32> -> vector<24x8xf32>
    %64 = vector.extract_strided_slice %47 {offsets = [0, 8], sizes = [24, 8], strides = [1, 1]} : vector<24x96xf32> to vector<24x8xf32>
    %65 = vector.extract_strided_slice %47 {offsets = [0, 40], sizes = [24, 8], strides = [1, 1]} : vector<24x96xf32> to vector<24x8xf32>
    %66 = vector.extract_strided_slice %47 {offsets = [0, 72], sizes = [24, 8], strides = [1, 1]} : vector<24x96xf32> to vector<24x8xf32>
    %cst_32 = arith.constant dense<0.000000e+00> : vector<24x24xf32>
    %67 = tpu.matmul %64, %65, %cst_32 {dimension_numbers = #tpu.dot_dimension_numbers<[1], [1], [0], [0], [0, 0, 1, 0], [], []>} : vector<24x8xf32>, vector<24x8xf32>, vector<24x24xf32> -> vector<24x24xf32>
    %68 = arith.addf %67, %34 : vector<24x24xf32>
    %cst_33 = arith.constant dense<0xFF800000> : vector<24xf32>
    %69 = vector.multi_reduction <maximumf>, %68, %cst_33 [1] : vector<24x24xf32> to vector<24xf32>
    %70 = vector.shape_cast %69 : vector<24xf32> to vector<24x1xf32>
    %71 = vector.broadcast %70 : vector<24x1xf32> to vector<24x24xf32>
    %72 = arith.subf %68, %71 : vector<24x24xf32>
    %73 = math.exp %72 : vector<24x24xf32>
    %cst_34 = arith.constant dense<0.000000e+00> : vector<24xf32>
    %74 = vector.multi_reduction <add>, %73, %cst_34 [1] : vector<24x24xf32> to vector<24xf32>
    %75 = vector.shape_cast %74 : vector<24xf32> to vector<24x1xf32>
    %76 = tpu.reciprocal %75 {approx = true} : vector<24x1xf32> -> vector<24x1xf32>
    %77 = vector.broadcast %76 : vector<24x1xf32> to vector<24x24xf32>
    %78 = arith.mulf %73, %77 : vector<24x24xf32>
    %cst_35 = arith.constant dense<0.000000e+00> : vector<24x8xf32>
    %79 = tpu.matmul %78, %66, %cst_35 {dimension_numbers = #tpu.dot_dimension_numbers<[1], [0], [0], [1], [0, 0, 1, 1], [], []>} : vector<24x24xf32>, vector<24x8xf32>, vector<24x8xf32> -> vector<24x8xf32>
    %80 = vector.extract_strided_slice %47 {offsets = [0, 16], sizes = [24, 8], strides = [1, 1]} : vector<24x96xf32> to vector<24x8xf32>
    %81 = vector.extract_strided_slice %47 {offsets = [0, 48], sizes = [24, 8], strides = [1, 1]} : vector<24x96xf32> to vector<24x8xf32>
    %82 = vector.extract_strided_slice %47 {offsets = [0, 80], sizes = [24, 8], strides = [1, 1]} : vector<24x96xf32> to vector<24x8xf32>
    %cst_36 = arith.constant dense<0.000000e+00> : vector<24x24xf32>
    %83 = tpu.matmul %80, %81, %cst_36 {dimension_numbers = #tpu.dot_dimension_numbers<[1], [1], [0], [0], [0, 0, 1, 0], [], []>} : vector<24x8xf32>, vector<24x8xf32>, vector<24x24xf32> -> vector<24x24xf32>
    %84 = arith.addf %83, %34 : vector<24x24xf32>
    %cst_37 = arith.constant dense<0xFF800000> : vector<24xf32>
    %85 = vector.multi_reduction <maximumf>, %84, %cst_37 [1] : vector<24x24xf32> to vector<24xf32>
    %86 = vector.shape_cast %85 : vector<24xf32> to vector<24x1xf32>
    %87 = vector.broadcast %86 : vector<24x1xf32> to vector<24x24xf32>
    %88 = arith.subf %84, %87 : vector<24x24xf32>
    %89 = math.exp %88 : vector<24x24xf32>
    %cst_38 = arith.constant dense<0.000000e+00> : vector<24xf32>
    %90 = vector.multi_reduction <add>, %89, %cst_38 [1] : vector<24x24xf32> to vector<24xf32>
    %91 = vector.shape_cast %90 : vector<24xf32> to vector<24x1xf32>
    %92 = tpu.reciprocal %91 {approx = true} : vector<24x1xf32> -> vector<24x1xf32>
    %93 = vector.broadcast %92 : vector<24x1xf32> to vector<24x24xf32>
    %94 = arith.mulf %89, %93 : vector<24x24xf32>
    %cst_39 = arith.constant dense<0.000000e+00> : vector<24x8xf32>
    %95 = tpu.matmul %94, %82, %cst_39 {dimension_numbers = #tpu.dot_dimension_numbers<[1], [0], [0], [1], [0, 0, 1, 1], [], []>} : vector<24x24xf32>, vector<24x8xf32>, vector<24x8xf32> -> vector<24x8xf32>
    %96 = vector.extract_strided_slice %47 {offsets = [0, 24], sizes = [24, 8], strides = [1, 1]} : vector<24x96xf32> to vector<24x8xf32>
    %97 = vector.extract_strided_slice %47 {offsets = [0, 56], sizes = [24, 8], strides = [1, 1]} : vector<24x96xf32> to vector<24x8xf32>
    %98 = vector.extract_strided_slice %47 {offsets = [0, 88], sizes = [24, 8], strides = [1, 1]} : vector<24x96xf32> to vector<24x8xf32>
    %cst_40 = arith.constant dense<0.000000e+00> : vector<24x24xf32>
    %99 = tpu.matmul %96, %97, %cst_40 {dimension_numbers = #tpu.dot_dimension_numbers<[1], [1], [0], [0], [0, 0, 1, 0], [], []>} : vector<24x8xf32>, vector<24x8xf32>, vector<24x24xf32> -> vector<24x24xf32>
    %100 = arith.addf %99, %34 : vector<24x24xf32>
    %cst_41 = arith.constant dense<0xFF800000> : vector<24xf32>
    %101 = vector.multi_reduction <maximumf>, %100, %cst_41 [1] : vector<24x24xf32> to vector<24xf32>
    %102 = vector.shape_cast %101 : vector<24xf32> to vector<24x1xf32>
    %103 = vector.broadcast %102 : vector<24x1xf32> to vector<24x24xf32>
    %104 = arith.subf %100, %103 : vector<24x24xf32>
    %105 = math.exp %104 : vector<24x24xf32>
    %cst_42 = arith.constant dense<0.000000e+00> : vector<24xf32>
    %106 = vector.multi_reduction <add>, %105, %cst_42 [1] : vector<24x24xf32> to vector<24xf32>
    %107 = vector.shape_cast %106 : vector<24xf32> to vector<24x1xf32>
    %108 = tpu.reciprocal %107 {approx = true} : vector<24x1xf32> -> vector<24x1xf32>
    %109 = vector.broadcast %108 : vector<24x1xf32> to vector<24x24xf32>
    %110 = arith.mulf %105, %109 : vector<24x24xf32>
    %cst_43 = arith.constant dense<0.000000e+00> : vector<24x8xf32>
    %111 = tpu.matmul %110, %98, %cst_43 {dimension_numbers = #tpu.dot_dimension_numbers<[1], [0], [0], [1], [0, 0, 1, 1], [], []>} : vector<24x24xf32>, vector<24x8xf32>, vector<24x8xf32> -> vector<24x8xf32>
    %112 = tpu.concatenate %63, %79, %95, %111 in 1 : vector<24x8xf32>, vector<24x8xf32>, vector<24x8xf32>, vector<24x8xf32> -> vector<24x32xf32>
    %c0_44 = arith.constant 0 : index
    %c0_45 = arith.constant 0 : index
    %c0_46 = arith.constant 0 : index
    %113 = vector.load %arg7[%c0_44, %c0_45, %c0_46] : memref<2x32x96xf32, #tpu.memory_space<vmem>>, vector<1x32x96xf32>
    %114 = vector.shape_cast %113 : vector<1x32x96xf32> to vector<32x96xf32>
    %115 = vector.extract_strided_slice %114 {offsets = [0, 0], sizes = [32, 32], strides = [1, 1]} : vector<32x96xf32> to vector<32x32xf32>
    %cst_47 = arith.constant dense<0.000000e+00> : vector<24x32xf32>
    %116 = tpu.matmul %112, %115, %cst_47 {dimension_numbers = #tpu.dot_dimension_numbers<[1], [0], [0], [1], [0, 0, 1, 1], [], []>} : vector<24x32xf32>, vector<32x32xf32>, vector<24x32xf32> -> vector<24x32xf32>
    %117 = vector.broadcast %35 : vector<1x32xf32> to vector<24x32xf32>
    %118 = arith.addf %116, %117 : vector<24x32xf32>
    %119 = arith.addf %33, %118 : vector<24x32xf32>
    %cst_48 = arith.constant dense<0.000000e+00> : vector<24xf32>
    %120 = vector.multi_reduction <add>, %119, %cst_48 [1] : vector<24x32xf32> to vector<24xf32>
    %121 = vector.shape_cast %120 : vector<24xf32> to vector<24x1xf32>
    %cst_49 = arith.constant 3.200000e+01 : f32
    %122 = vector.broadcast %cst_49 : f32 to vector<24x1xf32>
    %123 = arith.divf %121, %122 : vector<24x1xf32>
    %124 = vector.broadcast %123 : vector<24x1xf32> to vector<24x32xf32>
    %125 = arith.subf %119, %124 : vector<24x32xf32>
    %126 = arith.mulf %125, %125 : vector<24x32xf32>
    %cst_50 = arith.constant dense<0.000000e+00> : vector<24xf32>
    %127 = vector.multi_reduction <add>, %126, %cst_50 [1] : vector<24x32xf32> to vector<24xf32>
    %128 = vector.shape_cast %127 : vector<24xf32> to vector<24x1xf32>
    %cst_51 = arith.constant 3.200000e+01 : f32
    %129 = vector.broadcast %cst_51 : f32 to vector<24x1xf32>
    %130 = arith.divf %128, %129 : vector<24x1xf32>
    %131 = vector.broadcast %123 : vector<24x1xf32> to vector<24x32xf32>
    %132 = arith.subf %119, %131 : vector<24x32xf32>
    %cst_52 = arith.constant 9.99999996E-13 : f32
    %133 = vector.broadcast %cst_52 : f32 to vector<24x1xf32>
    %134 = arith.addf %130, %133 : vector<24x1xf32>
    %135 = math.rsqrt %134 : vector<24x1xf32>
    %136 = vector.broadcast %135 : vector<24x1xf32> to vector<24x32xf32>
    %137 = arith.mulf %132, %136 : vector<24x32xf32>
    %138 = vector.broadcast %36 : vector<1x32xf32> to vector<24x32xf32>
    %139 = arith.mulf %137, %138 : vector<24x32xf32>
    %140 = vector.broadcast %37 : vector<1x32xf32> to vector<24x32xf32>
    %141 = arith.addf %139, %140 : vector<24x32xf32>
    %142 = vector.extract_strided_slice %114 {offsets = [0, 32], sizes = [32, 64], strides = [1, 1]} : vector<32x96xf32> to vector<32x64xf32>
    %cst_53 = arith.constant dense<0.000000e+00> : vector<24x64xf32>
    %143 = tpu.matmul %141, %142, %cst_53 {dimension_numbers = #tpu.dot_dimension_numbers<[1], [0], [0], [1], [0, 0, 1, 1], [], []>} : vector<24x32xf32>, vector<32x64xf32>, vector<24x64xf32> -> vector<24x64xf32>
    %c0_54 = arith.constant 0 : index
    %c0_55 = arith.constant 0 : index
    %c0_56 = arith.constant 0 : index
    %144 = vector.load %arg8[%c0_54, %c0_55, %c0_56] : memref<2x1x64xf32, #tpu.memory_space<vmem>>, vector<1x1x64xf32>
    %145 = vector.shape_cast %144 : vector<1x1x64xf32> to vector<1x64xf32>
    %146 = vector.broadcast %145 : vector<1x64xf32> to vector<24x64xf32>
    %147 = arith.addf %143, %146 : vector<24x64xf32>
    %148 = arith.mulf %147, %147 : vector<24x64xf32>
    %149 = arith.mulf %147, %148 : vector<24x64xf32>
    %cst_57 = arith.constant 4.471500e-02 : f32
    %150 = vector.broadcast %cst_57 : f32 to vector<24x64xf32>
    %151 = arith.mulf %150, %149 : vector<24x64xf32>
    %152 = arith.addf %147, %151 : vector<24x64xf32>
    %cst_58 = arith.constant 0.797884583 : f32
    %153 = vector.broadcast %cst_58 : f32 to vector<24x64xf32>
    %154 = arith.mulf %153, %152 : vector<24x64xf32>
    %155 = math.tanh %154 : vector<24x64xf32>
    %cst_59 = arith.constant 1.000000e+00 : f32
    %156 = vector.broadcast %cst_59 : f32 to vector<24x64xf32>
    %157 = arith.addf %156, %155 : vector<24x64xf32>
    %cst_60 = arith.constant 5.000000e-01 : f32
    %158 = vector.broadcast %cst_60 : f32 to vector<24x64xf32>
    %159 = arith.mulf %158, %157 : vector<24x64xf32>
    %160 = arith.mulf %147, %159 : vector<24x64xf32>
    %c0_61 = arith.constant 0 : index
    %c0_62 = arith.constant 0 : index
    %c0_63 = arith.constant 0 : index
    %161 = vector.load %arg9[%c0_61, %c0_62, %c0_63] : memref<2x64x32xf32, #tpu.memory_space<vmem>>, vector<1x64x32xf32>
    %162 = vector.shape_cast %161 : vector<1x64x32xf32> to vector<64x32xf32>
    %cst_64 = arith.constant dense<0.000000e+00> : vector<24x32xf32>
    %163 = tpu.matmul %160, %162, %cst_64 {dimension_numbers = #tpu.dot_dimension_numbers<[1], [0], [0], [1], [0, 0, 1, 1], [], []>} : vector<24x64xf32>, vector<64x32xf32>, vector<24x32xf32> -> vector<24x32xf32>
    %164 = vector.broadcast %38 : vector<1x32xf32> to vector<24x32xf32>
    %165 = arith.addf %163, %164 : vector<24x32xf32>
    %166 = arith.addf %141, %165 : vector<24x32xf32>
    %cst_65 = arith.constant dense<0.000000e+00> : vector<24xf32>
    %167 = vector.multi_reduction <add>, %166, %cst_65 [1] : vector<24x32xf32> to vector<24xf32>
    %168 = vector.shape_cast %167 : vector<24xf32> to vector<24x1xf32>
    %cst_66 = arith.constant 3.200000e+01 : f32
    %169 = vector.broadcast %cst_66 : f32 to vector<24x1xf32>
    %170 = arith.divf %168, %169 : vector<24x1xf32>
    %171 = vector.broadcast %170 : vector<24x1xf32> to vector<24x32xf32>
    %172 = arith.subf %166, %171 : vector<24x32xf32>
    %173 = arith.mulf %172, %172 : vector<24x32xf32>
    %cst_67 = arith.constant dense<0.000000e+00> : vector<24xf32>
    %174 = vector.multi_reduction <add>, %173, %cst_67 [1] : vector<24x32xf32> to vector<24xf32>
    %175 = vector.shape_cast %174 : vector<24xf32> to vector<24x1xf32>
    %cst_68 = arith.constant 3.200000e+01 : f32
    %176 = vector.broadcast %cst_68 : f32 to vector<24x1xf32>
    %177 = arith.divf %175, %176 : vector<24x1xf32>
    %178 = vector.broadcast %170 : vector<24x1xf32> to vector<24x32xf32>
    %179 = arith.subf %166, %178 : vector<24x32xf32>
    %cst_69 = arith.constant 9.99999996E-13 : f32
    %180 = vector.broadcast %cst_69 : f32 to vector<24x1xf32>
    %181 = arith.addf %177, %180 : vector<24x1xf32>
    %182 = math.rsqrt %181 : vector<24x1xf32>
    %183 = vector.broadcast %182 : vector<24x1xf32> to vector<24x32xf32>
    %184 = arith.mulf %179, %183 : vector<24x32xf32>
    %185 = vector.broadcast %39 : vector<1x32xf32> to vector<24x32xf32>
    %186 = arith.mulf %184, %185 : vector<24x32xf32>
    %187 = vector.broadcast %40 : vector<1x32xf32> to vector<24x32xf32>
    %188 = arith.addf %186, %187 : vector<24x32xf32>
    %c8 = arith.constant 8 : index
    %c0_70 = arith.constant 0 : index
    %189 = vector.load %arg4[%c8, %c0_70] : memref<14x32xf32, #tpu.memory_space<vmem>>, vector<1x32xf32>
    %c9 = arith.constant 9 : index
    %c0_71 = arith.constant 0 : index
    %190 = vector.load %arg4[%c9, %c0_71] : memref<14x32xf32, #tpu.memory_space<vmem>>, vector<1x32xf32>
    %c10 = arith.constant 10 : index
    %c0_72 = arith.constant 0 : index
    %191 = vector.load %arg4[%c10, %c0_72] : memref<14x32xf32, #tpu.memory_space<vmem>>, vector<1x32xf32>
    %c11 = arith.constant 11 : index
    %c0_73 = arith.constant 0 : index
    %192 = vector.load %arg4[%c11, %c0_73] : memref<14x32xf32, #tpu.memory_space<vmem>>, vector<1x32xf32>
    %c12 = arith.constant 12 : index
    %c0_74 = arith.constant 0 : index
    %193 = vector.load %arg4[%c12, %c0_74] : memref<14x32xf32, #tpu.memory_space<vmem>>, vector<1x32xf32>
    %c13 = arith.constant 13 : index
    %c0_75 = arith.constant 0 : index
    %194 = vector.load %arg4[%c13, %c0_75] : memref<14x32xf32, #tpu.memory_space<vmem>>, vector<1x32xf32>
    %c1_76 = arith.constant 1 : index
    %c0_77 = arith.constant 0 : index
    %c0_78 = arith.constant 0 : index
    %195 = vector.load %arg5[%c1_76, %c0_77, %c0_78] : memref<2x32x96xf32, #tpu.memory_space<vmem>>, vector<1x32x96xf32>
    %196 = vector.shape_cast %195 : vector<1x32x96xf32> to vector<32x96xf32>
    %cst_79 = arith.constant dense<0.000000e+00> : vector<24x96xf32>
    %197 = tpu.matmul %188, %196, %cst_79 {dimension_numbers = #tpu.dot_dimension_numbers<[1], [0], [0], [1], [0, 0, 1, 1], [], []>} : vector<24x32xf32>, vector<32x96xf32>, vector<24x96xf32> -> vector<24x96xf32>
    %c1_80 = arith.constant 1 : index
    %c0_81 = arith.constant 0 : index
    %c0_82 = arith.constant 0 : index
    %198 = vector.load %arg6[%c1_80, %c0_81, %c0_82] : memref<2x1x96xf32, #tpu.memory_space<vmem>>, vector<1x1x96xf32>
    %199 = vector.shape_cast %198 : vector<1x1x96xf32> to vector<1x96xf32>
    %200 = vector.broadcast %199 : vector<1x96xf32> to vector<24x96xf32>
    %201 = arith.addf %197, %200 : vector<24x96xf32>
    %202 = vector.extract_strided_slice %201 {offsets = [0, 0], sizes = [24, 8], strides = [1, 1]} : vector<24x96xf32> to vector<24x8xf32>
    %203 = vector.extract_strided_slice %201 {offsets = [0, 32], sizes = [24, 8], strides = [1, 1]} : vector<24x96xf32> to vector<24x8xf32>
    %204 = vector.extract_strided_slice %201 {offsets = [0, 64], sizes = [24, 8], strides = [1, 1]} : vector<24x96xf32> to vector<24x8xf32>
    %cst_83 = arith.constant dense<0.000000e+00> : vector<24x24xf32>
    %205 = tpu.matmul %202, %203, %cst_83 {dimension_numbers = #tpu.dot_dimension_numbers<[1], [1], [0], [0], [0, 0, 1, 0], [], []>} : vector<24x8xf32>, vector<24x8xf32>, vector<24x24xf32> -> vector<24x24xf32>
    %206 = arith.addf %205, %34 : vector<24x24xf32>
    %cst_84 = arith.constant dense<0xFF800000> : vector<24xf32>
    %207 = vector.multi_reduction <maximumf>, %206, %cst_84 [1] : vector<24x24xf32> to vector<24xf32>
    %208 = vector.shape_cast %207 : vector<24xf32> to vector<24x1xf32>
    %209 = vector.broadcast %208 : vector<24x1xf32> to vector<24x24xf32>
    %210 = arith.subf %206, %209 : vector<24x24xf32>
    %211 = math.exp %210 : vector<24x24xf32>
    %cst_85 = arith.constant dense<0.000000e+00> : vector<24xf32>
    %212 = vector.multi_reduction <add>, %211, %cst_85 [1] : vector<24x24xf32> to vector<24xf32>
    %213 = vector.shape_cast %212 : vector<24xf32> to vector<24x1xf32>
    %214 = tpu.reciprocal %213 {approx = true} : vector<24x1xf32> -> vector<24x1xf32>
    %215 = vector.broadcast %214 : vector<24x1xf32> to vector<24x24xf32>
    %216 = arith.mulf %211, %215 : vector<24x24xf32>
    %cst_86 = arith.constant dense<0.000000e+00> : vector<24x8xf32>
    %217 = tpu.matmul %216, %204, %cst_86 {dimension_numbers = #tpu.dot_dimension_numbers<[1], [0], [0], [1], [0, 0, 1, 1], [], []>} : vector<24x24xf32>, vector<24x8xf32>, vector<24x8xf32> -> vector<24x8xf32>
    %218 = vector.extract_strided_slice %201 {offsets = [0, 8], sizes = [24, 8], strides = [1, 1]} : vector<24x96xf32> to vector<24x8xf32>
    %219 = vector.extract_strided_slice %201 {offsets = [0, 40], sizes = [24, 8], strides = [1, 1]} : vector<24x96xf32> to vector<24x8xf32>
    %220 = vector.extract_strided_slice %201 {offsets = [0, 72], sizes = [24, 8], strides = [1, 1]} : vector<24x96xf32> to vector<24x8xf32>
    %cst_87 = arith.constant dense<0.000000e+00> : vector<24x24xf32>
    %221 = tpu.matmul %218, %219, %cst_87 {dimension_numbers = #tpu.dot_dimension_numbers<[1], [1], [0], [0], [0, 0, 1, 0], [], []>} : vector<24x8xf32>, vector<24x8xf32>, vector<24x24xf32> -> vector<24x24xf32>
    %222 = arith.addf %221, %34 : vector<24x24xf32>
    %cst_88 = arith.constant dense<0xFF800000> : vector<24xf32>
    %223 = vector.multi_reduction <maximumf>, %222, %cst_88 [1] : vector<24x24xf32> to vector<24xf32>
    %224 = vector.shape_cast %223 : vector<24xf32> to vector<24x1xf32>
    %225 = vector.broadcast %224 : vector<24x1xf32> to vector<24x24xf32>
    %226 = arith.subf %222, %225 : vector<24x24xf32>
    %227 = math.exp %226 : vector<24x24xf32>
    %cst_89 = arith.constant dense<0.000000e+00> : vector<24xf32>
    %228 = vector.multi_reduction <add>, %227, %cst_89 [1] : vector<24x24xf32> to vector<24xf32>
    %229 = vector.shape_cast %228 : vector<24xf32> to vector<24x1xf32>
    %230 = tpu.reciprocal %229 {approx = true} : vector<24x1xf32> -> vector<24x1xf32>
    %231 = vector.broadcast %230 : vector<24x1xf32> to vector<24x24xf32>
    %232 = arith.mulf %227, %231 : vector<24x24xf32>
    %cst_90 = arith.constant dense<0.000000e+00> : vector<24x8xf32>
    %233 = tpu.matmul %232, %220, %cst_90 {dimension_numbers = #tpu.dot_dimension_numbers<[1], [0], [0], [1], [0, 0, 1, 1], [], []>} : vector<24x24xf32>, vector<24x8xf32>, vector<24x8xf32> -> vector<24x8xf32>
    %234 = vector.extract_strided_slice %201 {offsets = [0, 16], sizes = [24, 8], strides = [1, 1]} : vector<24x96xf32> to vector<24x8xf32>
    %235 = vector.extract_strided_slice %201 {offsets = [0, 48], sizes = [24, 8], strides = [1, 1]} : vector<24x96xf32> to vector<24x8xf32>
    %236 = vector.extract_strided_slice %201 {offsets = [0, 80], sizes = [24, 8], strides = [1, 1]} : vector<24x96xf32> to vector<24x8xf32>
    %cst_91 = arith.constant dense<0.000000e+00> : vector<24x24xf32>
    %237 = tpu.matmul %234, %235, %cst_91 {dimension_numbers = #tpu.dot_dimension_numbers<[1], [1], [0], [0], [0, 0, 1, 0], [], []>} : vector<24x8xf32>, vector<24x8xf32>, vector<24x24xf32> -> vector<24x24xf32>
    %238 = arith.addf %237, %34 : vector<24x24xf32>
    %cst_92 = arith.constant dense<0xFF800000> : vector<24xf32>
    %239 = vector.multi_reduction <maximumf>, %238, %cst_92 [1] : vector<24x24xf32> to vector<24xf32>
    %240 = vector.shape_cast %239 : vector<24xf32> to vector<24x1xf32>
    %241 = vector.broadcast %240 : vector<24x1xf32> to vector<24x24xf32>
    %242 = arith.subf %238, %241 : vector<24x24xf32>
    %243 = math.exp %242 : vector<24x24xf32>
    %cst_93 = arith.constant dense<0.000000e+00> : vector<24xf32>
    %244 = vector.multi_reduction <add>, %243, %cst_93 [1] : vector<24x24xf32> to vector<24xf32>
    %245 = vector.shape_cast %244 : vector<24xf32> to vector<24x1xf32>
    %246 = tpu.reciprocal %245 {approx = true} : vector<24x1xf32> -> vector<24x1xf32>
    %247 = vector.broadcast %246 : vector<24x1xf32> to vector<24x24xf32>
    %248 = arith.mulf %243, %247 : vector<24x24xf32>
    %cst_94 = arith.constant dense<0.000000e+00> : vector<24x8xf32>
    %249 = tpu.matmul %248, %236, %cst_94 {dimension_numbers = #tpu.dot_dimension_numbers<[1], [0], [0], [1], [0, 0, 1, 1], [], []>} : vector<24x24xf32>, vector<24x8xf32>, vector<24x8xf32> -> vector<24x8xf32>
    %250 = vector.extract_strided_slice %201 {offsets = [0, 24], sizes = [24, 8], strides = [1, 1]} : vector<24x96xf32> to vector<24x8xf32>
    %251 = vector.extract_strided_slice %201 {offsets = [0, 56], sizes = [24, 8], strides = [1, 1]} : vector<24x96xf32> to vector<24x8xf32>
    %252 = vector.extract_strided_slice %201 {offsets = [0, 88], sizes = [24, 8], strides = [1, 1]} : vector<24x96xf32> to vector<24x8xf32>
    %cst_95 = arith.constant dense<0.000000e+00> : vector<24x24xf32>
    %253 = tpu.matmul %250, %251, %cst_95 {dimension_numbers = #tpu.dot_dimension_numbers<[1], [1], [0], [0], [0, 0, 1, 0], [], []>} : vector<24x8xf32>, vector<24x8xf32>, vector<24x24xf32> -> vector<24x24xf32>
    %254 = arith.addf %253, %34 : vector<24x24xf32>
    %cst_96 = arith.constant dense<0xFF800000> : vector<24xf32>
    %255 = vector.multi_reduction <maximumf>, %254, %cst_96 [1] : vector<24x24xf32> to vector<24xf32>
    %256 = vector.shape_cast %255 : vector<24xf32> to vector<24x1xf32>
    %257 = vector.broadcast %256 : vector<24x1xf32> to vector<24x24xf32>
    %258 = arith.subf %254, %257 : vector<24x24xf32>
    %259 = math.exp %258 : vector<24x24xf32>
    %cst_97 = arith.constant dense<0.000000e+00> : vector<24xf32>
    %260 = vector.multi_reduction <add>, %259, %cst_97 [1] : vector<24x24xf32> to vector<24xf32>
    %261 = vector.shape_cast %260 : vector<24xf32> to vector<24x1xf32>
    %262 = tpu.reciprocal %261 {approx = true} : vector<24x1xf32> -> vector<24x1xf32>
    %263 = vector.broadcast %262 : vector<24x1xf32> to vector<24x24xf32>
    %264 = arith.mulf %259, %263 : vector<24x24xf32>
    %cst_98 = arith.constant dense<0.000000e+00> : vector<24x8xf32>
    %265 = tpu.matmul %264, %252, %cst_98 {dimension_numbers = #tpu.dot_dimension_numbers<[1], [0], [0], [1], [0, 0, 1, 1], [], []>} : vector<24x24xf32>, vector<24x8xf32>, vector<24x8xf32> -> vector<24x8xf32>
    %266 = tpu.concatenate %217, %233, %249, %265 in 1 : vector<24x8xf32>, vector<24x8xf32>, vector<24x8xf32>, vector<24x8xf32> -> vector<24x32xf32>
    %c1_99 = arith.constant 1 : index
    %c0_100 = arith.constant 0 : index
    %c0_101 = arith.constant 0 : index
    %267 = vector.load %arg7[%c1_99, %c0_100, %c0_101] : memref<2x32x96xf32, #tpu.memory_space<vmem>>, vector<1x32x96xf32>
    %268 = vector.shape_cast %267 : vector<1x32x96xf32> to vector<32x96xf32>
    %269 = vector.extract_strided_slice %268 {offsets = [0, 0], sizes = [32, 32], strides = [1, 1]} : vector<32x96xf32> to vector<32x32xf32>
    %cst_102 = arith.constant dense<0.000000e+00> : vector<24x32xf32>
    %270 = tpu.matmul %266, %269, %cst_102 {dimension_numbers = #tpu.dot_dimension_numbers<[1], [0], [0], [1], [0, 0, 1, 1], [], []>} : vector<24x32xf32>, vector<32x32xf32>, vector<24x32xf32> -> vector<24x32xf32>
    %271 = vector.broadcast %189 : vector<1x32xf32> to vector<24x32xf32>
    %272 = arith.addf %270, %271 : vector<24x32xf32>
    %273 = arith.addf %188, %272 : vector<24x32xf32>
    %cst_103 = arith.constant dense<0.000000e+00> : vector<24xf32>
    %274 = vector.multi_reduction <add>, %273, %cst_103 [1] : vector<24x32xf32> to vector<24xf32>
    %275 = vector.shape_cast %274 : vector<24xf32> to vector<24x1xf32>
    %cst_104 = arith.constant 3.200000e+01 : f32
    %276 = vector.broadcast %cst_104 : f32 to vector<24x1xf32>
    %277 = arith.divf %275, %276 : vector<24x1xf32>
    %278 = vector.broadcast %277 : vector<24x1xf32> to vector<24x32xf32>
    %279 = arith.subf %273, %278 : vector<24x32xf32>
    %280 = arith.mulf %279, %279 : vector<24x32xf32>
    %cst_105 = arith.constant dense<0.000000e+00> : vector<24xf32>
    %281 = vector.multi_reduction <add>, %280, %cst_105 [1] : vector<24x32xf32> to vector<24xf32>
    %282 = vector.shape_cast %281 : vector<24xf32> to vector<24x1xf32>
    %cst_106 = arith.constant 3.200000e+01 : f32
    %283 = vector.broadcast %cst_106 : f32 to vector<24x1xf32>
    %284 = arith.divf %282, %283 : vector<24x1xf32>
    %285 = vector.broadcast %277 : vector<24x1xf32> to vector<24x32xf32>
    %286 = arith.subf %273, %285 : vector<24x32xf32>
    %cst_107 = arith.constant 9.99999996E-13 : f32
    %287 = vector.broadcast %cst_107 : f32 to vector<24x1xf32>
    %288 = arith.addf %284, %287 : vector<24x1xf32>
    %289 = math.rsqrt %288 : vector<24x1xf32>
    %290 = vector.broadcast %289 : vector<24x1xf32> to vector<24x32xf32>
    %291 = arith.mulf %286, %290 : vector<24x32xf32>
    %292 = vector.broadcast %190 : vector<1x32xf32> to vector<24x32xf32>
    %293 = arith.mulf %291, %292 : vector<24x32xf32>
    %294 = vector.broadcast %191 : vector<1x32xf32> to vector<24x32xf32>
    %295 = arith.addf %293, %294 : vector<24x32xf32>
    %296 = vector.extract_strided_slice %268 {offsets = [0, 32], sizes = [32, 64], strides = [1, 1]} : vector<32x96xf32> to vector<32x64xf32>
    %cst_108 = arith.constant dense<0.000000e+00> : vector<24x64xf32>
    %297 = tpu.matmul %295, %296, %cst_108 {dimension_numbers = #tpu.dot_dimension_numbers<[1], [0], [0], [1], [0, 0, 1, 1], [], []>} : vector<24x32xf32>, vector<32x64xf32>, vector<24x64xf32> -> vector<24x64xf32>
    %c1_109 = arith.constant 1 : index
    %c0_110 = arith.constant 0 : index
    %c0_111 = arith.constant 0 : index
    %298 = vector.load %arg8[%c1_109, %c0_110, %c0_111] : memref<2x1x64xf32, #tpu.memory_space<vmem>>, vector<1x1x64xf32>
    %299 = vector.shape_cast %298 : vector<1x1x64xf32> to vector<1x64xf32>
    %300 = vector.broadcast %299 : vector<1x64xf32> to vector<24x64xf32>
    %301 = arith.addf %297, %300 : vector<24x64xf32>
    %302 = arith.mulf %301, %301 : vector<24x64xf32>
    %303 = arith.mulf %301, %302 : vector<24x64xf32>
    %cst_112 = arith.constant 4.471500e-02 : f32
    %304 = vector.broadcast %cst_112 : f32 to vector<24x64xf32>
    %305 = arith.mulf %304, %303 : vector<24x64xf32>
    %306 = arith.addf %301, %305 : vector<24x64xf32>
    %cst_113 = arith.constant 0.797884583 : f32
    %307 = vector.broadcast %cst_113 : f32 to vector<24x64xf32>
    %308 = arith.mulf %307, %306 : vector<24x64xf32>
    %309 = math.tanh %308 : vector<24x64xf32>
    %cst_114 = arith.constant 1.000000e+00 : f32
    %310 = vector.broadcast %cst_114 : f32 to vector<24x64xf32>
    %311 = arith.addf %310, %309 : vector<24x64xf32>
    %cst_115 = arith.constant 5.000000e-01 : f32
    %312 = vector.broadcast %cst_115 : f32 to vector<24x64xf32>
    %313 = arith.mulf %312, %311 : vector<24x64xf32>
    %314 = arith.mulf %301, %313 : vector<24x64xf32>
    %c1_116 = arith.constant 1 : index
    %c0_117 = arith.constant 0 : index
    %c0_118 = arith.constant 0 : index
    %315 = vector.load %arg9[%c1_116, %c0_117, %c0_118] : memref<2x64x32xf32, #tpu.memory_space<vmem>>, vector<1x64x32xf32>
    %316 = vector.shape_cast %315 : vector<1x64x32xf32> to vector<64x32xf32>
    %cst_119 = arith.constant dense<0.000000e+00> : vector<24x32xf32>
    %317 = tpu.matmul %314, %316, %cst_119 {dimension_numbers = #tpu.dot_dimension_numbers<[1], [0], [0], [1], [0, 0, 1, 1], [], []>} : vector<24x64xf32>, vector<64x32xf32>, vector<24x32xf32> -> vector<24x32xf32>
    %318 = vector.broadcast %192 : vector<1x32xf32> to vector<24x32xf32>
    %319 = arith.addf %317, %318 : vector<24x32xf32>
    %320 = arith.addf %295, %319 : vector<24x32xf32>
    %cst_120 = arith.constant dense<0.000000e+00> : vector<24xf32>
    %321 = vector.multi_reduction <add>, %320, %cst_120 [1] : vector<24x32xf32> to vector<24xf32>
    %322 = vector.shape_cast %321 : vector<24xf32> to vector<24x1xf32>
    %cst_121 = arith.constant 3.200000e+01 : f32
    %323 = vector.broadcast %cst_121 : f32 to vector<24x1xf32>
    %324 = arith.divf %322, %323 : vector<24x1xf32>
    %325 = vector.broadcast %324 : vector<24x1xf32> to vector<24x32xf32>
    %326 = arith.subf %320, %325 : vector<24x32xf32>
    %327 = arith.mulf %326, %326 : vector<24x32xf32>
    %cst_122 = arith.constant dense<0.000000e+00> : vector<24xf32>
    %328 = vector.multi_reduction <add>, %327, %cst_122 [1] : vector<24x32xf32> to vector<24xf32>
    %329 = vector.shape_cast %328 : vector<24xf32> to vector<24x1xf32>
    %cst_123 = arith.constant 3.200000e+01 : f32
    %330 = vector.broadcast %cst_123 : f32 to vector<24x1xf32>
    %331 = arith.divf %329, %330 : vector<24x1xf32>
    %332 = vector.broadcast %324 : vector<24x1xf32> to vector<24x32xf32>
    %333 = arith.subf %320, %332 : vector<24x32xf32>
    %cst_124 = arith.constant 9.99999996E-13 : f32
    %334 = vector.broadcast %cst_124 : f32 to vector<24x1xf32>
    %335 = arith.addf %331, %334 : vector<24x1xf32>
    %336 = math.rsqrt %335 : vector<24x1xf32>
    %337 = vector.broadcast %336 : vector<24x1xf32> to vector<24x32xf32>
    %338 = arith.mulf %333, %337 : vector<24x32xf32>
    %339 = vector.broadcast %193 : vector<1x32xf32> to vector<24x32xf32>
    %340 = arith.mulf %338, %339 : vector<24x32xf32>
    %341 = vector.broadcast %194 : vector<1x32xf32> to vector<24x32xf32>
    %342 = arith.addf %340, %341 : vector<24x32xf32>
    %c24 = arith.constant 24 : index
    %c0_125 = arith.constant 0 : index
    %343 = vector.load %arg0[%c24, %c0_125] : memref<40x1xi32, #tpu.memory_space<vmem>>, vector<16x1xi32>
    %344 = tpu.iota {dimensions = array<i32: 1>} : vector<16x24xi32>
    %345 = vector.broadcast %343 : vector<16x1xi32> to vector<16x24xi32>
    %346 = arith.cmpi eq, %344, %345 : vector<16x24xi32>
    %347 = arith.extui %346 : vector<16x24xi1> to vector<16x24xi32>
    %348 = arith.sitofp %347 : vector<16x24xi32> to vector<16x24xf32>
    %cst_126 = arith.constant dense<0.000000e+00> : vector<16x32xf32>
    %349 = tpu.matmul %348, %342, %cst_126 {dimension_numbers = #tpu.dot_dimension_numbers<[1], [0], [0], [1], [0, 0, 1, 1], [], []>} : vector<16x24xf32>, vector<24x32xf32>, vector<16x32xf32> -> vector<16x32xf32>
    %c0_127 = arith.constant 0 : index
    %c0_128 = arith.constant 0 : index
    %350 = vector.load %arg10[%c0_127, %c0_128] : memref<16x32xf32, #tpu.memory_space<vmem>>, vector<16x32xf32>
    tpu.vector_store %arg10[%c0_127, %c0_128], %349 {strides = array<i32>} : memref<16x32xf32, #tpu.memory_space<vmem>>, vector<16x32xf32>,
    return
  }
}

</mosaic_0001>

<bundles_post_ra>
// kernel: tpu_custom_call.1
= control target key start
LH: loop header
LB: loop body
LE: loop exit
PB: predicated region body
PF: predicated region fallthrough
CT: control target
= control target key end

     0   :  { %v4614_v2 = vmov 0   ;;  %v4615_v9 = vmov 0.0|0.0   ;;  %vm4616_vm0 = vmmov 0   ;;  %v4617_v10 = vmov 0.0   ;;  %s5759_s0 = inlined_call_operand.vmem [shape: s32[40,1], index: 0, kind: input, shape index: {}]   ;;  %s5760_s1 = inlined_call_operand.vmem [shape: f32[24,24], index: 1, kind: input, shape index: {}]   ;;  %s5761_s2 = inlined_call_operand.vmem [shape: f32[24,32], index: 2, kind: input, shape index: {}]   ;;  %s5762_s3 = inlined_call_operand.vmem [shape: f32[100,32], index: 3, kind: input, shape index: {}]   ;;  %s5763_s4 = inlined_call_operand.vmem [shape: f32[14,32], index: 4, kind: input, shape index: {}]   ;;  %s5764_s5 = inlined_call_operand.vmem [shape: f32[2,32,96], index: 5, kind: input, shape index: {}]   ;;  %s5765_s6 = inlined_call_operand.vmem [shape: f32[2,1,96], index: 6, kind: input, shape index: {}]   ;;  %s5766_s7 = inlined_call_operand.vmem [shape: f32[2,32,96], index: 7, kind: input, shape index: {}]   ;;  %s5767_s8 = inlined_call_operand.vmem [shape: f32[2,1,64], index: 8, kind: input, shape index: {}]   ;;  %s5768_s9 = inlined_call_operand.vmem [shape: f32[2,64,32], index: 9, kind: input, shape index: {}]   ;;  %s5769_s10 = inlined_call_operand.hbm [shape: f32[16,32], index: 10, kind: output, shape index: {}]  }
   0x1   :  { %v36_v0 = vld [vmem:[%s5759_s0] sm:$0xff]  ;;  %v38_v1 = vld [vmem:[%s5759_s0 + $0x10] sm:$0xff]  ;;  %4347 = vset.pattern.permute.xlu0 %v4614_v2  ;;  %4348 = vset.pattern.permute.xlu1 %v4614_v2  ;;  %v60_v4 = vld [vmem:[%s5762_s3 + $0x8] sm:$0xff] }
   0x2   :  { %v59_v3 = vld [vmem:[%s5762_s3] sm:$0xff]  ;;  %v61_v5 = vld [vmem:[%s5762_s3 + $0x10] sm:$0xff]  ;;  %42 = vperm.xlu0 %4347, %v36_v0   ;;  %48 = vperm.xlu1 %4348, %v38_v1   ;;  %v62_v7 = vld [vmem:[%s5762_s3 + $0x18] sm:$0xff] }
   0x3   :  { %v4186_v6 = vpack.c.bf16 %v60_v4, %v59_v3  ;;  %v37_v8 = vld [vmem:[%s5759_s0 + $0x8] sm:$0xff]  ;;  %4185 = vmatprep.subr.bf16.mxu0 %v4615_v9  ;;  %3775 = vmatprep.mubr.msk.f32.mxu0 %vm4616_vm0, %v4617_v10  ;;  %v4189_v11 = vpack.c.bf16 %v62_v7, %v61_v5  ;;  %v63_v12 = vld [vmem:[%s5762_s3 + $0x20] sm:$0xff] }
   0x4   :  { %4203 = vmatprep.subr.bf16.mxu1 %v4615_v9  ;;  %v64_v13 = vld [vmem:[%s5762_s3 + $0x28] sm:$0xff]  ;;  %3792 = vmatprep.mubr.msk.f32.mxu1 %vm4616_vm0, %v4617_v10 }
   0x5   :  { %4187 = vmatpush3.bf16.msra.mxu0 %v4186_v6 }
   0x6   :  { %4188 = vmatprep.subr.bf16.mxu0 %v4615_v9 }
   0x7   :  { %15 = vsyncpa [#allocation3], 0  ;;  %45 = vperm.xlu0 %4347, %v37_v8   ;;  %v4192_v14 = vpack.c.bf16 %v64_v13, %v63_v12  ;;  %v65_v15 = vld [vmem:[%s5762_s3 + $0x30] sm:$0xff]  ;;  %v66_v16 = vld [vmem:[%s5762_s3 + $0x38] sm:$0xff]  ;;  %vm85_vm1 = vcmask 1043456   ;;  %v39_v25 = vlaneseq  ;;  %vm75_vm2 = vcmask 818176  }
   0x8   :  { %v4195_v17 = vpack.c.bf16 %v66_v16, %v65_v15  ;;  %v67_v18 = vld [vmem:[%s5762_s3 + $0x40] sm:$0xff]  ;;  %v68_v19 = vld [vmem:[%s5762_s3 + $0x48] sm:$0xff]  ;;  %v69_v21 = vld [vmem:[%s5762_s3 + $0x50] sm:$0xff]  ;;  %vm171_vm6 = vcmask 261120   ;;  %s4618_s23 = smov 96   ;;  %s4619_s24 = smov 88  }
   0x9   :  { %4190 = vmatpush3.bf16.msra.mxu0 %v4189_v11  ;;  %v4198_v20 = vpack.c.bf16 %v68_v19, %v67_v18  ;;  %v70_v22 = vld [vmem:[%s5762_s3 + $0x58] sm:$0xff]  ;;  %v71_v24 = vld [vmem:[%s5762_s3 + $0x60] sm:$0xf]  ;;  %v4750_v26 = vand.u32 127, %v39_v25  ;;  %v73_v37 = vld [vmem:[%s5761_s2 + $0x8] sm:$0xff]  ;;  %s4620_s3 = smov 120  }
   0xa   :  { %4191 = vmatprep.subr.bf16.mxu0 %v4615_v9  ;;  %v4201_v23 = vpack.c.bf16 %v70_v22, %v69_v21  ;;  %v72_v33 = vld [vmem:[%s5761_s2] sm:$0xff]  ;;  %v74_v42 = vld [vmem:[%s5761_s2 + $0x10] sm:$0xff]  ;;  %v236_v0 = vld [vmem:[%s5764_s5 + $0x8] sm:$0xff]  ;;  %s4621_s25 = smov 80   ;;  %s4622_s26 = smov 112   ;;  %vm344_vm7 = vcmask 64512  }
   0xb   :  { %v235_v63 = vld [vmem:[%s5764_s5] sm:$0xff]  ;;  %v237_v2 = vld [vmem:[%s5764_s5 + $0x10] sm:$0xff]  ;;  %v238_v3 = vld [vmem:[%s5764_s5 + $0x18] sm:$0xff]  ;;  %s4623_s27 = smov 64   ;;  %s4624_s28 = smov 56   ;;  %vm437_vm9 = vcmask 195584  }
   0xc   :  { %v4204_v1 = vpack.c.bf16 %v236_v0, %v235_v63  ;;  %v4207_v4 = vpack.c.bf16 %v238_v3, %v237_v2  ;;  %v3433_v19 = vld [vmem:[%s5763_s4 + $0x1] ss:$0 sm:$0xff]  ;;  %s4625_s29 = smov 72   ;;  %vm4864_vm8 = vmpackc.low %vm344_vm7, %vm344_vm7  ;;  %s4626_s15 = smov 48   ;;  %vm1313_vm10 = vcmask 130048   ;;  %vm1624_vm11 = vcmask 523264  }
   0xd   :  { %4193 = vmatpush3.bf16.msra.mxu0 %v4192_v14  ;;  %s4627_s16 = smov 104   ;;  %s4628_s17 = smov 40  }
   0xe   :  { %4194 = vmatprep.subr.bf16.mxu0 %v4615_v9  ;;  %4205 = vmatpush3.bf16.msra.mxu1 %v4204_v1  ;;  %s4629_s18 = smov 8   ;;  %s4630_s19 = smov 16  }
   0xf   :  { %4206 = vmatprep.subr.bf16.mxu1 %v4615_v9  ;;  %s4631_s14 = smov 24  }
  0x11   :  { %4196 = vmatpush3.bf16.msra.mxu0 %v4195_v17  ;;  %v3432_v17 = vld [vmem:[%s5763_s4] ss:$0 sm:$0xff] }
  0x12   :  { %4197 = vmatprep.subr.bf16.mxu0 %v4615_v9  ;;  %4208 = vmatpush3.bf16.msra.mxu1 %v4207_v4 }
  0x13   :  { %4209 = vmatprep.subr.bf16.mxu1 %v4615_v9 }
  0x15   :  { %4199 = vmatpush3.bf16.msra.mxu0 %v4198_v20 }
  0x16   :  { %4200 = vmatprep.subr.bf16.mxu0 %v4615_v9 }
  0x19   :  { %4202 = vmatpush3.bf16.msra.mxu0 %v4201_v23 }
  0x1a   :  { %3773 = vmatprep.subr.mxu0 %v4617_v10 }
  0x1d   :  { %3774 = vmatpush3.msk.msra.mxu0 %vm85_vm1, %v71_v24 }
  0x1e   :  { %4216 = vmatprep.subr.bf16.mxu0 %v4615_v9 }
  0x81   :  { %v43_v27 = vpop.permute.xlu0 %42  ;;  %v49_v29 = vpop.permute.xlu1 %48 }
  0x82   :  { %vm50_vm3 = vcmp.eq.s32.totalorder %v4750_v26, %v43_v27  ;;  %vm52_vm5 = vcmp.eq.s32.totalorder %v4750_v26, %v49_v29 }
  0x83   :  { %v3425_v28 = vsel %vm50_vm3, 1.0, %v4617_v10  ;;  %v3427_v32 = vsel %vm52_vm5, 1.0, %v4617_v10 }
  0x84   :  { %3776 = vmatmul.mubr.msk.f32.vlgmr.msra.gmra.mrb[0].mxu0 %vm75_vm2, %v3425_v28 }
  0x85   :  { %3778 = vmatprep.mubr.msk.f32.mxu0 %vm4616_vm0, %v4617_v10 }
  0x86   :  { %v46_v30 = vpop.permute.xlu0 %45 }
  0x87   :  { %vm51_vm4 = vcmp.eq.s32.totalorder %v4750_v26, %v46_v30 }
  0x88   :  { %v3426_v31 = vsel %vm51_vm4, 1.0, %v4617_v10 }
  0x89   :  { %3779 = vmatmul.mubr.msk.f32.gmra.mrb[2].mxu0 %vm75_vm2, %v3426_v31 }
  0x8a   :  { %3781 = vmatprep.mubr.msk.f32.mxu0 %vm4616_vm0, %v4617_v10 }
  0x8d   :  { %3782 = vmatmul.mubr.msk.f32.gmra.mrb[4].mxu0 %vm75_vm2, %v3427_v32 }
  0x8e   :  { %3837 = vmatprep.mubr.msk.f32.mxu0 %vm4616_vm0, %v4617_v10 }
 0x157   :  { %v155_v34 = vpop.f32.mrb[0].mxu0 }
 0x158   :  { %v156_v35 = vadd.f32 %v155_v34, %v72_v33  ;;  %v3777_v36 = vpop.f32.mrb[1].mxu0  ;;  %v3434_v33 = vld [vmem:[%s5765_s6] ss:$0 sm:$0xff] }
 0x15a   :  { %v172_v38 = vsel %vm171_vm6, %v156_v35, 0.0 }
 0x15b   :  { %173 = vadd.xlane.f32.xlu1 %v172_v38 }
 0x15c   :  { %v160_v39 = vpop.f32.mrb[2].mxu0 }
 0x15d   :  { %v161_v40 = vadd.f32 %v160_v39, %v73_v37  ;;  %v3780_v41 = vpop.f32.mrb[3].mxu0 }
 0x15f   :  { %v175_v43 = vsel %vm171_vm6, %v161_v40, 0.0 }
 0x160   :  { %176 = vadd.xlane.f32.xlu0 %v175_v43  ;;  %v165_v44 = vpop.f32.mrb[4].mxu0 }
 0x161   :  { %v166_v45 = vadd.f32 %v165_v44, %v74_v42  ;;  %v3783_v46 = vpop.f32.mrb[5].mxu0 }
 0x163   :  { %v178_v47 = vsel %vm171_vm6, %v166_v45, 0.0 }
 0x164   :  { %179 = vadd.xlane.f32.xlu0 %v178_v47 }
 0x1e8   :  { %v174_v48 = vpop.xlane.xlu1 %173 }
 0x1e9   :  { %v182_v49 = vmul.f32 0.03125, %v174_v48 }
 0x1eb   :  { %v185_v50 = vsub.f32 %v156_v35, %v182_v49 }
 0x1ed   :  { %v177_v51 = vpop.xlane.xlu0 %176  ;;  %v188_v53 = vmul.f32 %v185_v50, %v185_v50 }
 0x1ee   :  { %v183_v52 = vmul.f32 0.03125, %v177_v51 }
 0x1ef   :  { %v191_v55 = vsel %vm171_vm6, %v188_v53, 0.0 }
 0x1f0   :  { %v186_v54 = vsub.f32 %v161_v40, %v183_v52  ;;  %192 = vadd.xlane.f32.xlu1 %v191_v55 }
 0x1f1   :  { %v180_v56 = vpop.xlane.xlu0 %179 }
 0x1f2   :  { %v184_v57 = vmul.f32 0.03125, %v180_v56  ;;  %v189_v58 = vmul.f32 %v186_v54, %v186_v54 }
 0x1f4   :  { %v187_v59 = vsub.f32 %v166_v45, %v184_v57  ;;  %v194_v60 = vsel %vm171_vm6, %v189_v58, 0.0 }
 0x1f5   :  { %195 = vadd.xlane.f32.xlu0 %v194_v60 }
 0x1f6   :  { %v190_v61 = vmul.f32 %v187_v59, %v187_v59 }
 0x1f8   :  { %v197_v62 = vsel %vm171_vm6, %v190_v61, 0.0 }
 0x1f9   :  { %198 = vadd.xlane.f32.xlu1 %v197_v62 }
 0x27d   :  { %v193_v5 = vpop.xlane.xlu1 %192 }
 0x27e   :  { %v200_v6 = vmul.f32 0.03125, %v193_v5 }
 0x280   :  { %v203_v7 = vadd.f32 1e-12, %v200_v6 }
 0x282   :  { %v196_v8 = vpop.xlane.xlu0 %195  ;;  %4449 = vrsqrt.f32 %v203_v7 }
 0x283   :  { %v201_v11 = vmul.f32 0.03125, %v196_v8 }
 0x285   :  { %v204_v12 = vadd.f32 1e-12, %v201_v11 }
 0x286   :  { %v199_v13 = vpop.xlane.xlu1 %198 }
 0x287   :  { %4451 = vrsqrt.f32 %v204_v12  ;;  %v202_v14 = vmul.f32 0.03125, %v199_v13  ;;  %v4926_v12 = vld [vmem:[%s5760_s1] sm:$0xff] }
 0x289   :  { %v205_v15 = vadd.f32 1e-12, %v202_v14 }
 0x28b   :  { %4453 = vrsqrt.f32 %v205_v15 }
 0x28c   :  { %v4450_v16 = vpop.eup %4449 }
 0x28d   :  { %v209_v18 = vmul.f32 %v4450_v16, %v185_v50  ;;  %v4932_v16 = vld [vmem:[%s5760_s1 + $0x8] sm:$0xff] }
 0x28f   :  { %v216_v20 = vmul.f32 %v3432_v17, %v209_v18 }
 0x291   :  { %v4452_v21 = vpop.eup %4451  ;;  %v4799_v22 = vadd.f32 %v3433_v19, %v216_v20 }
 0x292   :  { %v210_v23 = vmul.f32 %v4452_v21, %v186_v54 }
 0x293   :  { %3793 = vmatmul.mubr.msk.f32.vlgmr.msra.gmra.mrb[0].mxu1 %vm171_vm6, %v4799_v22 }
 0x294   :  { %v217_v24 = vmul.f32 %v3432_v17, %v210_v23  ;;  %3795 = vmatprep.mubr.msk.f32.mxu1 %vm4616_vm0, %v4617_v10 }
 0x295   :  { %v4454_v25 = vpop.eup %4453 }
 0x296   :  { %v4805_v27 = vadd.f32 %v3433_v19, %v217_v24  ;;  %v211_v28 = vmul.f32 %v4454_v25, %v187_v59 }
 0x298   :  { %3796 = vmatmul.mubr.msk.f32.gmra.mrb[2].mxu1 %vm171_vm6, %v4805_v27  ;;  %v218_v29 = vmul.f32 %v3432_v17, %v211_v28 }
 0x299   :  { %3798 = vmatprep.mubr.msk.f32.mxu1 %vm4616_vm0, %v4617_v10 }
 0x29a   :  { %v4811_v30 = vadd.f32 %v3433_v19, %v218_v29 }
 0x29c   :  { %3799 = vmatmul.mubr.msk.f32.gmra.mrb[4].mxu1 %vm171_vm6, %v4811_v30 }
 0x29d   :  { %3807 = vmatprep.mubr.msk.f32.mxu1 %vm4616_vm0, %v4617_v10 }
 0x366   :  { %v321_v31 = vpop.f32.mrb[0].mxu1 }
 0x367   :  { %v3794_v32 = vpop.f32.mrb[1].mxu1  ;;  %v4820_v35 = vadd.f32 %v3434_v33, %v321_v31 }
 0x368   :  { %v4942_v32 = vld [vmem:[%s5760_s1 + $0x10] sm:$0xff] }
 0x36b   :  { %v326_v34 = vpop.f32.mrb[2].mxu1 }
 0x36c   :  { %v4822_v36 = vadd.f32 %v3434_v33, %v326_v34  ;;  %v3797_v37 = vpop.f32.mrb[3].mxu1 }
 0x36e   :  { %v4826_v38 = vpack.i.bf16 %v4822_v36, %v4820_v35 }
 0x36f   :  { %v331_v39 = vpop.f32.mrb[4].mxu1 }
 0x370   :  { %v4828_v40 = vadd.f32 %v3434_v33, %v331_v39  ;;  %4350 = vrot.lane.b32.xlu0 %v4826_v38, %s4618_s23  ;;  %v3800_v41 = vpop.f32.mrb[5].mxu1 }
 0x372   :  { %342 = vrot.lane.b32.xlu1 %v4828_v40, %s4618_s23 }
 0x374   :  { %579 = vrot.lane.b32.xlu0 %v4828_v40, %s4619_s24 }
 0x376   :  { %4355 = vrot.lane.b32.xlu1 %v4826_v38, %s4619_s24 }
 0x378   :  { %569 = vrot.lane.b32.xlu0 %v4820_v35, %s4620_s3 }
 0x37a   :  { %4360 = vrot.lane.b32.xlu1 %v4826_v38, %s4621_s25 }
 0x37c   :  { %573 = vrot.lane.b32.xlu0 %v4828_v40, %s4620_s3 }
 0x37e   :  { %571 = vrot.lane.b32.xlu1 %v4822_v36, %s4620_s3 }
 0x380   :  { %804 = vrot.lane.b32.xlu0 %v4820_v35, %s4622_s26 }
 0x382   :  { %814 = vrot.lane.b32.xlu1 %v4828_v40, %s4621_s25 }
 0x384   :  { %808 = vrot.lane.b32.xlu0 %v4828_v40, %s4622_s26 }
 0x386   :  { %806 = vrot.lane.b32.xlu1 %v4822_v36, %s4622_s26 }
 0x388   :  { %4365 = vrot.lane.b32.xlu0 %v4826_v38, %s4623_s27 }
 0x38a   :  { %4370 = vrot.lane.b32.xlu1 %v4826_v38, %s4624_s28 }
 0x38c   :  { %4375 = vrot.lane.b32.xlu0 %v4826_v38, %s4625_s29 }
 0x38e   :  { %475 = vrot.lane.b32.xlu1 %v4828_v40, %s4623_s27 }
 0x3e2   :  { %v4351_v42 = vpop.permute.xlu0 %4350 }
 0x3e3   :  { %v4353_v43 = vunpack.i.h.bf16 %v4351_v42  ;;  %v4352_v44 = vunpack.i.l.bf16 %v4351_v42 }
 0x3e4   :  { %v343_v45 = vpop.permute.xlu1 %342 }
 0x3e5   :  { %v4210_v47 = vpack.c.bf16 %v4353_v43, %v4352_v44 }
 0x3e6   :  { %v580_v48 = vpop.permute.xlu0 %579 }
 0x3e7   :  { %4212 = vmatpush3.bf16.xpose.msk.msra.mxu1 %vm4864_vm8, %v4210_v47 }
 0x3e8   :  { %v4356_v49 = vpop.permute.xlu1 %4355  ;;  %3805 = vmatprep.subr.mxu1 %v4617_v10 }
 0x3e9   :  { %v4358_v50 = vunpack.i.h.bf16 %v4356_v49  ;;  %v4357_v51 = vunpack.i.l.bf16 %v4356_v49 }
 0x3ea   :  { %v570_v52 = vpop.permute.xlu0 %569 }
 0x3eb   :  { %v4217_v53 = vpack.c.bf16 %v4358_v50, %v4357_v51 }
 0x3ec   :  { %v4361_v54 = vpop.permute.xlu1 %4360 }
 0x3ed   :  { %4219 = vmatpush3.bf16.xpose.msk.msra.mxu0 %vm4864_vm8, %v4217_v53  ;;  %v4363_v58 = vunpack.i.h.bf16 %v4361_v54  ;;  %v4362_v59 = vunpack.i.l.bf16 %v4361_v54 }
 0x3ee   :  { %v574_v55 = vpop.permute.xlu0 %573  ;;  %3835 = vmatprep.subr.mxu0 %v4617_v10 }
 0x3ef   :  { %3806 = vmatpush3.xpose.msk.msra.mxu1 %vm344_vm7, %v343_v45  ;;  %v4224_v62 = vpack.c.bf16 %v4363_v58, %v4362_v59 }
 0x3f0   :  { %v572_v56 = vpop.permute.xlu1 %571  ;;  %4213 = vmatprep.subr.bf16.mxu1 %v4615_v9 }
 0x3f2   :  { %v805_v57 = vpop.permute.xlu0 %804  ;;  %3808 = vmatmul.mubr.msk.f32.vlgmr.msra.gmra.mrb[6].mxu1 %vm344_vm7, %v4820_v35 }
 0x3f3   :  { %3810 = vmatprep.mubr.msk.f32.mxu1 %vm4616_vm0, %v4617_v10 }
 0x3f4   :  { %v815_v60 = vpop.permute.xlu1 %814 }
 0x3f5   :  { %3836 = vmatpush3.xpose.msk.msra.mxu0 %vm344_vm7, %v580_v48 }
 0x3f6   :  { %v809_v61 = vpop.permute.xlu0 %808  ;;  %3811 = vmatmul.mubr.msk.f32.gmra.mrb[8].mxu1 %vm344_vm7, %v4822_v36  ;;  %4223 = vmatprep.subr.bf16.mxu0 %v4615_v9 }
 0x3f7   :  { %3813 = vmatprep.mubr.msk.f32.mxu1 %vm4616_vm0, %v4617_v10 }
 0x3f8   :  { %v807_v63 = vpop.permute.xlu1 %806  ;;  %3838 = vmatmul.mubr.msk.f32.vlgmr.msra.gmra.mrb[6].mxu0 %vm344_vm7, %v570_v52 }
 0x3f9   :  { %4226 = vmatpush3.bf16.xpose.msk.msra.mxu0 %vm4864_vm8, %v4224_v62  ;;  %3840 = vmatprep.mubr.msk.f32.mxu0 %vm4616_vm0, %v4617_v10 }
 0x3fa   :  { %v4366_v0 = vpop.permute.xlu0 %4365  ;;  %3814 = vmatmul.mubr.msk.f32.gmra.mrb[10].mxu1 %vm344_vm7, %v4828_v40  ;;  %3865 = vmatprep.subr.mxu0 %v4617_v10 }
 0x3fb   :  { %v4368_v1 = vunpack.i.h.bf16 %v4366_v0  ;;  %v4367_v2 = vunpack.i.l.bf16 %v4366_v0  ;;  %3822 = vmatprep.mubr.msk.f32.mxu1 %vm4616_vm0, %v4617_v10 }
 0x3fc   :  { %v4896_v3 = vpop.permute.xlu1 %4370  ;;  %3841 = vmatmul.mubr.msk.f32.gmra.mrb[8].mxu0 %vm344_vm7, %v572_v56 }
 0x3fd   :  { %v4214_v4 = vpack.c.bf16 %v4368_v1, %v4367_v2  ;;  %3843 = vmatprep.mubr.msk.f32.mxu0 %vm4616_vm0, %v4617_v10 }
 0x3fe   :  { %v4376_v5 = vpop.permute.xlu0 %4375 }
 0x3ff   :  { %v4378_v6 = vunpack.i.h.bf16 %v4376_v5  ;;  %v4377_v7 = vunpack.i.l.bf16 %v4376_v5  ;;  %4215 = vmatpush3.bf16.msra.mxu1 %v4214_v4 }
 0x400   :  { %3844 = vmatmul.mubr.msk.f32.gmra.mrb[10].mxu0 %vm344_vm7, %v574_v55  ;;  %3820 = vmatprep.subr.mxu1 %v4617_v10  ;;  %v476_v8 = vpop.permute.xlu1 %475 }
 0x401   :  { %3866 = vmatpush3.xpose.msk.msra.mxu0 %vm344_vm7, %v815_v60  ;;  %3867 = vmatprep.mubr.msk.f32.mxu0 %vm4616_vm0, %v4617_v10  ;;  %v4907_v11 = vpack.c.bf16 %v4378_v6, %v4377_v7 }
 0x402   :  { %4230 = vmatprep.subr.bf16.mxu0 %v4615_v9 }
 0x403   :  { %3821 = vmatpush3.msra.mxu1 %v476_v8 }
 0x404   :  { %3868 = vmatmul.mubr.msk.f32.vlgmr.msra.gmra.mrb[12].mxu0 %vm344_vm7, %v805_v57  ;;  %4220 = vmatprep.subr.bf16.mxu1 %v4615_v9 }
 0x405   :  { %4233 = vmatpush3.bf16.xpose.msk.msra.mxu0 %vm4864_vm8, %v4907_v11  ;;  %3870 = vmatprep.mubr.msk.f32.mxu0 %vm4616_vm0, %v4617_v10 }
 0x406   :  { %3895 = vmatprep.subr.mxu0 %v4617_v10 }
 0x408   :  { %3871 = vmatmul.mubr.msk.f32.gmra.mrb[14].mxu0 %vm344_vm7, %v807_v63 }
 0x409   :  { %3873 = vmatprep.mubr.msk.f32.mxu0 %vm4616_vm0, %v4617_v10 }
 0x40c   :  { %3874 = vmatmul.mubr.msk.f32.gmra.mrb[16].mxu0 %vm344_vm7, %v809_v61 }
 0x40d   :  { %3897 = vmatprep.mubr.msk.f32.mxu0 %vm4616_vm0, %v4617_v10 }
 0x4c5   :  { %v423_v13 = vpop.f32.mrb[6].mxu1 }
 0x4c6   :  { %v424_v14 = vadd.f32 %v423_v13, %v4926_v12  ;;  %v3809_v15 = vpop.f32.mrb[7].mxu1 }
 0x4c8   :  { %v438_v17 = vsel %vm437_vm9, %v424_v14, -inf }
 0x4c9   :  { %439 = vmax.xlane.f32.xlu1 %v438_v17  ;;  %v428_v18 = vpop.f32.mrb[8].mxu1 }
 0x4ca   :  { %v429_v19 = vadd.f32 %v428_v18, %v4932_v16  ;;  %v3812_v20 = vpop.f32.mrb[9].mxu1 }
 0x4cb   :  { %v659_v21 = vpop.f32.mrb[6].mxu0 }
 0x4cc   :  { %v660_v23 = vadd.f32 %v659_v21, %v4926_v12  ;;  %v3839_v24 = vpop.f32.mrb[7].mxu0  ;;  %v441_v25 = vsel %vm437_vm9, %v429_v19, -inf }
 0x4cd   :  { %442 = vmax.xlane.f32.xlu0 %v441_v25  ;;  %v433_v28 = vpop.f32.mrb[10].mxu1 }
 0x4ce   :  { %v3815_v29 = vpop.f32.mrb[11].mxu1  ;;  %v673_v31 = vsel %vm437_vm9, %v660_v23, -inf  ;;  %v434_v39 = vadd.f32 %v433_v28, %v4942_v32 }
 0x4cf   :  { %674 = vmax.xlane.f32.xlu1 %v673_v31  ;;  %v664_v33 = vpop.f32.mrb[8].mxu0 }
 0x4d0   :  { %v665_v34 = vadd.f32 %v664_v33, %v4932_v16  ;;  %v3842_v37 = vpop.f32.mrb[9].mxu0  ;;  %v444_v45 = vsel %vm437_vm9, %v434_v39, -inf }
 0x4d2   :  { %v676_v41 = vsel %vm437_vm9, %v665_v34, -inf }
 0x4d3   :  { %677 = vmax.xlane.f32.xlu0 %v676_v41  ;;  %v669_v42 = vpop.f32.mrb[10].mxu0 }
 0x4d4   :  { %v4948_v43 = vadd.f32 %v669_v42, %v4942_v32  ;;  %v3845_v44 = vpop.f32.mrb[11].mxu0 }
 0x4d6   :  { %v679_v47 = vsel %vm437_vm9, %v4948_v43, -inf }
 0x4d7   :  { %445 = vmax.xlane.f32.xlu0 %v444_v45  ;;  %680 = vmax.xlane.f32.xlu1 %v679_v47  ;;  %v894_v48 = vpop.f32.mrb[12].mxu0 }
 0x4d8   :  { %v4954_v49 = vadd.f32 %v894_v48, %v4926_v12  ;;  %v3869_v50 = vpop.f32.mrb[13].mxu0 }
 0x4da   :  { %v908_v51 = vsel %vm437_vm9, %v4954_v49, -inf }
 0x4db   :  { %909 = vmax.xlane.f32.xlu0 %v908_v51  ;;  %v899_v52 = vpop.f32.mrb[14].mxu0 }
 0x4dc   :  { %v900_v53 = vadd.f32 %v899_v52, %v4932_v16  ;;  %v3872_v54 = vpop.f32.mrb[15].mxu0 }
 0x4de   :  { %v911_v55 = vsel %vm437_vm9, %v900_v53, -inf }
 0x4df   :  { %912 = vmax.xlane.f32.xlu1 %v911_v55  ;;  %v904_v56 = vpop.f32.mrb[16].mxu0 }
 0x4e0   :  { %v3875_v57 = vpop.f32.mrb[17].mxu0  ;;  %v905_v58 = vadd.f32 %v904_v56, %v4942_v32 }
 0x4e2   :  { %v914_v59 = vsel %vm437_vm9, %v905_v58, -inf }
 0x4f0   :  { %710 = vrot.lane.b32.xlu1 %v4828_v40, %s4624_s28 }
 0x4f1   :  { %4380 = vrot.lane.b32.xlu0 %v4826_v38, %s4626_s15 }
 0x510   :  { %915 = vmax.xlane.f32.xlu0 %v914_v59 }
 0x526   :  { %945 = vrot.lane.b32.xlu0 %v4828_v40, %s4626_s15 }
 0x556   :  { %v440_v60 = vpop.xlane.xlu1 %439 }
 0x557   :  { %v447_v61 = vsub.f32 %v424_v14, %v440_v60 }
 0x559   :  { %v450_v62 = vmul.f32 1.442695, %v447_v61  ;;  %v4373_v61 = vunpack.i.h.bf16 %v4896_v3 }
 0x55a   :  { %v443_v63 = vpop.xlane.xlu0 %442 }
 0x55b   :  { %4455 = vpow2.f32 %v450_v62  ;;  %v448_v0 = vsub.f32 %v429_v19, %v443_v63  ;;  %v4372_v62 = vunpack.i.l.bf16 %v4896_v3 }
 0x55c   :  { %v675_v1 = vpop.xlane.xlu1 %674 }
 0x55d   :  { %v682_v2 = vsub.f32 %v660_v23, %v675_v1  ;;  %v452_v4 = vmul.f32 1.442695, %v448_v0 }
 0x55f   :  { %v685_v5 = vmul.f32 1.442695, %v682_v2 }
 0x560   :  { %v678_v6 = vpop.xlane.xlu0 %677 }
 0x561   :  { %4457 = vpow2.f32 %v685_v5  ;;  %v683_v7 = vsub.f32 %v665_v34, %v678_v6 }
 0x562   :  { %4459 = vpow2.f32 %v452_v4  ;;  %v4221_v4 = vpack.c.bf16 %v4373_v61, %v4372_v62 }
 0x563   :  { %v687_v8 = vmul.f32 1.442695, %v683_v7 }
 0x564   :  { %v446_v13 = vpop.xlane.xlu0 %445  ;;  %v681_v31 = vpop.xlane.xlu1 %680 }
 0x565   :  { %v4968_v15 = vpop.eup %4455  ;;  %4461 = vpow2.f32 %v687_v8  ;;  %v449_v17 = vsub.f32 %v434_v39, %v446_v13  ;;  %v684_v39 = vsub.f32 %v4948_v43, %v681_v31 }
 0x566   :  { %v456_v14 = vsel %vm437_vm9, %v4968_v15, 0.0 }
 0x567   :  { %v454_v18 = vmul.f32 1.442695, %v449_v17  ;;  %457 = vadd.xlane.f32.xlu1 %v456_v14  ;;  %v689_v42 = vmul.f32 1.442695, %v684_v39 }
 0x568   :  { %v910_v37 = vpop.xlane.xlu0 %909 }
 0x569   :  { %4463 = vpow2.f32 %v454_v18  ;;  %v917_v44 = vsub.f32 %v4954_v49, %v910_v37 }
 0x56b   :  { %v4972_v19 = vpop.eup %4457  ;;  %v920_v47 = vmul.f32 1.442695, %v917_v44 }
 0x56c   :  { %v691_v20 = vsel %vm437_vm9, %v4972_v19, 0.0  ;;  %v4976_v21 = vpop.eup %4459  ;;  %v913_v33 = vpop.xlane.xlu1 %912 }
 0x56d   :  { %692 = vadd.xlane.f32.xlu0 %v691_v20  ;;  %v459_v25 = vsel %vm437_vm9, %v4976_v21, 0.0  ;;  %v918_v34 = vsub.f32 %v900_v53, %v913_v33  ;;  %v4994_v45 = vpop.permute.xlu0 %4380 }
 0x56e   :  { %v4383_v17 = vunpack.i.h.bf16 %v4994_v45  ;;  %v4382_v14 = vunpack.i.l.bf16 %v4994_v45 }
 0x56f   :  { %v4978_v23 = vpop.eup %4461  ;;  %v922_v41 = vmul.f32 1.442695, %v918_v34 }
 0x570   :  { %v694_v24 = vsel %vm437_vm9, %v4978_v23, 0.0  ;;  %v711_v57 = vpop.permute.xlu1 %710 }
 0x571   :  { %695 = vadd.xlane.f32.xlu1 %v694_v24  ;;  %460 = vadd.xlane.f32.xlu0 %v459_v25  ;;  %4465 = vpow2.f32 %v922_v41 }
 0x572   :  { %4467 = vpow2.f32 %v689_v42 }
 0x573   :  { %v4984_v28 = vpop.eup %4463  ;;  %4469 = vpow2.f32 %v920_v47 }
 0x574   :  { %v462_v29 = vsel %vm437_vm9, %v4984_v28, 0.0 }
 0x575   :  { %463 = vadd.xlane.f32.xlu1 %v462_v29 }
 0x57b   :  { %v4996_v51 = vpop.eup %4465 }
 0x57c   :  { %v929_v52 = vsel %vm437_vm9, %v4996_v51, 0.0  ;;  %v5000_v43 = vpop.eup %4467 }
 0x57d   :  { %v697_v49 = vsel %vm437_vm9, %v5000_v43, 0.0  ;;  %v5004_v53 = vpop.eup %4469 }
 0x57e   :  { %v926_v54 = vsel %vm437_vm9, %v5004_v53, 0.0 }
 0x586   :  { %1039 = vrot.lane.b32.xlu1 %v4820_v35, %s4627_s16 }
 0x587   :  { %1049 = vrot.lane.b32.xlu0 %v4828_v40, %s4625_s29 }
 0x59d   :  { %v916_v48 = vpop.xlane.xlu0 %915 }
 0x59e   :  { %v919_v35 = vsub.f32 %v905_v58, %v916_v48 }
 0x5a0   :  { %v924_v50 = vmul.f32 1.442695, %v919_v35 }
 0x5a1   :  { %v946_v59 = vpop.permute.xlu0 %945 }
 0x5a2   :  { %4471 = vpow2.f32 %v924_v50 }
 0x5a6   :  { %930 = vadd.xlane.f32.xlu0 %v929_v52 }
 0x5aa   :  { %698 = vadd.xlane.f32.xlu1 %v697_v49 }
 0x5ac   :  { %v5008_v55 = vpop.eup %4471 }
 0x5ad   :  { %v932_v56 = vsel %vm437_vm9, %v5008_v55, 0.0 }
 0x5ae   :  { %927 = vadd.xlane.f32.xlu1 %v926_v54 }
 0x5b2   :  { %933 = vadd.xlane.f32.xlu1 %v932_v56 }
 0x5bc   :  { %1041 = vrot.lane.b32.xlu0 %v4822_v36, %s4627_s16 }
 0x5c3   :  { %1043 = vrot.lane.b32.xlu1 %v4828_v40, %s4627_s16 }
 0x5f4   :  { %v458_v58 = vpop.xlane.xlu1 %457 }
 0x5f5   :  { %4473 = vrcp.f32 %v458_v58 }
 0x5fa   :  { %v693_v60 = vpop.xlane.xlu0 %692 }
 0x5fe   :  { %v696_v63 = vpop.xlane.xlu1 %695  ;;  %v461_v0 = vpop.xlane.xlu0 %460 }
 0x5ff   :  { %v4474_v1 = vpop.eup %4473  ;;  %4475 = vrcp.f32 %v461_v0 }
 0x600   :  { %v468_v2 = vmul.f32 %v4474_v1, %v4968_v15 }
 0x602   :  { %3823 = vmatmul.mubr.msk.f32.vlgmr.msra.gmra.mrb[12].mxu1 %vm437_vm9, %v468_v2  ;;  %v464_v36 = vpop.xlane.xlu1 %463  ;;  %v5020_v5 = vpop.permute.xlu0 %1049 }
 0x603   :  { %4222 = vmatpush3.bf16.msra.mxu1 %v4221_v4  ;;  %4477 = vrcp.f32 %v464_v36  ;;  %3896 = vmatpush3.xpose.msk.msra.mxu0 %vm344_vm7, %v5020_v5 }
 0x604   :  { %3850 = vmatprep.subr.mxu1 %v4617_v10  ;;  %3825 = vmatprep.mubr.msk.f32.mxu1 %vm4616_vm0, %v4617_v10  ;;  %4479 = vrcp.f32 %v693_v60 }
 0x605   :  { %4237 = vmatprep.subr.bf16.mxu0 %v4615_v9  ;;  %4481 = vrcp.f32 %v696_v63 }
 0x606   :  { %v1040_v3 = vpop.permute.xlu1 %1039 }
 0x607   :  { %3851 = vmatpush3.msra.mxu1 %v711_v57  ;;  %3898 = vmatmul.mubr.msk.f32.vlgmr.msra.gmra.mrb[18].mxu0 %vm344_vm7, %v1040_v3 }
 0x608   :  { %4227 = vmatprep.subr.bf16.mxu1 %v4615_v9  ;;  %3900 = vmatprep.mubr.msk.f32.mxu0 %vm4616_vm0, %v4617_v10 }
 0x609   :  { %v4476_v6 = vpop.eup %4475 }
 0x60a   :  { %v469_v7 = vmul.f32 %v4476_v6, %v4976_v21  ;;  %v4228_v21 = vpack.c.bf16 %v4383_v17, %v4382_v14 }
 0x60c   :  { %3826 = vmatmul.mubr.msk.f32.gmra.mrb[14].mxu1 %vm437_vm9, %v469_v7 }
 0x60d   :  { %v4478_v8 = vpop.eup %4477  ;;  %3828 = vmatprep.mubr.msk.f32.mxu1 %vm4616_vm0, %v4617_v10 }
 0x60e   :  { %v470_v13 = vmul.f32 %v4478_v8, %v4984_v28  ;;  %v4480_v15 = vpop.eup %4479 }
 0x60f   :  { %v703_v18 = vmul.f32 %v4480_v15, %v4972_v19  ;;  %v4482_v20 = vpop.eup %4481 }
 0x610   :  { %3829 = vmatmul.mubr.msk.f32.gmra.mrb[16].mxu1 %vm437_vm9, %v470_v13  ;;  %v704_v24 = vmul.f32 %v4482_v20, %v4978_v23 }
 0x611   :  { %3852 = vmatprep.mubr.msk.f32.mxu1 %vm4616_vm0, %v4617_v10 }
 0x614   :  { %3853 = vmatmul.mubr.msk.f32.vlgmr.msra.gmra.mrb[18].mxu1 %vm437_vm9, %v703_v18 }
 0x615   :  { %4229 = vmatpush3.bf16.msra.mxu1 %v4228_v21  ;;  %3855 = vmatprep.mubr.msk.f32.mxu1 %vm4616_vm0, %v4617_v10 }
 0x616   :  { %3880 = vmatprep.subr.mxu1 %v4617_v10 }
 0x618   :  { %3856 = vmatmul.mubr.msk.f32.gmra.mrb[20].mxu1 %vm437_vm9, %v704_v24 }
 0x619   :  { %3881 = vmatpush3.msra.mxu1 %v946_v59  ;;  %3858 = vmatprep.mubr.msk.f32.mxu1 %vm4616_vm0, %v4617_v10 }
 0x61a   :  { %4323 = vmatprep.subr.bf16.mxu1 %v4615_v9 }
 0x633   :  { %v931_v19 = vpop.xlane.xlu0 %930 }
 0x637   :  { %v699_v25 = vpop.xlane.xlu1 %698  ;;  %v1042_v28 = vpop.permute.xlu0 %1041 }
 0x638   :  { %4483 = vrcp.f32 %v699_v25  ;;  %3901 = vmatmul.mubr.msk.f32.gmra.mrb[20].mxu0 %vm344_vm7, %v1042_v28 }
 0x639   :  { %3929 = vmatprep.mubr.msk.f32.mxu0 %vm4616_vm0, %v4617_v10 }
 0x63b   :  { %v928_v29 = vpop.xlane.xlu1 %927 }
 0x63c   :  { %4485 = vrcp.f32 %v928_v29 }
 0x63d   :  { %4487 = vrcp.f32 %v931_v19 }
 0x63f   :  { %v934_v23 = vpop.xlane.xlu1 %933 }
 0x640   :  { %4489 = vrcp.f32 %v934_v23 }
 0x642   :  { %v4484_v31 = vpop.eup %4483 }
 0x643   :  { %v705_v33 = vmul.f32 %v4484_v31, %v5000_v43 }
 0x645   :  { %3859 = vmatmul.mubr.msk.f32.gmra.mrb[22].mxu1 %vm437_vm9, %v705_v33 }
 0x646   :  { %v4486_v34 = vpop.eup %4485  ;;  %3882 = vmatprep.mubr.msk.f32.mxu1 %vm4616_vm0, %v4617_v10 }
 0x647   :  { %v938_v37 = vmul.f32 %v4486_v34, %v5004_v53  ;;  %v4488_v39 = vpop.eup %4487 }
 0x648   :  { %v939_v41 = vmul.f32 %v4488_v39, %v4996_v51 }
 0x649   :  { %3883 = vmatmul.mubr.msk.f32.vlgmr.msra.gmra.mrb[24].mxu1 %vm437_vm9, %v938_v37 }
 0x64a   :  { %4325 = vmatpush3.bf16.xpose.msk.msra.mxu1 %vm4864_vm8, %v4907_v11  ;;  %3885 = vmatprep.mubr.msk.f32.mxu1 %vm4616_vm0, %v4617_v10  ;;  %v4490_v42 = vpop.eup %4489  ;;  %v1044_v11 = vpop.permute.xlu1 %1043 }
 0x64b   :  { %4324 = vmatprep.subr.mxu1 %v4617_v10  ;;  %v940_v44 = vmul.f32 %v4490_v42, %v5008_v55 }
 0x64d   :  { %3886 = vmatmul.mubr.msk.f32.gmra.mrb[26].mxu1 %vm437_vm9, %v939_v41 }
 0x64e   :  { %3888 = vmatprep.mubr.msk.f32.mxu1 %vm4616_vm0, %v4617_v10 }
 0x651   :  { %3889 = vmatmul.mubr.msk.f32.gmra.mrb[28].mxu1 %vm437_vm9, %v940_v44 }
 0x652   :  { %4326 = vmatpush3.xpose.msk.msra.mxu1 %vm344_vm7, %v5020_v5  ;;  %3903 = vmatprep.mubr.msk.f32.mxu1 %vm4616_vm0, %v4617_v10 }
 0x653   :  { %4234 = vmatprep.subr.bf16.mxu1 %v4615_v9 }
 0x655   :  { %3904 = vmatmul.mubr.msk.f32.vlgmr.msra.gmra.mrb[30].mxu1 %vm344_vm7, %v1044_v11 }
 0x656   :  { %3912 = vmatprep.mubr.msk.f32.mxu1 %vm4616_vm0, %v4617_v10 }
 0x6d5   :  { %v5081_v45 = vpop.f32.mrb[12].mxu1 }
 0x6d6   :  { %v3824_v47 = vpop.f32.mrb[13].mxu1 }
 0x6da   :  { %v1129_v48 = vpop.f32.mrb[18].mxu0 }
 0x6db   :  { %v1130_v35 = vadd.f32 %v1129_v48, %v4926_v12  ;;  %v3899_v50 = vpop.f32.mrb[19].mxu0 }
 0x6dc   :  { %v5128_v50 = vld [vmem:[%s5766_s7 + $0x8] sm:$0xff] }
 0x6dd   :  { %v1143_v51 = vsel %vm437_vm9, %v1130_v35, -inf }
 0x6de   :  { %1144 = vmax.xlane.f32.xlu0 %v1143_v51  ;;  %v5133_v51 = vld [vmem:[%s5766_s7 + $0x10] sm:$0xff] }
 0x6df   :  { %v5085_v52 = vpop.f32.mrb[14].mxu1 }
 0x6e0   :  { %v3827_v43 = vpop.f32.mrb[15].mxu1 }
 0x6e3   :  { %v5087_v49 = vpop.f32.mrb[16].mxu1 }
 0x6e4   :  { %v3830_v53 = vpop.f32.mrb[17].mxu1 }
 0x6e5   :  { %v5140_v53 = vld [vmem:[%s5766_s7 + $0x18] sm:$0xff] }
 0x6e7   :  { %v790_v54 = vpop.f32.mrb[18].mxu1 }
 0x6e8   :  { %v3854_v55 = vpop.f32.mrb[19].mxu1 }
 0x6eb   :  { %v795_v56 = vpop.f32.mrb[20].mxu1 }
 0x6ec   :  { %v3857_v57 = vpop.f32.mrb[21].mxu1 }
 0x70b   :  { %v1134_v58 = vpop.f32.mrb[20].mxu0 }
 0x70c   :  { %v1135_v59 = vadd.f32 %v1134_v58, %v4932_v16  ;;  %v3902_v60 = vpop.f32.mrb[21].mxu0 }
 0x70e   :  { %v1146_v12 = vsel %vm437_vm9, %v1135_v59, -inf }
 0x70f   :  { %1147 = vmax.xlane.f32.xlu1 %v1146_v12 }
 0x718   :  { %v5091_v61 = vpop.f32.mrb[22].mxu1 }
 0x719   :  { %v3860_v62 = vpop.f32.mrb[23].mxu1 }
 0x71c   :  { %v1025_v63 = vpop.f32.mrb[24].mxu1 }
 0x71d   :  { %v3884_v0 = vpop.f32.mrb[25].mxu1 }
 0x720   :  { %v5093_v1 = vpop.f32.mrb[26].mxu1 }
 0x721   :  { %v3887_v2 = vpop.f32.mrb[27].mxu1 }
 0x724   :  { %v5095_v4 = vpop.f32.mrb[28].mxu1 }
 0x725   :  { %v3890_v36 = vpop.f32.mrb[29].mxu1 }
 0x728   :  { %v1139_v5 = vpop.f32.mrb[30].mxu1 }
 0x729   :  { %v1140_v3 = vadd.f32 %v1139_v5, %v4942_v32  ;;  %v3905_v6 = vpop.f32.mrb[31].mxu1 }
 0x72b   :  { %v1149_v16 = vsel %vm437_vm9, %v1140_v3, -inf }
 0x72c   :  { %1150 = vmax.xlane.f32.xlu0 %v1149_v16 }
 0x76b   :  { %v1145_v7 = vpop.xlane.xlu0 %1144 }
 0x76c   :  { %v1152_v8 = vsub.f32 %v1130_v35, %v1145_v7  ;;  %v5123_v35 = vld [vmem:[%s5766_s7] sm:$0xff] }
 0x76d   :  { %v4238_v43 = vpack.c.bf16 %v5128_v50, %v5123_v35 }
 0x76e   :  { %v1155_v13 = vmul.f32 1.442695, %v1152_v8 }
 0x76f   :  { %4239 = vmatpush3.bf16.msra.mxu0 %v4238_v43 }
 0x770   :  { %4491 = vpow2.f32 %v1155_v13  ;;  %4240 = vmatprep.subr.bf16.mxu0 %v4615_v9 }
 0x77a   :  { %v4492_v15 = vpop.eup %4491 }
 0x77b   :  { %v1161_v17 = vsel %vm437_vm9, %v4492_v15, 0.0 }
 0x77c   :  { %1162 = vadd.xlane.f32.xlu0 %v1161_v17 }
 0x79c   :  { %v1148_v14 = vpop.xlane.xlu1 %1147 }
 0x79d   :  { %v1153_v18 = vsub.f32 %v1135_v59, %v1148_v14 }
 0x79f   :  { %v1157_v20 = vmul.f32 1.442695, %v1153_v18 }
 0x7a1   :  { %4493 = vpow2.f32 %v1157_v20 }
 0x7ab   :  { %v4494_v21 = vpop.eup %4493 }
 0x7ac   :  { %v1164_v24 = vsel %vm437_vm9, %v4494_v21, 0.0 }
 0x7ad   :  { %1165 = vadd.xlane.f32.xlu1 %v1164_v24 }
 0x7b9   :  { %v1151_v32 = vpop.xlane.xlu0 %1150 }
 0x7ba   :  { %v1154_v19 = vsub.f32 %v1140_v3, %v1151_v32 }
 0x7bc   :  { %v1159_v25 = vmul.f32 1.442695, %v1154_v19 }
 0x7be   :  { %4495 = vpow2.f32 %v1159_v25  ;;  %4385 = vrot.lane.b32.xlu1 %v4826_v38, %s4628_s17 }
 0x7c2   :  { %1277 = vrot.lane.b32.xlu1 %v790_v54, %s4629_s18  ;;  %v4241_v54 = vpack.c.bf16 %v5140_v53, %v5133_v51 }
 0x7c4   :  { %4242 = vmatpush3.bf16.msra.mxu0 %v4241_v54  ;;  %v4389_v54 = vpack.i.bf16 %v5128_v50, %v5123_v35 }
 0x7c5   :  { %4249 = vmatprep.subr.bf16.mxu0 %v4615_v9 }
 0x7c6   :  { %1289 = vrot.lane.b32.xlu1 %v1025_v63, %s4630_s19 }
 0x7c8   :  { %v4496_v28 = vpop.eup %4495 }
 0x7c9   :  { %v1167_v29 = vsel %vm437_vm9, %v4496_v28, 0.0 }
 0x7ca   :  { %1168 = vadd.xlane.f32.xlu0 %v1167_v29  ;;  %1279 = vrot.lane.b32.xlu1 %v795_v56, %s4629_s18 }
 0x7e0   :  { %1180 = vrot.lane.b32.xlu0 %v4828_v40, %s4628_s17 }
 0x809   :  { %v1163_v37 = vpop.xlane.xlu0 %1162 }
 0x80a   :  { %4497 = vrcp.f32 %v1163_v37 }
 0x814   :  { %v4498_v41 = vpop.eup %4497 }
 0x815   :  { %v1173_v42 = vmul.f32 %v4498_v41, %v4492_v15  ;;  %v3474_v15 = vld [vmem:[%s5763_s4 + $0x2] ss:$0 sm:$0xff] }
 0x83a   :  { %v1166_v23 = vpop.xlane.xlu1 %1165 }
 0x83b   :  { %4499 = vrcp.f32 %v1166_v23 }
 0x83e   :  { %v4386_v31 = vpop.permute.xlu1 %4385 }
 0x83f   :  { %v4388_v33 = vunpack.i.h.bf16 %v4386_v31  ;;  %v4387_v34 = vunpack.i.l.bf16 %v4386_v31 }
 0x841   :  { %v4235_v38 = vpack.c.bf16 %v4388_v33, %v4387_v34 }
 0x842   :  { %v1278_v12 = vpop.permute.xlu1 %1277 }
 0x843   :  { %4236 = vmatpush3.bf16.msra.mxu1 %v4235_v38  ;;  %v1310_v63 = vsel %vm344_vm7, %v5081_v45, %v1278_v12 }
 0x844   :  { %3910 = vmatprep.subr.mxu1 %v4617_v10 }
 0x845   :  { %v4500_v11 = vpop.eup %4499 }
 0x846   :  { %v1174_v40 = vmul.f32 %v4500_v11, %v4494_v21  ;;  %v1290_v62 = vpop.permute.xlu1 %1289 }
 0x847   :  { %v1314_v0 = vsel %vm1313_vm10, %v1310_v63, %v1290_v62 }
 0x857   :  { %v1169_v39 = vpop.xlane.xlu0 %1168 }
 0x858   :  { %4501 = vrcp.f32 %v1169_v39 }
 0x85b   :  { %v1181_v44 = vpop.permute.xlu0 %1180 }
 0x85c   :  { %3911 = vmatpush3.msra.mxu1 %v1181_v44 }
 0x85d   :  { %3913 = vmatmul.mubr.msk.f32.vlgmr.msra.gmra.mrb[32].mxu1 %vm437_vm9, %v1173_v42  ;;  %4243 = vmatprep.subr.bf16.mxu1 %v4615_v9 }
 0x85e   :  { %3915 = vmatprep.mubr.msk.f32.mxu1 %vm4616_vm0, %v4617_v10 }
 0x861   :  { %3916 = vmatmul.mubr.msk.f32.gmra.mrb[34].mxu1 %vm437_vm9, %v1174_v40 }
 0x862   :  { %v4502_v47 = vpop.eup %4501  ;;  %3918 = vmatprep.mubr.msk.f32.mxu1 %vm4616_vm0, %v4617_v10 }
 0x863   :  { %v1175_v48 = vmul.f32 %v4502_v47, %v4496_v28 }
 0x865   :  { %3919 = vmatmul.mubr.msk.f32.gmra.mrb[36].mxu1 %vm437_vm9, %v1175_v48 }
 0x866   :  { %3946 = vmatprep.mubr.msk.f32.mxu1 %vm4616_vm0, %v4617_v10 }
 0x930   :  { %v1260_v55 = vpop.f32.mrb[32].mxu1 }
 0x931   :  { %1301 = vrot.lane.b32.xlu0 %v1260_v55, %s4631_s14  ;;  %v3914_v56 = vpop.f32.mrb[33].mxu1  ;;  %v4394_v55 = vpack.i.bf16 %v5140_v53, %v5133_v51  ;;  %v3478_v53 = vld [vmem:[%s5763_s4 + $0x3] ss:$0 sm:$0xff] }
 0x934   :  { %v1265_v57 = vpop.f32.mrb[34].mxu1 }
 0x935   :  { %1291 = vrot.lane.b32.xlu0 %v5093_v1, %s4630_s19  ;;  %1303 = vrot.lane.b32.xlu1 %v1265_v57, %s4631_s14  ;;  %v3917_v58 = vpop.f32.mrb[35].mxu1  ;;  %v1280_v1 = vpop.permute.xlu1 %1279 }
 0x938   :  { %v1270_v59 = vpop.f32.mrb[36].mxu1 }
 0x939   :  { %1281 = vrot.lane.b32.xlu0 %v5091_v61, %s4629_s18  ;;  %1293 = vrot.lane.b32.xlu1 %v5095_v4, %s4630_s19  ;;  %v3920_v60 = vpop.f32.mrb[37].mxu1  ;;  %v1311_v61 = vsel %vm344_vm7, %v5085_v52, %v1280_v1 }
 0x93d   :  { %1305 = vrot.lane.b32.xlu0 %v1270_v59, %s4631_s14 }
 0x9a3   :  { %v1302_v2 = vpop.permute.xlu0 %1301 }
 0x9a4   :  { %v1317_v36 = vsel %vm437_vm9, %v1314_v0, %v1302_v2 }
 0x9a5   :  { %3930 = vmatmul.mubr.msk.f32.vlgmr.msra.gmra.mrb[22].mxu0 %vm171_vm6, %v1317_v36 }
 0x9a6   :  { %3932 = vmatprep.mubr.msk.f32.mxu0 %vm4616_vm0, %v4617_v10 }
 0x9a7   :  { %v1292_v4 = vpop.permute.xlu0 %1291  ;;  %v1304_v5 = vpop.permute.xlu1 %1303 }
 0x9a8   :  { %v1315_v3 = vsel %vm1313_vm10, %v1311_v61, %v1292_v4 }
 0x9a9   :  { %v1318_v45 = vsel %vm437_vm9, %v1315_v3, %v1304_v5 }
 0x9aa   :  { %3933 = vmatmul.mubr.msk.f32.gmra.mrb[24].mxu0 %vm171_vm6, %v1318_v45  ;;  %v3479_v45 = vld [vmem:[%s5763_s4 + $0x4] ss:$0 sm:$0xff] }
 0x9ab   :  { %v1282_v6 = vpop.permute.xlu0 %1281  ;;  %3935 = vmatprep.mubr.msk.f32.mxu0 %vm4616_vm0, %v4617_v10  ;;  %v1294_v7 = vpop.permute.xlu1 %1293 }
 0x9ac   :  { %v1312_v16 = vsel %vm344_vm7, %v5087_v49, %v1282_v6 }
 0x9ad   :  { %v1316_v8 = vsel %vm1313_vm10, %v1312_v16, %v1294_v7 }
 0x9af   :  { %v1306_v13 = vpop.permute.xlu0 %1305 }
 0x9b0   :  { %v1319_v52 = vsel %vm437_vm9, %v1316_v8, %v1306_v13 }
 0x9b1   :  { %3936 = vmatmul.mubr.msk.f32.gmra.mrb[26].mxu0 %vm171_vm6, %v1319_v52 }
 0x9b2   :  { %3971 = vmatprep.mubr.msk.f32.mxu0 %vm4616_vm0, %v4617_v10 }
 0xa78   :  { %v1403_v17 = vpop.f32.mrb[22].mxu0 }
 0xa79   :  { %v1404_v14 = vadd.f32 %v3474_v15, %v1403_v17  ;;  %v3931_v18 = vpop.f32.mrb[23].mxu0 }
 0xa7b   :  { %v1417_v49 = vadd.f32 %v1404_v14, %v4799_v22 }
 0xa7d   :  { %v1408_v20 = vpop.f32.mrb[24].mxu0  ;;  %v1420_v21 = vsel %vm171_vm6, %v1417_v49, 0.0 }
 0xa7e   :  { %v1409_v24 = vadd.f32 %v3474_v15, %v1408_v20  ;;  %1421 = vadd.xlane.f32.xlu1 %v1420_v21  ;;  %v3934_v32 = vpop.f32.mrb[25].mxu0  ;;  %v1613_v20 = vld [vmem:[%s5768_s9 + $0x8] sm:$0xff] }
 0xa7f   :  { %v1615_v32 = vld [vmem:[%s5768_s9 + $0x18] sm:$0xff] }
 0xa80   :  { %v1418_v19 = vadd.f32 %v1409_v24, %v4805_v27  ;;  %v1614_v24 = vld [vmem:[%s5768_s9 + $0x10] sm:$0xff] }
 0xa82   :  { %v1423_v25 = vsel %vm171_vm6, %v1418_v19, 0.0 }
 0xa83   :  { %1424 = vadd.xlane.f32.xlu0 %v1423_v25  ;;  %v1616_v25 = vld [vmem:[%s5768_s9 + $0x20] sm:$0xff] }
 0xa84   :  { %v1413_v28 = vpop.f32.mrb[26].mxu0 }
 0xa85   :  { %v1414_v29 = vadd.f32 %v3474_v15, %v1413_v28  ;;  %v3937_v23 = vpop.f32.mrb[27].mxu0  ;;  %v1617_v28 = vld [vmem:[%s5768_s9 + $0x28] sm:$0xff] }
 0xa86   :  { %v1618_v23 = vld [vmem:[%s5768_s9 + $0x30] sm:$0xff] }
 0xa87   :  { %v1419_v31 = vadd.f32 %v1414_v29, %v4811_v30  ;;  %v4256_v29 = vpack.c.bf16 %v1617_v28, %v1616_v25 }
 0xa89   :  { %v1426_v33 = vsel %vm171_vm6, %v1419_v31, 0.0 }
 0xa8a   :  { %1427 = vadd.xlane.f32.xlu0 %v1426_v33 }
 0xb0b   :  { %v1422_v22 = vpop.xlane.xlu1 %1421 }
 0xb0c   :  { %v1429_v34 = vmul.f32 0.03125, %v1422_v22  ;;  %v3480_v22 = vld [vmem:[%s5767_s8] ss:$0 sm:$0xff] }
 0xb0e   :  { %v1432_v38 = vsub.f32 %v1417_v49, %v1429_v34  ;;  %v1612_v49 = vld [vmem:[%s5768_s9] sm:$0xff] }
 0xb0f   :  { %v4250_v21 = vpack.c.bf16 %v1613_v20, %v1612_v49 }
 0xb10   :  { %v1425_v37 = vpop.xlane.xlu0 %1424  ;;  %v1435_v39 = vmul.f32 %v1432_v38, %v1432_v38 }
 0xb11   :  { %v1430_v41 = vmul.f32 0.03125, %v1425_v37  ;;  %4251 = vmatpush3.bf16.msra.mxu0 %v4250_v21 }
 0xb12   :  { %v1438_v42 = vsel %vm171_vm6, %v1435_v39, 0.0  ;;  %4252 = vmatprep.subr.bf16.mxu0 %v4615_v9 }
 0xb13   :  { %v1433_v27 = vsub.f32 %v1418_v19, %v1430_v41  ;;  %1439 = vadd.xlane.f32.xlu1 %v1438_v42  ;;  %v4253_v19 = vpack.c.bf16 %v1615_v32, %v1614_v24 }
 0xb15   :  { %v1436_v44 = vmul.f32 %v1433_v27, %v1433_v27  ;;  %4254 = vmatpush3.bf16.msra.mxu0 %v4253_v19 }
 0xb16   :  { %4255 = vmatprep.subr.bf16.mxu0 %v4615_v9 }
 0xb17   :  { %v1428_v11 = vpop.xlane.xlu0 %1427  ;;  %v1441_v40 = vsel %vm171_vm6, %v1436_v44, 0.0 }
 0xb18   :  { %v1431_v47 = vmul.f32 0.03125, %v1428_v11  ;;  %1442 = vadd.xlane.f32.xlu0 %v1441_v40 }
 0xb19   :  { %4257 = vmatpush3.bf16.msra.mxu0 %v4256_v29 }
 0xb1a   :  { %v1434_v30 = vsub.f32 %v1419_v31, %v1431_v47  ;;  %4258 = vmatprep.subr.bf16.mxu0 %v4615_v9  ;;  %v1619_v31 = vld [vmem:[%s5768_s9 + $0x38] sm:$0xff] }
 0xb1b   :  { %v4259_v33 = vpack.c.bf16 %v1619_v31, %v1618_v23 }
 0xb1c   :  { %v1437_v48 = vmul.f32 %v1434_v30, %v1434_v30 }
 0xb1d   :  { %4260 = vmatpush3.bf16.msra.mxu0 %v4259_v33 }
 0xb1e   :  { %v1444_v43 = vsel %vm171_vm6, %v1437_v48, 0.0  ;;  %4267 = vmatprep.subr.bf16.mxu0 %v4615_v9 }
 0xb1f   :  { %1445 = vadd.xlane.f32.xlu1 %v1444_v43 }
 0xb2e   :  { %4390 = vrot.lane.b32.xlu0 %v4389_v54, %s4618_s23 }
 0xb30   :  { %4395 = vrot.lane.b32.xlu1 %v4394_v55, %s4618_s23 }
 0xba0   :  { %v1440_v56 = vpop.xlane.xlu1 %1439 }
 0xba1   :  { %v1447_v57 = vmul.f32 0.03125, %v1440_v56 }
 0xba3   :  { %v1450_v58 = vadd.f32 1e-12, %v1447_v57 }
 0xba5   :  { %4503 = vrsqrt.f32 %v1450_v58  ;;  %v1443_v59 = vpop.xlane.xlu0 %1442 }
 0xba6   :  { %v1448_v60 = vmul.f32 0.03125, %v1443_v59 }
 0xba8   :  { %v1451_v12 = vadd.f32 1e-12, %v1448_v60 }
 0xba9   :  { %v4391_v62 = vpop.permute.xlu0 %4390 }
 0xbaa   :  { %4505 = vrsqrt.f32 %v1451_v12  ;;  %v4393_v63 = vunpack.i.h.bf16 %v4391_v62  ;;  %v4392_v0 = vunpack.i.l.bf16 %v4391_v62 }
 0xbac   :  { %v1446_v1 = vpop.xlane.xlu1 %1445  ;;  %v4244_v35 = vpack.c.bf16 %v4393_v63, %v4392_v0 }
 0xbad   :  { %v1449_v50 = vmul.f32 0.03125, %v1446_v1 }
 0xbae   :  { %4245 = vmatpush3.bf16.msra.mxu1 %v4244_v35 }
 0xbaf   :  { %v4504_v51 = vpop.eup %4503  ;;  %v1452_v2 = vadd.f32 1e-12, %v1449_v50  ;;  %4246 = vmatprep.subr.bf16.mxu1 %v4615_v9 }
 0xbb0   :  { %v1456_v36 = vmul.f32 %v4504_v51, %v1432_v38  ;;  %v4396_v61 = vpop.permute.xlu1 %4395 }
 0xbb1   :  { %4507 = vrsqrt.f32 %v1452_v2  ;;  %v4398_v4 = vunpack.i.h.bf16 %v4396_v61  ;;  %v4397_v5 = vunpack.i.l.bf16 %v4396_v61 }
 0xbb2   :  { %v1463_v3 = vmul.f32 %v3478_v53, %v1456_v36 }
 0xbb3   :  { %v4247_v6 = vpack.c.bf16 %v4398_v4, %v4397_v5 }
 0xbb4   :  { %v4506_v16 = vpop.eup %4505  ;;  %v5201_v8 = vadd.f32 %v3479_v45, %v1463_v3 }
 0xbb5   :  { %4248 = vmatpush3.bf16.msra.mxu1 %v4247_v6  ;;  %v1457_v7 = vmul.f32 %v4506_v16, %v1433_v27 }
 0xbb6   :  { %4261 = vmatprep.subr.bf16.mxu1 %v4615_v9 }
 0xbb7   :  { %v1464_v13 = vmul.f32 %v3478_v53, %v1457_v7 }
 0xbb8   :  { %3947 = vmatmul.mubr.msk.f32.vlgmr.msra.gmra.mrb[38].mxu1 %vm171_vm6, %v5201_v8 }
 0xbb9   :  { %3949 = vmatprep.mubr.msk.f32.mxu1 %vm4616_vm0, %v4617_v10  ;;  %v5208_v52 = vadd.f32 %v3479_v45, %v1464_v13 }
 0xbbb   :  { %v4508_v15 = vpop.eup %4507 }
 0xbbc   :  { %3950 = vmatmul.mubr.msk.f32.gmra.mrb[40].mxu1 %vm171_vm6, %v5208_v52  ;;  %v1458_v17 = vmul.f32 %v4508_v15, %v1434_v30 }
 0xbbd   :  { %3952 = vmatprep.mubr.msk.f32.mxu1 %vm4616_vm0, %v4617_v10 }
 0xbbe   :  { %v1465_v14 = vmul.f32 %v3478_v53, %v1458_v17 }
 0xbc0   :  { %v5214_v18 = vadd.f32 %v3479_v45, %v1465_v14  ;;  %v3484_v45 = vld [vmem:[%s5763_s4 + $0x5] ss:$0 sm:$0xff] }
 0xbc2   :  { %3953 = vmatmul.mubr.msk.f32.gmra.mrb[42].mxu1 %vm171_vm6, %v5214_v18 }
 0xbc3   :  { %3988 = vmatprep.mubr.msk.f32.mxu1 %vm4616_vm0, %v4617_v10 }
 0xc8b   :  { %v1571_v34 = vpop.f32.mrb[38].mxu1 }
 0xc8c   :  { %v1572_v38 = vadd.f32 %v3480_v22, %v1571_v34  ;;  %v3948_v37 = vpop.f32.mrb[39].mxu1 }
 0xc8e   :  { %v1585_v39 = vmul.f32 %v1572_v38, %v1572_v38 }
 0xc8f   :  { %v1576_v41 = vpop.f32.mrb[40].mxu1 }
 0xc90   :  { %v1588_v42 = vmul.f32 %v1585_v39, %v1572_v38  ;;  %v1577_v27 = vadd.f32 %v3480_v22, %v1576_v41  ;;  %v3951_v44 = vpop.f32.mrb[41].mxu1 }
 0xc91   :  { %v3490_v44 = vld [vmem:[%s5764_s5 + $0x20] sm:$0xff] }
 0xc92   :  { %v1591_v11 = vmul.f32 0.044715, %v1588_v42  ;;  %v1586_v40 = vmul.f32 %v1577_v27, %v1577_v27 }
 0xc94   :  { %v1594_v47 = vadd.f32 %v1591_v11, %v1572_v38  ;;  %v1589_v30 = vmul.f32 %v1586_v40, %v1577_v27  ;;  %v3491_v11 = vld [vmem:[%s5764_s5 + $0x28] sm:$0xff] }
 0xc95   :  { %v1581_v48 = vpop.f32.mrb[42].mxu1  ;;  %v4262_v40 = vpack.c.bf16 %v3491_v11, %v3490_v44 }
 0xc96   :  { %v1597_v43 = vmul.f32 0.7978846, %v1594_v47  ;;  %v1592_v54 = vmul.f32 0.044715, %v1589_v30  ;;  %v1582_v55 = vadd.f32 %v3480_v22, %v1581_v48  ;;  %v3954_v56 = vpop.f32.mrb[43].mxu1  ;;  %v3492_v47 = vld [vmem:[%s5764_s5 + $0x30] sm:$0xff] }
 0xc97   :  { %4263 = vmatpush3.bf16.msra.mxu1 %v4262_v40  ;;  %v3493_v30 = vld [vmem:[%s5764_s5 + $0x38] sm:$0xff] }
 0xc98   :  { %4509 = vtanh.f32 %v1597_v43  ;;  %v1595_v57 = vadd.f32 %v1592_v54, %v1577_v27  ;;  %v1587_v58 = vmul.f32 %v1582_v55, %v1582_v55  ;;  %4264 = vmatprep.subr.bf16.mxu1 %v4615_v9  ;;  %v4265_v48 = vpack.c.bf16 %v3493_v30, %v3492_v47 }
 0xc9a   :  { %v1598_v59 = vmul.f32 0.7978846, %v1595_v57  ;;  %v1590_v60 = vmul.f32 %v1587_v58, %v1582_v55 }
 0xc9b   :  { %4266 = vmatpush3.bf16.msra.mxu1 %v4265_v48 }
 0xc9c   :  { %4511 = vtanh.f32 %v1598_v59  ;;  %v1593_v12 = vmul.f32 0.044715, %v1590_v60  ;;  %4271 = vmatprep.subr.bf16.mxu1 %v4615_v9 }
 0xc9e   :  { %v1596_v62 = vadd.f32 %v1593_v12, %v1582_v55 }
 0xca0   :  { %v1599_v63 = vmul.f32 0.7978846, %v1596_v62 }
 0xca2   :  { %v4510_v0 = vpop.eup %4509  ;;  %4513 = vtanh.f32 %v1599_v63  ;;  %v3488_v63 = vld [vmem:[%s5763_s4 + $0x6] ss:$0 sm:$0xff] }
 0xca3   :  { %v1603_v1 = vadd.f32 1.0, %v4510_v0 }
 0xca5   :  { %v1606_v35 = vmul.f32 0.5, %v1603_v1  ;;  %v3489_v1 = vld [vmem:[%s5763_s4 + $0x7] ss:$0 sm:$0xff] }
 0xca6   :  { %v4512_v50 = vpop.eup %4511 }
 0xca7   :  { %v1609_v51 = vmul.f32 %v1606_v35, %v1572_v38  ;;  %v1604_v53 = vadd.f32 1.0, %v4512_v50 }
 0xca9   :  { %3972 = vmatmul.mubr.msk.f32.vlgmr.msra.gmra.mrb[28].mxu0 %vm1624_vm11, %v1609_v51  ;;  %v1607_v2 = vmul.f32 0.5, %v1604_v53 }
 0xcaa   :  { %3974 = vmatprep.mubr.msk.f32.mxu0 %vm4616_vm0, %v4617_v10 }
 0xcab   :  { %v1610_v36 = vmul.f32 %v1607_v2, %v1577_v27 }
 0xcac   :  { %v4514_v61 = vpop.eup %4513 }
 0xcad   :  { %3975 = vmatmul.mubr.msk.f32.gmra.mrb[30].mxu0 %vm1624_vm11, %v1610_v36  ;;  %v1605_v4 = vadd.f32 1.0, %v4514_v61 }
 0xcae   :  { %3977 = vmatprep.mubr.msk.f32.mxu0 %vm4616_vm0, %v4617_v10 }
 0xcaf   :  { %v1608_v5 = vmul.f32 0.5, %v1605_v4 }
 0xcb1   :  { %v1611_v3 = vmul.f32 %v1608_v5, %v1582_v55 }
 0xcb3   :  { %3978 = vmatmul.mubr.msk.f32.gmra.mrb[32].mxu0 %vm1624_vm11, %v1611_v3 }
 0xcb4   :  { %4003 = vmatprep.mubr.msk.f32.mxu0 %vm4616_vm0, %v4617_v10 }
 0xd7c   :  { %v1700_v6 = vpop.f32.mrb[28].mxu0 }
 0xd7d   :  { %v1701_v16 = vadd.f32 %v3484_v45, %v1700_v6  ;;  %v3973_v7 = vpop.f32.mrb[29].mxu0 }
 0xd7f   :  { %v1714_v13 = vadd.f32 %v1701_v16, %v5201_v8  ;;  %v3495_v16 = vld [vmem:[%s5765_s6 + $0x1] ss:$0 sm:$0xff] }
 0xd80   :  { %v1705_v15 = vpop.f32.mrb[30].mxu0 }
 0xd81   :  { %v1706_v17 = vadd.f32 %v3484_v45, %v1705_v15  ;;  %v3976_v14 = vpop.f32.mrb[31].mxu0  ;;  %v1717_v49 = vsel %vm171_vm6, %v1714_v13, 0.0 }
 0xd82   :  { %1718 = vadd.xlane.f32.xlu1 %v1717_v49 }
 0xd83   :  { %v1715_v20 = vadd.f32 %v1706_v17, %v5208_v52 }
 0xd85   :  { %v1720_v21 = vsel %vm171_vm6, %v1715_v20, 0.0 }
 0xd86   :  { %1721 = vadd.xlane.f32.xlu0 %v1720_v21  ;;  %v1710_v24 = vpop.f32.mrb[32].mxu0 }
 0xd87   :  { %v1711_v32 = vadd.f32 %v3484_v45, %v1710_v24  ;;  %v3979_v19 = vpop.f32.mrb[33].mxu0 }
 0xd89   :  { %v1716_v25 = vadd.f32 %v1711_v32, %v5214_v18 }
 0xd8b   :  { %v1723_v28 = vsel %vm171_vm6, %v1716_v25, 0.0 }
 0xd8c   :  { %1724 = vadd.xlane.f32.xlu0 %v1723_v28 }
 0xe0f   :  { %v1719_v8 = vpop.xlane.xlu1 %1718 }
 0xe10   :  { %v1726_v29 = vmul.f32 0.03125, %v1719_v8 }
 0xe12   :  { %v1729_v23 = vsub.f32 %v1714_v13, %v1726_v29 }
 0xe13   :  { %v1722_v31 = vpop.xlane.xlu0 %1721 }
 0xe14   :  { %v1727_v33 = vmul.f32 0.03125, %v1722_v31  ;;  %v1732_v22 = vmul.f32 %v1729_v23, %v1729_v23 }
 0xe16   :  { %v1730_v34 = vsub.f32 %v1715_v20, %v1727_v33  ;;  %v1735_v52 = vsel %vm171_vm6, %v1732_v22, 0.0 }
 0xe17   :  { %1736 = vadd.xlane.f32.xlu1 %v1735_v52 }
 0xe18   :  { %v1733_v38 = vmul.f32 %v1730_v34, %v1730_v34 }
 0xe19   :  { %v1725_v37 = vpop.xlane.xlu0 %1724 }
 0xe1a   :  { %v1728_v39 = vmul.f32 0.03125, %v1725_v37  ;;  %v1738_v41 = vsel %vm171_vm6, %v1733_v38, 0.0 }
 0xe1b   :  { %1739 = vadd.xlane.f32.xlu0 %v1738_v41 }
 0xe1c   :  { %v1731_v18 = vsub.f32 %v1716_v25, %v1728_v39 }
 0xe1e   :  { %v1734_v42 = vmul.f32 %v1731_v18, %v1731_v18 }
 0xe20   :  { %v1741_v27 = vsel %vm171_vm6, %v1734_v42, 0.0 }
 0xe21   :  { %1742 = vadd.xlane.f32.xlu1 %v1741_v27 }
 0xea4   :  { %v1737_v43 = vpop.xlane.xlu1 %1736 }
 0xea5   :  { %v1744_v54 = vmul.f32 0.03125, %v1737_v43 }
 0xea7   :  { %v1747_v55 = vadd.f32 1e-12, %v1744_v54 }
 0xea8   :  { %v1740_v56 = vpop.xlane.xlu0 %1739 }
 0xea9   :  { %4515 = vrsqrt.f32 %v1747_v55  ;;  %v1745_v57 = vmul.f32 0.03125, %v1740_v56  ;;  %v4587_v56 = vld [vmem:[%s5760_s1] sm:$0xff] }
 0xeab   :  { %v1748_v58 = vadd.f32 1e-12, %v1745_v57 }
 0xead   :  { %4517 = vrsqrt.f32 %v1748_v58 }
 0xeae   :  { %v1743_v59 = vpop.xlane.xlu1 %1742 }
 0xeaf   :  { %v1746_v60 = vmul.f32 0.03125, %v1743_v59 }
 0xeb1   :  { %v1749_v12 = vadd.f32 1e-12, %v1746_v60 }
 0xeb3   :  { %v4516_v62 = vpop.eup %4515  ;;  %4519 = vrsqrt.f32 %v1749_v12  ;;  %v4588_v12 = vld [vmem:[%s5760_s1 + $0x8] sm:$0xff] }
 0xeb4   :  { %v1753_v0 = vmul.f32 %v4516_v62, %v1729_v23 }
 0xeb6   :  { %v1760_v35 = vmul.f32 %v3488_v63, %v1753_v0 }
 0xeb7   :  { %v4518_v50 = vpop.eup %4517 }
 0xeb8   :  { %v5292_v51 = vadd.f32 %v3489_v1, %v1760_v35  ;;  %v1754_v53 = vmul.f32 %v4518_v50, %v1730_v34  ;;  %v4589_v35 = vld [vmem:[%s5760_s1 + $0x10] sm:$0xff] }
 0xeba   :  { %3989 = vmatmul.mubr.msk.f32.vlgmr.msra.gmra.mrb[44].mxu1 %vm171_vm6, %v5292_v51  ;;  %v1761_v2 = vmul.f32 %v3488_v63, %v1754_v53 }
 0xebb   :  { %3991 = vmatprep.mubr.msk.f32.mxu1 %vm4616_vm0, %v4617_v10 }
 0xebc   :  { %v5298_v36 = vadd.f32 %v3489_v1, %v1761_v2 }
 0xebd   :  { %v4520_v61 = vpop.eup %4519 }
 0xebe   :  { %3992 = vmatmul.mubr.msk.f32.gmra.mrb[46].mxu1 %vm171_vm6, %v5298_v36  ;;  %v1755_v4 = vmul.f32 %v4520_v61, %v1731_v18 }
 0xebf   :  { %3994 = vmatprep.mubr.msk.f32.mxu1 %vm4616_vm0, %v4617_v10 }
 0xec0   :  { %v1762_v5 = vmul.f32 %v3488_v63, %v1755_v4 }
 0xec2   :  { %v5304_v3 = vadd.f32 %v3489_v1, %v1762_v5 }
 0xec4   :  { %3995 = vmatmul.mubr.msk.f32.gmra.mrb[48].mxu1 %vm171_vm6, %v5304_v3 }
 0xec5   :  { %4018 = vmatprep.mubr.msk.f32.mxu1 %vm4616_vm0, %v4617_v10 }
 0xf8d   :  { %v1864_v45 = vpop.f32.mrb[44].mxu1 }
 0xf8e   :  { %v3990_v6 = vpop.f32.mrb[45].mxu1  ;;  %v1865_v13 = vadd.f32 %v3495_v16, %v1864_v45 }
 0xf91   :  { %v1869_v7 = vpop.f32.mrb[46].mxu1 }
 0xf92   :  { %v1870_v15 = vadd.f32 %v3495_v16, %v1869_v7  ;;  %v3993_v17 = vpop.f32.mrb[47].mxu1 }
 0xf94   :  { %v5313_v14 = vpack.i.bf16 %v1870_v15, %v1865_v13 }
 0xf96   :  { %4400 = vrot.lane.b32.xlu0 %v5313_v14, %s4618_s23 }
 0xf97   :  { %v1874_v49 = vpop.f32.mrb[48].mxu1 }
 0xf98   :  { %v5317_v20 = vadd.f32 %v3495_v16, %v1874_v49  ;;  %v3996_v21 = vpop.f32.mrb[49].mxu1 }
 0xf9a   :  { %2120 = vrot.lane.b32.xlu0 %v5317_v20, %s4619_s24  ;;  %1885 = vrot.lane.b32.xlu1 %v5317_v20, %s4618_s23 }
 0xf9e   :  { %2110 = vrot.lane.b32.xlu0 %v1865_v13, %s4620_s3  ;;  %4405 = vrot.lane.b32.xlu1 %v5313_v14, %s4619_s24 }
 0xfa2   :  { %2114 = vrot.lane.b32.xlu0 %v5317_v20, %s4620_s3  ;;  %4410 = vrot.lane.b32.xlu1 %v5313_v14, %s4621_s25 }
 0xfa6   :  { %4415 = vrot.lane.b32.xlu0 %v5313_v14, %s4625_s29  ;;  %2112 = vrot.lane.b32.xlu1 %v1870_v15, %s4620_s3 }
 0xfaa   :  { %2347 = vrot.lane.b32.xlu0 %v1870_v15, %s4622_s26  ;;  %2355 = vrot.lane.b32.xlu1 %v5317_v20, %s4621_s25 }
 0xfae   :  { %2590 = vrot.lane.b32.xlu0 %v5317_v20, %s4625_s29  ;;  %2345 = vrot.lane.b32.xlu1 %v1865_v13, %s4622_s26 }
 0xfb2   :  { %2582 = vrot.lane.b32.xlu0 %v1870_v15, %s4627_s16  ;;  %2349 = vrot.lane.b32.xlu1 %v5317_v20, %s4622_s26 }
 0xfb6   :  { %2580 = vrot.lane.b32.xlu1 %v1865_v13, %s4627_s16 }
 0xfba   :  { %2584 = vrot.lane.b32.xlu1 %v5317_v20, %s4627_s16 }
0x1008   :  { %v4401_v24 = vpop.permute.xlu0 %4400 }
0x1009   :  { %v4403_v32 = vunpack.i.h.bf16 %v4401_v24  ;;  %v4402_v19 = vunpack.i.l.bf16 %v4401_v24 }
0x100b   :  { %v4268_v25 = vpack.c.bf16 %v4403_v32, %v4402_v19 }
0x100c   :  { %v1886_v28 = vpop.permute.xlu1 %1885  ;;  %v2121_v31 = vpop.permute.xlu0 %2120 }
0x100d   :  { %4270 = vmatpush3.bf16.xpose.msk.msra.mxu0 %vm4864_vm8, %v4268_v25 }
0x100e   :  { %4001 = vmatprep.subr.mxu0 %v4617_v10 }
0x1010   :  { %v4406_v8 = vpop.permute.xlu1 %4405  ;;  %v2111_v22 = vpop.permute.xlu0 %2110 }
0x1011   :  { %v4408_v29 = vunpack.i.h.bf16 %v4406_v8  ;;  %v4407_v23 = vunpack.i.l.bf16 %v4406_v8 }
0x1013   :  { %v4275_v33 = vpack.c.bf16 %v4408_v29, %v4407_v23 }
0x1014   :  { %v4411_v34 = vpop.permute.xlu1 %4410  ;;  %v2115_v37 = vpop.permute.xlu0 %2114 }
0x1015   :  { %4002 = vmatpush3.xpose.msk.msra.mxu0 %vm344_vm7, %v1886_v28  ;;  %v4413_v52 = vunpack.i.h.bf16 %v4411_v34  ;;  %v4412_v38 = vunpack.i.l.bf16 %v4411_v34 }
0x1016   :  { %4274 = vmatprep.subr.bf16.mxu0 %v4615_v9 }
0x1017   :  { %v4282_v39 = vpack.c.bf16 %v4413_v52, %v4412_v38 }
0x1018   :  { %4004 = vmatmul.mubr.msk.f32.vlgmr.msra.gmra.mrb[34].mxu0 %vm344_vm7, %v1865_v13  ;;  %v2113_v41 = vpop.permute.xlu1 %2112  ;;  %v4416_v18 = vpop.permute.xlu0 %4415 }
0x1019   :  { %4277 = vmatpush3.bf16.xpose.msk.msra.mxu0 %vm4864_vm8, %v4275_v33  ;;  %4006 = vmatprep.mubr.msk.f32.mxu0 %vm4616_vm0, %v4617_v10  ;;  %v4418_v27 = vunpack.i.h.bf16 %v4416_v18  ;;  %v4417_v44 = vunpack.i.l.bf16 %v4416_v18 }
0x101a   :  { %4031 = vmatprep.subr.mxu0 %v4617_v10 }
0x101b   :  { %v4289_v11 = vpack.c.bf16 %v4418_v27, %v4417_v44 }
0x101c   :  { %4007 = vmatmul.mubr.msk.f32.gmra.mrb[36].mxu0 %vm344_vm7, %v1870_v15  ;;  %v2356_v42 = vpop.permute.xlu1 %2355  ;;  %v2348_v47 = vpop.permute.xlu0 %2347 }
0x101d   :  { %4009 = vmatprep.mubr.msk.f32.mxu0 %vm4616_vm0, %v4617_v10 }
0x1020   :  { %4010 = vmatmul.mubr.msk.f32.gmra.mrb[38].mxu0 %vm344_vm7, %v5317_v20  ;;  %v2346_v40 = vpop.permute.xlu1 %2345  ;;  %v2591_v48 = vpop.permute.xlu0 %2590 }
0x1021   :  { %4032 = vmatpush3.xpose.msk.msra.mxu0 %vm344_vm7, %v2121_v31  ;;  %4033 = vmatprep.mubr.msk.f32.mxu0 %vm4616_vm0, %v4617_v10 }
0x1022   :  { %4281 = vmatprep.subr.bf16.mxu0 %v4615_v9 }
0x1024   :  { %4034 = vmatmul.mubr.msk.f32.vlgmr.msra.gmra.mrb[40].mxu0 %vm344_vm7, %v2111_v22  ;;  %v2350_v30 = vpop.permute.xlu1 %2349  ;;  %v2583_v43 = vpop.permute.xlu0 %2582 }
0x1025   :  { %4284 = vmatpush3.bf16.xpose.msk.msra.mxu0 %vm4864_vm8, %v4282_v39  ;;  %4036 = vmatprep.mubr.msk.f32.mxu0 %vm4616_vm0, %v4617_v10 }
0x1026   :  { %4061 = vmatprep.subr.mxu0 %v4617_v10 }
0x1028   :  { %4037 = vmatmul.mubr.msk.f32.gmra.mrb[42].mxu0 %vm344_vm7, %v2113_v41  ;;  %v2581_v46 = vpop.permute.xlu1 %2580 }
0x1029   :  { %4039 = vmatprep.mubr.msk.f32.mxu0 %vm4616_vm0, %v4617_v10 }
0x102c   :  { %4040 = vmatmul.mubr.msk.f32.gmra.mrb[44].mxu0 %vm344_vm7, %v2115_v37  ;;  %v2585_v54 = vpop.permute.xlu1 %2584 }
0x102d   :  { %4062 = vmatpush3.xpose.msk.msra.mxu0 %vm344_vm7, %v2356_v42  ;;  %4063 = vmatprep.mubr.msk.f32.mxu0 %vm4616_vm0, %v4617_v10 }
0x102e   :  { %4288 = vmatprep.subr.bf16.mxu0 %v4615_v9 }
0x1030   :  { %4064 = vmatmul.mubr.msk.f32.vlgmr.msra.gmra.mrb[46].mxu0 %vm344_vm7, %v2346_v40 }
0x1031   :  { %4291 = vmatpush3.bf16.xpose.msk.msra.mxu0 %vm4864_vm8, %v4289_v11  ;;  %4066 = vmatprep.mubr.msk.f32.mxu0 %vm4616_vm0, %v4617_v10 }
0x1032   :  { %4091 = vmatprep.subr.mxu0 %v4617_v10 }
0x1034   :  { %4067 = vmatmul.mubr.msk.f32.gmra.mrb[48].mxu0 %vm344_vm7, %v2348_v47 }
0x1035   :  { %4069 = vmatprep.mubr.msk.f32.mxu0 %vm4616_vm0, %v4617_v10 }
0x1038   :  { %4070 = vmatmul.mubr.msk.f32.gmra.mrb[50].mxu0 %vm344_vm7, %v2350_v30 }
0x1039   :  { %4092 = vmatpush3.xpose.msk.msra.mxu0 %vm344_vm7, %v2591_v48  ;;  %4093 = vmatprep.mubr.msk.f32.mxu0 %vm4616_vm0, %v4617_v10 }
0x103a   :  { %4295 = vmatprep.subr.bf16.mxu0 %v4615_v9 }
0x103c   :  { %4094 = vmatmul.mubr.msk.f32.vlgmr.msra.gmra.mrb[52].mxu0 %vm344_vm7, %v2581_v46 }
0x103d   :  { %4096 = vmatprep.mubr.msk.f32.mxu0 %vm4616_vm0, %v4617_v10 }
0x1040   :  { %4097 = vmatmul.mubr.msk.f32.gmra.mrb[54].mxu0 %vm344_vm7, %v2583_v43 }
0x1041   :  { %4099 = vmatprep.mubr.msk.f32.mxu0 %vm4616_vm0, %v4617_v10 }
0x1044   :  { %4100 = vmatmul.mubr.msk.f32.gmra.mrb[56].mxu0 %vm344_vm7, %v2585_v54 }
0x1045   :  { %4125 = vmatprep.mubr.msk.f32.mxu0 %vm4616_vm0, %v4617_v10 }
0x10eb   :  { %v1965_v55 = vpop.f32.mrb[34].mxu0 }
0x10ec   :  { %v5405_v57 = vadd.f32 %v4587_v56, %v1965_v55  ;;  %v4005_v58 = vpop.f32.mrb[35].mxu0 }
0x10ee   :  { %v1979_v59 = vsel %vm437_vm9, %v5405_v57, -inf }
0x10ef   :  { %1980 = vmax.xlane.f32.xlu0 %v1979_v59  ;;  %v1970_v60 = vpop.f32.mrb[36].mxu0 }
0x10f0   :  { %v5412_v62 = vadd.f32 %v4588_v12, %v1970_v60  ;;  %v4008_v63 = vpop.f32.mrb[37].mxu0 }
0x10f2   :  { %v1982_v0 = vsel %vm437_vm9, %v5412_v62, -inf }
0x10f3   :  { %1983 = vmax.xlane.f32.xlu1 %v1982_v0  ;;  %v1975_v1 = vpop.f32.mrb[38].mxu0 }
0x10f4   :  { %v1976_v50 = vadd.f32 %v4589_v35, %v1975_v1  ;;  %v4011_v53 = vpop.f32.mrb[39].mxu0 }
0x10f6   :  { %v1985_v2 = vsel %vm437_vm9, %v1976_v50, -inf }
0x10f7   :  { %1986 = vmax.xlane.f32.xlu0 %v1985_v2  ;;  %v2200_v61 = vpop.f32.mrb[40].mxu0 }
0x10f8   :  { %v2201_v4 = vadd.f32 %v4587_v56, %v2200_v61  ;;  %v4035_v5 = vpop.f32.mrb[41].mxu0 }
0x10fa   :  { %v2214_v45 = vsel %vm437_vm9, %v2201_v4, -inf }
0x10fb   :  { %2215 = vmax.xlane.f32.xlu0 %v2214_v45  ;;  %v2205_v6 = vpop.f32.mrb[42].mxu0 }
0x10fc   :  { %v5421_v16 = vadd.f32 %v4588_v12, %v2205_v6  ;;  %v4038_v7 = vpop.f32.mrb[43].mxu0 }
0x10fe   :  { %v2217_v13 = vsel %vm437_vm9, %v5421_v16, -inf }
0x10ff   :  { %2218 = vmax.xlane.f32.xlu1 %v2217_v13  ;;  %v2210_v15 = vpop.f32.mrb[44].mxu0 }
0x1100   :  { %v5425_v17 = vadd.f32 %v4589_v35, %v2210_v15  ;;  %v4041_v49 = vpop.f32.mrb[45].mxu0 }
0x1102   :  { %v2220_v21 = vsel %vm437_vm9, %v5425_v17, -inf }
0x1103   :  { %2221 = vmax.xlane.f32.xlu0 %v2220_v21  ;;  %v2435_v24 = vpop.f32.mrb[46].mxu0 }
0x1104   :  { %v5429_v32 = vadd.f32 %v4587_v56, %v2435_v24  ;;  %v4065_v19 = vpop.f32.mrb[47].mxu0 }
0x1106   :  { %v2449_v25 = vsel %vm437_vm9, %v5429_v32, -inf }
0x1107   :  { %2450 = vmax.xlane.f32.xlu1 %v2449_v25  ;;  %v2440_v28 = vpop.f32.mrb[48].mxu0 }
0x1108   :  { %v5433_v8 = vadd.f32 %v4588_v12, %v2440_v28  ;;  %v4068_v29 = vpop.f32.mrb[49].mxu0 }
0x110a   :  { %v2452_v23 = vsel %vm437_vm9, %v5433_v8, -inf }
0x110b   :  { %2453 = vmax.xlane.f32.xlu0 %v2452_v23  ;;  %v2445_v31 = vpop.f32.mrb[50].mxu0 }
0x110c   :  { %v5437_v33 = vadd.f32 %v4589_v35, %v2445_v31  ;;  %v4071_v22 = vpop.f32.mrb[51].mxu0 }
0x110e   :  { %v2455_v34 = vsel %vm437_vm9, %v5437_v33, -inf }
0x110f   :  { %2456 = vmax.xlane.f32.xlu1 %v2455_v34  ;;  %v2670_v52 = vpop.f32.mrb[52].mxu0 }
0x1110   :  { %v5441_v38 = vadd.f32 %v4587_v56, %v2670_v52  ;;  %v4095_v37 = vpop.f32.mrb[53].mxu0 }
0x1112   :  { %v2684_v39 = vsel %vm437_vm9, %v5441_v38, -inf }
0x1113   :  { %2685 = vmax.xlane.f32.xlu0 %v2684_v39  ;;  %v2675_v41 = vpop.f32.mrb[54].mxu0 }
0x1114   :  { %v5445_v18 = vadd.f32 %v4588_v12, %v2675_v41  ;;  %v4098_v42 = vpop.f32.mrb[55].mxu0 }
0x1116   :  { %v2687_v27 = vsel %vm437_vm9, %v5445_v18, -inf }
0x1117   :  { %2688 = vmax.xlane.f32.xlu1 %v2687_v27  ;;  %v2680_v44 = vpop.f32.mrb[56].mxu0 }
0x1118   :  { %v5449_v11 = vadd.f32 %v4589_v35, %v2680_v44  ;;  %v4101_v40 = vpop.f32.mrb[57].mxu0 }
0x111a   :  { %v2690_v47 = vsel %vm437_vm9, %v5449_v11, -inf }
0x111b   :  { %2691 = vmax.xlane.f32.xlu0 %v2690_v47 }
0x1128   :  { %2016 = vrot.lane.b32.xlu1 %v5317_v20, %s4623_s27 }
0x112c   :  { %4425 = vrot.lane.b32.xlu1 %v5313_v14, %s4624_s28 }
0x1131   :  { %4420 = vrot.lane.b32.xlu0 %v5313_v14, %s4623_s27 }
0x117c   :  { %v1981_v30 = vpop.xlane.xlu0 %1980 }
0x117d   :  { %v1988_v48 = vsub.f32 %v5405_v57, %v1981_v30 }
0x117f   :  { %v1991_v46 = vmul.f32 1.442695, %v1988_v48 }
0x1180   :  { %v1984_v43 = vpop.xlane.xlu1 %1983 }
0x1181   :  { %4521 = vpow2.f32 %v1991_v46  ;;  %v1989_v54 = vsub.f32 %v5412_v62, %v1984_v43 }
0x1183   :  { %v1993_v55 = vmul.f32 1.442695, %v1989_v54 }
0x1184   :  { %v1987_v56 = vpop.xlane.xlu0 %1986 }
0x1185   :  { %4523 = vpow2.f32 %v1993_v55  ;;  %v1990_v58 = vsub.f32 %v1976_v50, %v1987_v56 }
0x1187   :  { %v1995_v59 = vmul.f32 1.442695, %v1990_v58 }
0x1188   :  { %v2216_v60 = vpop.xlane.xlu0 %2215 }
0x1189   :  { %4525 = vpow2.f32 %v1995_v59  ;;  %v2223_v12 = vsub.f32 %v2201_v4, %v2216_v60 }
0x118b   :  { %v5461_v63 = vpop.eup %4521  ;;  %v2226_v0 = vmul.f32 1.442695, %v2223_v12 }
0x118c   :  { %v2219_v1 = vpop.xlane.xlu1 %2218  ;;  %v1997_v57 = vsel %vm437_vm9, %v5461_v63, 0.0 }
0x118d   :  { %4527 = vpow2.f32 %v2226_v0  ;;  %v2224_v35 = vsub.f32 %v5421_v16, %v2219_v1  ;;  %1998 = vadd.xlane.f32.xlu1 %v1997_v57 }
0x118f   :  { %v5466_v62 = vpop.eup %4523  ;;  %v2228_v53 = vmul.f32 1.442695, %v2224_v35 }
0x1190   :  { %v2222_v2 = vpop.xlane.xlu0 %2221  ;;  %v2000_v50 = vsel %vm437_vm9, %v5466_v62, 0.0 }
0x1191   :  { %4529 = vpow2.f32 %v2228_v53  ;;  %v2225_v61 = vsub.f32 %v5425_v17, %v2222_v2  ;;  %2001 = vadd.xlane.f32.xlu0 %v2000_v50 }
0x1193   :  { %v5471_v4 = vpop.eup %4525  ;;  %v2230_v5 = vmul.f32 1.442695, %v2225_v61 }
0x1194   :  { %v2451_v45 = vpop.xlane.xlu1 %2450  ;;  %v2003_v6 = vsel %vm437_vm9, %v5471_v4, 0.0 }
0x1195   :  { %4531 = vpow2.f32 %v2230_v5  ;;  %v2458_v16 = vsub.f32 %v5429_v32, %v2451_v45  ;;  %2004 = vadd.xlane.f32.xlu1 %v2003_v6 }
0x1197   :  { %v5476_v7 = vpop.eup %4527  ;;  %v2461_v13 = vmul.f32 1.442695, %v2458_v16 }
0x1198   :  { %v2454_v15 = vpop.xlane.xlu0 %2453  ;;  %v2232_v49 = vsel %vm437_vm9, %v5476_v7, 0.0 }
0x1199   :  { %4533 = vpow2.f32 %v2461_v13  ;;  %v2459_v17 = vsub.f32 %v5433_v8, %v2454_v15  ;;  %2233 = vadd.xlane.f32.xlu0 %v2232_v49 }
0x119b   :  { %v5481_v21 = vpop.eup %4529  ;;  %v2463_v24 = vmul.f32 1.442695, %v2459_v17 }
0x119c   :  { %v2457_v19 = vpop.xlane.xlu1 %2456  ;;  %v2235_v25 = vsel %vm437_vm9, %v5481_v21, 0.0 }
0x119d   :  { %4535 = vpow2.f32 %v2463_v24  ;;  %v2460_v32 = vsub.f32 %v5437_v33, %v2457_v19  ;;  %2236 = vadd.xlane.f32.xlu1 %v2235_v25 }
0x119f   :  { %v5486_v28 = vpop.eup %4531  ;;  %v2465_v29 = vmul.f32 1.442695, %v2460_v32 }
0x11a0   :  { %v2686_v23 = vpop.xlane.xlu0 %2685  ;;  %v2238_v31 = vsel %vm437_vm9, %v5486_v28, 0.0 }
0x11a1   :  { %4537 = vpow2.f32 %v2465_v29  ;;  %v2693_v8 = vsub.f32 %v5441_v38, %v2686_v23  ;;  %2239 = vadd.xlane.f32.xlu1 %v2238_v31 }
0x11a3   :  { %v5491_v22 = vpop.eup %4533  ;;  %v2696_v34 = vmul.f32 1.442695, %v2693_v8 }
0x11a4   :  { %v2467_v52 = vsel %vm437_vm9, %v5491_v22, 0.0  ;;  %v2689_v47 = vpop.xlane.xlu1 %2688 }
0x11a5   :  { %4539 = vpow2.f32 %v2696_v34  ;;  %2468 = vadd.xlane.f32.xlu1 %v2467_v52  ;;  %v2694_v43 = vsub.f32 %v5445_v18, %v2689_v47 }
0x11a7   :  { %v5495_v33 = vpop.eup %4535  ;;  %v2698_v54 = vmul.f32 1.442695, %v2694_v43 }
0x11a8   :  { %v2692_v37 = vpop.xlane.xlu0 %2691  ;;  %v2470_v39 = vsel %vm437_vm9, %v5495_v33, 0.0  ;;  %v2017_v46 = vpop.permute.xlu1 %2016 }
0x11a9   :  { %2471 = vadd.xlane.f32.xlu0 %v2470_v39  ;;  %v2695_v55 = vsub.f32 %v5449_v11, %v2692_v37  ;;  %4541 = vpow2.f32 %v2698_v54 }
0x11ab   :  { %v5499_v41 = vpop.eup %4537  ;;  %v2700_v56 = vmul.f32 1.442695, %v2695_v55 }
0x11ac   :  { %v4421_v42 = vpop.permute.xlu0 %4420  ;;  %v2473_v38 = vsel %vm437_vm9, %v5499_v41, 0.0  ;;  %v4426_v18 = vpop.permute.xlu1 %4425 }
0x11ad   :  { %v4423_v27 = vunpack.i.h.bf16 %v4421_v42  ;;  %2474 = vadd.xlane.f32.xlu1 %v2473_v38  ;;  %v4422_v44 = vunpack.i.l.bf16 %v4421_v42  ;;  %4543 = vpow2.f32 %v2700_v56  ;;  %v4428_v57 = vunpack.i.h.bf16 %v4426_v18 }
0x11ae   :  { %v4427_v35 = vunpack.i.l.bf16 %v4426_v18 }
0x11af   :  { %v5503_v40 = vpop.eup %4539  ;;  %v4272_v30 = vpack.c.bf16 %v4423_v27, %v4422_v44 }
0x11b0   :  { %v2702_v48 = vsel %vm437_vm9, %v5503_v40, 0.0  ;;  %v4279_v50 = vpack.c.bf16 %v4428_v57, %v4427_v35  ;;  %v5589_v35 = vld [vmem:[%s5766_s7 + $0x20] sm:$0xff] }
0x11b1   :  { %2703 = vadd.xlane.f32.xlu0 %v2702_v48  ;;  %4273 = vmatpush3.bf16.msra.mxu1 %v4272_v30 }
0x11b2   :  { %4016 = vmatprep.subr.mxu1 %v4617_v10 }
0x11b3   :  { %v5515_v58 = vpop.eup %4541 }
0x11b4   :  { %v2705_v59 = vsel %vm437_vm9, %v5515_v58, 0.0 }
0x11b5   :  { %4017 = vmatpush3.msra.mxu1 %v2017_v46 }
0x11b6   :  { %4278 = vmatprep.subr.bf16.mxu1 %v4615_v9 }
0x11b7   :  { %v5519_v60 = vpop.eup %4543 }
0x11b8   :  { %v2708_v12 = vsel %vm437_vm9, %v5519_v60, 0.0 }
0x11be   :  { %4430 = vrot.lane.b32.xlu1 %v5313_v14, %s4626_s15 }
0x11c7   :  { %2251 = vrot.lane.b32.xlu0 %v5317_v20, %s4624_s28 }
0x11e2   :  { %2706 = vadd.xlane.f32.xlu1 %v2705_v59 }
0x11e6   :  { %2709 = vadd.xlane.f32.xlu0 %v2708_v12 }
0x11f3   :  { %2486 = vrot.lane.b32.xlu1 %v5317_v20, %s4626_s15 }
0x11f7   :  { %4435 = vrot.lane.b32.xlu1 %v5313_v14, %s4628_s17 }
0x11fb   :  { %2721 = vrot.lane.b32.xlu1 %v5317_v20, %s4628_s17 }
0x121a   :  { %v1999_v11 = vpop.xlane.xlu1 %1998 }
0x121b   :  { %4545 = vrcp.f32 %v1999_v11 }
0x121e   :  { %v2002_v0 = vpop.xlane.xlu0 %2001 }
0x121f   :  { %4547 = vrcp.f32 %v2002_v0 }
0x1222   :  { %v2005_v1 = vpop.xlane.xlu1 %2004 }
0x1223   :  { %4549 = vrcp.f32 %v2005_v1 }
0x1225   :  { %v4546_v53 = vpop.eup %4545 }
0x1226   :  { %v2009_v2 = vmul.f32 %v4546_v53, %v5461_v63  ;;  %v2234_v6 = vpop.xlane.xlu0 %2233  ;;  %v5594_v53 = vld [vmem:[%s5766_s7 + $0x28] sm:$0xff] }
0x1227   :  { %4551 = vrcp.f32 %v2234_v6 }
0x1228   :  { %4019 = vmatmul.mubr.msk.f32.vlgmr.msra.gmra.mrb[50].mxu1 %vm437_vm9, %v2009_v2  ;;  %v5599_v2 = vld [vmem:[%s5766_s7 + $0x30] sm:$0xff] }
0x1229   :  { %v4548_v61 = vpop.eup %4547  ;;  %4280 = vmatpush3.bf16.msra.mxu1 %v4279_v50  ;;  %4021 = vmatprep.mubr.msk.f32.mxu1 %vm4616_vm0, %v4617_v10  ;;  %v4296_v50 = vpack.c.bf16 %v5594_v53, %v5589_v35 }
0x122a   :  { %v2237_v14 = vpop.xlane.xlu1 %2236  ;;  %v2010_v20 = vmul.f32 %v4548_v61, %v5466_v62  ;;  %4046 = vmatprep.subr.mxu1 %v4617_v10  ;;  %v5606_v61 = vld [vmem:[%s5766_s7 + $0x38] sm:$0xff] }
0x122b   :  { %4553 = vrcp.f32 %v2237_v14  ;;  %4297 = vmatpush3.bf16.msra.mxu0 %v4296_v50  ;;  %v4299_v14 = vpack.c.bf16 %v5606_v61, %v5599_v2 }
0x122c   :  { %4022 = vmatmul.mubr.msk.f32.gmra.mrb[52].mxu1 %vm437_vm9, %v2010_v20  ;;  %4298 = vmatprep.subr.bf16.mxu0 %v4615_v9 }
0x122d   :  { %v4550_v5 = vpop.eup %4549  ;;  %4024 = vmatprep.mubr.msk.f32.mxu1 %vm4616_vm0, %v4617_v10 }
0x122e   :  { %v2011_v63 = vmul.f32 %v4550_v5, %v5471_v4  ;;  %v2240_v45 = vpop.xlane.xlu1 %2239 }
0x122f   :  { %4555 = vrcp.f32 %v2240_v45  ;;  %4300 = vmatpush3.bf16.msra.mxu0 %v4299_v14 }
0x1230   :  { %4025 = vmatmul.mubr.msk.f32.gmra.mrb[54].mxu1 %vm437_vm9, %v2011_v63  ;;  %4307 = vmatprep.subr.bf16.mxu0 %v4615_v9 }
0x1231   :  { %4048 = vmatprep.mubr.msk.f32.mxu1 %vm4616_vm0, %v4617_v10  ;;  %v4552_v17 = vpop.eup %4551 }
0x1232   :  { %v2469_v16 = vpop.xlane.xlu1 %2468  ;;  %v2244_v4 = vmul.f32 %v4552_v17, %v5476_v7 }
0x1233   :  { %4557 = vrcp.f32 %v2469_v16 }
0x1235   :  { %v4554_v32 = vpop.eup %4553 }
0x1236   :  { %v2472_v62 = vpop.xlane.xlu0 %2471  ;;  %v2245_v23 = vmul.f32 %v4554_v32, %v5481_v21 }
0x1237   :  { %4559 = vrcp.f32 %v2472_v62 }
0x1239   :  { %v4556_v31 = vpop.eup %4555 }
0x123a   :  { %v2475_v13 = vpop.xlane.xlu1 %2474  ;;  %v2246_v7 = vmul.f32 %v4556_v31, %v5486_v28 }
0x123b   :  { %4561 = vrcp.f32 %v2475_v13 }
0x123d   :  { %v4558_v21 = vpop.eup %4557 }
0x123e   :  { %v4431_v15 = vpop.permute.xlu1 %4430  ;;  %v2704_v49 = vpop.xlane.xlu0 %2703  ;;  %v2479_v34 = vmul.f32 %v4558_v21, %v5491_v22 }
0x123f   :  { %v4433_v24 = vunpack.i.h.bf16 %v4431_v15  ;;  %v4432_v19 = vunpack.i.l.bf16 %v4431_v15  ;;  %4563 = vrcp.f32 %v2704_v49 }
0x1241   :  { %v4286_v29 = vpack.c.bf16 %v4433_v24, %v4432_v19  ;;  %v4560_v37 = vpop.eup %4559 }
0x1242   :  { %v2252_v25 = vpop.permute.xlu0 %2251  ;;  %v2480_v42 = vmul.f32 %v4560_v37, %v5495_v33 }
0x1243   :  { %4047 = vmatpush3.msra.mxu1 %v2252_v25 }
0x1244   :  { %4049 = vmatmul.mubr.msk.f32.vlgmr.msra.gmra.mrb[56].mxu1 %vm437_vm9, %v2244_v4  ;;  %4285 = vmatprep.subr.bf16.mxu1 %v4615_v9 }
0x1245   :  { %4287 = vmatpush3.bf16.msra.mxu1 %v4286_v29  ;;  %4051 = vmatprep.mubr.msk.f32.mxu1 %vm4616_vm0, %v4617_v10  ;;  %v4562_v38 = vpop.eup %4561 }
0x1246   :  { %4076 = vmatprep.subr.mxu1 %v4617_v10  ;;  %v2481_v47 = vmul.f32 %v4562_v38, %v5499_v41 }
0x1248   :  { %4052 = vmatmul.mubr.msk.f32.gmra.mrb[58].mxu1 %vm437_vm9, %v2245_v23 }
0x1249   :  { %4054 = vmatprep.mubr.msk.f32.mxu1 %vm4616_vm0, %v4617_v10  ;;  %v4564_v30 = vpop.eup %4563 }
0x124a   :  { %v2714_v33 = vmul.f32 %v4564_v30, %v5503_v40 }
0x124c   :  { %4055 = vmatmul.mubr.msk.f32.gmra.mrb[60].mxu1 %vm437_vm9, %v2246_v7 }
0x124d   :  { %4078 = vmatprep.mubr.msk.f32.mxu1 %vm4616_vm0, %v4617_v10 }
0x126f   :  { %v2707_v8 = vpop.xlane.xlu1 %2706 }
0x1270   :  { %4565 = vrcp.f32 %v2707_v8 }
0x1273   :  { %v2487_v52 = vpop.permute.xlu1 %2486  ;;  %v2710_v28 = vpop.xlane.xlu0 %2709 }
0x1274   :  { %4077 = vmatpush3.msra.mxu1 %v2487_v52  ;;  %4567 = vrcp.f32 %v2710_v28 }
0x1275   :  { %4079 = vmatmul.mubr.msk.f32.vlgmr.msra.gmra.mrb[62].mxu1 %vm437_vm9, %v2479_v34  ;;  %4292 = vmatprep.subr.bf16.mxu1 %v4615_v9 }
0x1276   :  { %4081 = vmatprep.mubr.msk.f32.mxu1 %vm4616_vm0, %v4617_v10 }
0x1277   :  { %v4436_v39 = vpop.permute.xlu1 %4435 }
0x1278   :  { %v4438_v27 = vunpack.i.h.bf16 %v4436_v39  ;;  %v4437_v44 = vunpack.i.l.bf16 %v4436_v39 }
0x1279   :  { %4082 = vmatmul.mubr.msk.f32.gmra.mrb[64].mxu1 %vm437_vm9, %v2480_v42 }
0x127a   :  { %v4293_v22 = vpack.c.bf16 %v4438_v27, %v4437_v44  ;;  %4084 = vmatprep.mubr.msk.f32.mxu1 %vm4616_vm0, %v4617_v10  ;;  %v4566_v46 = vpop.eup %4565  ;;  %v3539_v44 = vld [vmem:[%s5763_s4 + $0x8] ss:$0 sm:$0xff] }
0x127b   :  { %v2722_v48 = vpop.permute.xlu1 %2721  ;;  %v2715_v41 = vmul.f32 %v4566_v46, %v5515_v58 }
0x127c   :  { %4294 = vmatpush3.bf16.msra.mxu1 %v4293_v22 }
0x127d   :  { %4085 = vmatmul.mubr.msk.f32.gmra.mrb[66].mxu1 %vm437_vm9, %v2481_v47  ;;  %4106 = vmatprep.subr.mxu1 %v4617_v10 }
0x127e   :  { %4108 = vmatprep.mubr.msk.f32.mxu1 %vm4616_vm0, %v4617_v10  ;;  %v4568_v43 = vpop.eup %4567 }
0x127f   :  { %v2716_v40 = vmul.f32 %v4568_v43, %v5519_v60 }
0x1280   :  { %4107 = vmatpush3.msra.mxu1 %v2722_v48 }
0x1281   :  { %4109 = vmatmul.mubr.msk.f32.vlgmr.msra.gmra.mrb[68].mxu1 %vm437_vm9, %v2714_v33  ;;  %4301 = vmatprep.subr.bf16.mxu1 %v4615_v9 }
0x1282   :  { %4111 = vmatprep.mubr.msk.f32.mxu1 %vm4616_vm0, %v4617_v10 }
0x1285   :  { %4112 = vmatmul.mubr.msk.f32.gmra.mrb[70].mxu1 %vm437_vm9, %v2715_v41 }
0x1286   :  { %4114 = vmatprep.mubr.msk.f32.mxu1 %vm4616_vm0, %v4617_v10 }
0x1289   :  { %4115 = vmatmul.mubr.msk.f32.gmra.mrb[72].mxu1 %vm437_vm9, %v2716_v40 }
0x128a   :  { %4142 = vmatprep.mubr.msk.f32.mxu1 %vm4616_vm0, %v4617_v10 }
0x12fb   :  { %v2096_v54 = vpop.f32.mrb[50].mxu1 }
0x12fc   :  { %v4020_v55 = vpop.f32.mrb[51].mxu1 }
0x12ff   :  { %v2101_v56 = vpop.f32.mrb[52].mxu1 }
0x1300   :  { %v4023_v59 = vpop.f32.mrb[53].mxu1 }
0x1303   :  { %v2106_v12 = vpop.f32.mrb[54].mxu1 }
0x1304   :  { %v4026_v18 = vpop.f32.mrb[55].mxu1 }
0x1317   :  { %v2331_v58 = vpop.f32.mrb[56].mxu1 }
0x1318   :  { %2818 = vrot.lane.b32.xlu1 %v2331_v58, %s4629_s18  ;;  %v4050_v11 = vpop.f32.mrb[57].mxu1 }
0x131b   :  { %v2336_v0 = vpop.f32.mrb[58].mxu1 }
0x131c   :  { %2820 = vrot.lane.b32.xlu0 %v2336_v0, %s4629_s18  ;;  %v4053_v1 = vpop.f32.mrb[59].mxu1 }
0x131f   :  { %v2341_v60 = vpop.f32.mrb[60].mxu1 }
0x1320   :  { %2822 = vrot.lane.b32.xlu1 %v2341_v60, %s4629_s18  ;;  %v4056_v57 = vpop.f32.mrb[61].mxu1 }
0x1348   :  { %v2566_v20 = vpop.f32.mrb[62].mxu1 }
0x1349   :  { %2830 = vrot.lane.b32.xlu1 %v2566_v20, %s4630_s19  ;;  %v4080_v5 = vpop.f32.mrb[63].mxu1 }
0x134c   :  { %v2571_v63 = vpop.f32.mrb[64].mxu1 }
0x134d   :  { %2832 = vrot.lane.b32.xlu1 %v2571_v63, %s4630_s19  ;;  %v4083_v45 = vpop.f32.mrb[65].mxu1 }
0x1350   :  { %v2576_v6 = vpop.f32.mrb[66].mxu1 }
0x1351   :  { %v4086_v16 = vpop.f32.mrb[67].mxu1 }
0x1352   :  { %v4444_v16 = vpack.i.bf16 %v5606_v61, %v5599_v2  ;;  %v3543_v61 = vld [vmem:[%s5763_s4 + $0x9] ss:$0 sm:$0xff] }
0x1354   :  { %v2801_v62 = vpop.f32.mrb[68].mxu1 }
0x1355   :  { %2842 = vrot.lane.b32.xlu1 %v2801_v62, %s4631_s14  ;;  %v4110_v13 = vpop.f32.mrb[69].mxu1 }
0x1358   :  { %v2806_v15 = vpop.f32.mrb[70].mxu1 }
0x1359   :  { %2844 = vrot.lane.b32.xlu1 %v2806_v15, %s4631_s14  ;;  %v4113_v49 = vpop.f32.mrb[71].mxu1 }
0x135c   :  { %v2811_v17 = vpop.f32.mrb[72].mxu1 }
0x135d   :  { %2834 = vrot.lane.b32.xlu1 %v2576_v6, %s4630_s19  ;;  %v4116_v24 = vpop.f32.mrb[73].mxu1  ;;  %v4439_v6 = vpack.i.bf16 %v5594_v53, %v5589_v35 }
0x1361   :  { %2846 = vrot.lane.b32.xlu1 %v2811_v17, %s4631_s14 }
0x138a   :  { %v2819_v19 = vpop.permute.xlu1 %2818 }
0x138b   :  { %v2851_v29 = vsel %vm344_vm7, %v2096_v54, %v2819_v19 }
0x138e   :  { %v2821_v23 = vpop.permute.xlu0 %2820 }
0x138f   :  { %v2852_v21 = vsel %vm344_vm7, %v2101_v56, %v2821_v23 }
0x1392   :  { %v2823_v4 = vpop.permute.xlu1 %2822 }
0x1393   :  { %v2853_v39 = vsel %vm344_vm7, %v2106_v12, %v2823_v4 }
0x13bb   :  { %v2831_v25 = vpop.permute.xlu1 %2830 }
0x13bc   :  { %v2854_v31 = vsel %vm1313_vm10, %v2851_v29, %v2831_v25 }
0x13bf   :  { %v2833_v32 = vpop.permute.xlu1 %2832 }
0x13c0   :  { %v2855_v34 = vsel %vm1313_vm10, %v2852_v21, %v2833_v32 }
0x13c7   :  { %v2843_v7 = vpop.permute.xlu1 %2842 }
0x13c8   :  { %v2857_v8 = vsel %vm437_vm9, %v2854_v31, %v2843_v7 }
0x13c9   :  { %4126 = vmatmul.mubr.msk.f32.vlgmr.msra.gmra.mrb[58].mxu0 %vm171_vm6, %v2857_v8 }
0x13ca   :  { %4128 = vmatprep.mubr.msk.f32.mxu0 %vm4616_vm0, %v4617_v10 }
0x13cb   :  { %v2845_v52 = vpop.permute.xlu1 %2844 }
0x13cc   :  { %v2858_v37 = vsel %vm437_vm9, %v2855_v34, %v2845_v52  ;;  %v3544_v52 = vld [vmem:[%s5763_s4 + $0xa] ss:$0 sm:$0xff] }
0x13cd   :  { %4129 = vmatmul.mubr.msk.f32.gmra.mrb[60].mxu0 %vm171_vm6, %v2858_v37 }
0x13ce   :  { %4131 = vmatprep.mubr.msk.f32.mxu0 %vm4616_vm0, %v4617_v10 }
0x13cf   :  { %v2835_v28 = vpop.permute.xlu1 %2834 }
0x13d0   :  { %v2856_v42 = vsel %vm1313_vm10, %v2853_v39, %v2835_v28 }
0x13d3   :  { %v2847_v38 = vpop.permute.xlu1 %2846 }
0x13d4   :  { %v2859_v27 = vsel %vm437_vm9, %v2856_v42, %v2847_v38 }
0x13d5   :  { %4132 = vmatmul.mubr.msk.f32.gmra.mrb[62].mxu0 %vm171_vm6, %v2859_v27 }
0x13d6   :  { %4167 = vmatprep.mubr.msk.f32.mxu0 %vm4616_vm0, %v4617_v10 }
0x149c   :  { %v2944_v22 = vpop.f32.mrb[58].mxu0 }
0x149d   :  { %v2945_v47 = vadd.f32 %v3539_v44, %v2944_v22  ;;  %v4127_v30 = vpop.f32.mrb[59].mxu0 }
0x149e   :  { %v3550_v30 = vld [vmem:[%s5768_s9 + $0x40] sm:$0xff] }
0x149f   :  { %v2958_v33 = vadd.f32 %v2945_v47, %v5292_v51 }
0x14a0   :  { %v2949_v48 = vpop.f32.mrb[60].mxu0 }
0x14a1   :  { %v2950_v46 = vadd.f32 %v3539_v44, %v2949_v48  ;;  %v4130_v41 = vpop.f32.mrb[61].mxu0  ;;  %v2961_v43 = vsel %vm171_vm6, %v2958_v33, 0.0 }
0x14a2   :  { %2962 = vadd.xlane.f32.xlu1 %v2961_v43  ;;  %v3553_v41 = vld [vmem:[%s5768_s9 + $0x58] sm:$0xff] }
0x14a3   :  { %v2959_v40 = vadd.f32 %v2950_v46, %v5298_v36  ;;  %v3552_v46 = vld [vmem:[%s5768_s9 + $0x50] sm:$0xff] }
0x14a4   :  { %v4311_v43 = vpack.c.bf16 %v3553_v41, %v3552_v46 }
0x14a5   :  { %v2964_v54 = vsel %vm171_vm6, %v2959_v40, 0.0 }
0x14a6   :  { %2965 = vadd.xlane.f32.xlu0 %v2964_v54  ;;  %v3555_v54 = vld [vmem:[%s5768_s9 + $0x68] sm:$0xff] }
0x14a8   :  { %v2954_v55 = vpop.f32.mrb[62].mxu0 }
0x14a9   :  { %v2955_v56 = vadd.f32 %v3539_v44, %v2954_v55  ;;  %v4133_v59 = vpop.f32.mrb[63].mxu0 }
0x14aa   :  { %v3557_v59 = vld [vmem:[%s5768_s9 + $0x78] sm:$0xff] }
0x14ab   :  { %v2960_v12 = vadd.f32 %v2955_v56, %v5304_v3  ;;  %v3556_v56 = vld [vmem:[%s5768_s9 + $0x70] sm:$0xff] }
0x14ad   :  { %v2967_v18 = vsel %vm171_vm6, %v2960_v12, 0.0 }
0x14ae   :  { %2968 = vadd.xlane.f32.xlu0 %v2967_v18  ;;  %v3546_v18 = vld [vmem:[%s5767_s8 + $0x1] ss:$0 sm:$0xff] }
0x152f   :  { %v2963_v51 = vpop.xlane.xlu1 %2962 }
0x1530   :  { %v2970_v58 = vmul.f32 0.03125, %v2963_v51 }
0x1532   :  { %v2973_v11 = vsub.f32 %v2958_v33, %v2970_v58  ;;  %v3551_v33 = vld [vmem:[%s5768_s9 + $0x48] sm:$0xff] }
0x1533   :  { %v2966_v0 = vpop.xlane.xlu0 %2965  ;;  %v4308_v48 = vpack.c.bf16 %v3551_v33, %v3550_v30 }
0x1534   :  { %v2971_v1 = vmul.f32 0.03125, %v2966_v0  ;;  %v2976_v60 = vmul.f32 %v2973_v11, %v2973_v11 }
0x1535   :  { %4309 = vmatpush3.bf16.msra.mxu0 %v4308_v48 }
0x1536   :  { %v2974_v57 = vsub.f32 %v2959_v40, %v2971_v1  ;;  %v2979_v36 = vsel %vm171_vm6, %v2976_v60, 0.0  ;;  %4310 = vmatprep.subr.bf16.mxu0 %v4615_v9  ;;  %v3554_v40 = vld [vmem:[%s5768_s9 + $0x60] sm:$0xff] }
0x1537   :  { %2980 = vadd.xlane.f32.xlu0 %v2979_v36  ;;  %v4314_v55 = vpack.c.bf16 %v3555_v54, %v3554_v40 }
0x1538   :  { %v2977_v50 = vmul.f32 %v2974_v57, %v2974_v57 }
0x1539   :  { %4312 = vmatpush3.bf16.msra.mxu0 %v4311_v43 }
0x153a   :  { %v2982_v14 = vsel %vm171_vm6, %v2977_v50, 0.0  ;;  %4313 = vmatprep.subr.bf16.mxu0 %v4615_v9 }
0x153b   :  { %2983 = vadd.xlane.f32.xlu1 %v2982_v14  ;;  %v2969_v20 = vpop.xlane.xlu0 %2968 }
0x153c   :  { %v2972_v5 = vmul.f32 0.03125, %v2969_v20 }
0x153d   :  { %4315 = vmatpush3.bf16.msra.mxu0 %v4314_v55 }
0x153e   :  { %v2975_v3 = vsub.f32 %v2960_v12, %v2972_v5  ;;  %4316 = vmatprep.subr.bf16.mxu0 %v4615_v9  ;;  %v4317_v12 = vpack.c.bf16 %v3557_v59, %v3556_v56 }
0x1540   :  { %v2978_v63 = vmul.f32 %v2975_v3, %v2975_v3 }
0x1541   :  { %4318 = vmatpush3.bf16.msra.mxu0 %v4317_v12 }
0x1542   :  { %v2985_v45 = vsel %vm171_vm6, %v2978_v63, 0.0 }
0x1543   :  { %2986 = vadd.xlane.f32.xlu0 %v2985_v45 }
0x154c   :  { %4440 = vrot.lane.b32.xlu1 %v4439_v6, %s4618_s23 }
0x1559   :  { %4445 = vrot.lane.b32.xlu0 %v4444_v16, %s4618_s23 }
0x15c4   :  { %v2981_v62 = vpop.xlane.xlu0 %2980 }
0x15c5   :  { %v2988_v13 = vmul.f32 0.03125, %v2981_v62 }
0x15c7   :  { %v2991_v15 = vadd.f32 1e-12, %v2988_v13 }
0x15c8   :  { %v2984_v49 = vpop.xlane.xlu1 %2983 }
0x15c9   :  { %4569 = vrsqrt.f32 %v2991_v15  ;;  %v2989_v17 = vmul.f32 0.03125, %v2984_v49 }
0x15cb   :  { %v2992_v24 = vadd.f32 1e-12, %v2989_v17 }
0x15cc   :  { %v4441_v19 = vpop.permute.xlu1 %4440 }
0x15cd   :  { %4571 = vrsqrt.f32 %v2992_v24  ;;  %v4443_v4 = vunpack.i.h.bf16 %v4441_v19  ;;  %v4442_v25 = vunpack.i.l.bf16 %v4441_v19 }
0x15cf   :  { %v4302_v32 = vpack.c.bf16 %v4443_v4, %v4442_v25 }
0x15d0   :  { %v2987_v35 = vpop.xlane.xlu0 %2986 }
0x15d1   :  { %v2990_v53 = vmul.f32 0.03125, %v2987_v35  ;;  %4303 = vmatpush3.bf16.msra.mxu1 %v4302_v32 }
0x15d2   :  { %4304 = vmatprep.subr.bf16.mxu1 %v4615_v9 }
0x15d3   :  { %v4570_v2 = vpop.eup %4569  ;;  %v2993_v29 = vadd.f32 1e-12, %v2990_v53 }
0x15d4   :  { %v2997_v23 = vmul.f32 %v4570_v2, %v2973_v11  ;;  %v4446_v31 = vpop.permute.xlu0 %4445 }
0x15d5   :  { %4573 = vrsqrt.f32 %v2993_v29  ;;  %v4448_v7 = vunpack.i.h.bf16 %v4446_v31  ;;  %v4447_v8 = vunpack.i.l.bf16 %v4446_v31 }
0x15d6   :  { %v3004_v21 = vmul.f32 %v3543_v61, %v2997_v23 }
0x15d7   :  { %v4572_v34 = vpop.eup %4571  ;;  %v4305_v37 = vpack.c.bf16 %v4448_v7, %v4447_v8  ;;  %v3558_v8 = vld [vmem:[%s5763_s4 + $0xb] ss:$0 sm:$0xff] }
0x15d8   :  { %v2998_v28 = vmul.f32 %v4572_v34, %v2974_v57  ;;  %v5661_v39 = vadd.f32 %v3544_v52, %v3004_v21 }
0x15d9   :  { %4306 = vmatpush3.bf16.msra.mxu1 %v4305_v37 }
0x15da   :  { %v3005_v42 = vmul.f32 %v3543_v61, %v2998_v28 }
0x15dc   :  { %4143 = vmatmul.mubr.msk.f32.vlgmr.msra.gmra.mrb[74].mxu1 %vm171_vm6, %v5661_v39  ;;  %v5667_v38 = vadd.f32 %v3544_v52, %v3005_v42 }
0x15dd   :  { %4145 = vmatprep.mubr.msk.f32.mxu1 %vm4616_vm0, %v4617_v10 }
0x15df   :  { %v4574_v27 = vpop.eup %4573 }
0x15e0   :  { %4146 = vmatmul.mubr.msk.f32.gmra.mrb[76].mxu1 %vm171_vm6, %v5667_v38  ;;  %v2999_v44 = vmul.f32 %v4574_v27, %v2975_v3 }
0x15e1   :  { %4148 = vmatprep.mubr.msk.f32.mxu1 %vm4616_vm0, %v4617_v10 }
0x15e2   :  { %v3006_v22 = vmul.f32 %v3543_v61, %v2999_v44 }
0x15e4   :  { %v5673_v47 = vadd.f32 %v3544_v52, %v3006_v22 }
0x15e6   :  { %4149 = vmatmul.mubr.msk.f32.gmra.mrb[78].mxu1 %vm171_vm6, %v5673_v47 }
0x16af   :  { %v3113_v51 = vpop.f32.mrb[74].mxu1 }
0x16b0   :  { %v3114_v58 = vadd.f32 %v3546_v18, %v3113_v51  ;;  %v4144_v11 = vpop.f32.mrb[75].mxu1 }
0x16b2   :  { %v3127_v0 = vmul.f32 %v3114_v58, %v3114_v58 }
0x16b3   :  { %v3118_v1 = vpop.f32.mrb[76].mxu1 }
0x16b4   :  { %v3130_v9 = vmul.f32 %v3127_v0, %v3114_v58  ;;  %v3119_v60 = vadd.f32 %v3546_v18, %v3118_v1  ;;  %v4147_v57 = vpop.f32.mrb[77].mxu1 }
0x16b6   :  { %v3133_v36 = vmul.f32 0.044715, %v3130_v9  ;;  %v3128_v50 = vmul.f32 %v3119_v60, %v3119_v60  ;;  %v3312_v9 = vld [vmem:[%s5759_s0 + $0x18] sm:$0xff] }
0x16b8   :  { %v3136_v14 = vadd.f32 %v3133_v36, %v3114_v58  ;;  %v3131_v20 = vmul.f32 %v3128_v50, %v3119_v60 }
0x16b9   :  { %v3123_v5 = vpop.f32.mrb[78].mxu1 }
0x16ba   :  { %v3139_v3 = vmul.f32 0.7978846, %v3136_v14  ;;  %v3134_v63 = vmul.f32 0.044715, %v3131_v20  ;;  %v3124_v45 = vadd.f32 %v3546_v18, %v3123_v5  ;;  %v4150_v6 = vpop.f32.mrb[79].mxu1 }
0x16bc   :  { %4575 = vtanh.f32 %v3139_v3  ;;  %v3137_v16 = vadd.f32 %v3134_v63, %v3119_v60  ;;  %v3129_v62 = vmul.f32 %v3124_v45, %v3124_v45 }
0x16be   :  { %v3140_v13 = vmul.f32 0.7978846, %v3137_v16  ;;  %v3132_v15 = vmul.f32 %v3129_v62, %v3124_v45 }
0x16c0   :  { %4577 = vtanh.f32 %v3140_v13  ;;  %v3135_v49 = vmul.f32 0.044715, %v3132_v15  ;;  %v3562_v15 = vld [vmem:[%s5763_s4 + $0xc] ss:$0 sm:$0xff] }
0x16c2   :  { %v3138_v17 = vadd.f32 %v3135_v49, %v3124_v45 }
0x16c4   :  { %v3141_v24 = vmul.f32 0.7978846, %v3138_v17 }
0x16c6   :  { %v4576_v19 = vpop.eup %4575  ;;  %4579 = vtanh.f32 %v3141_v24 }
0x16c7   :  { %v3145_v4 = vadd.f32 1.0, %v4576_v19  ;;  %v3563_v19 = vld [vmem:[%s5763_s4 + $0xd] ss:$0 sm:$0xff]  ;;  %s4632_s4 = smov [#allocation2]  }
0x16c8   :  { %s3414_s2 = sshll.u32 %s4632_s4, 4  ;;  %s3415_s2 = int_to_ptr.vmem [resolvable:$true] %s3414_s2 }
0x16c9   :  { %v3148_v25 = vmul.f32 0.5, %v3145_v4  ;;  %s4590_s5 = scalar_lea.vmem %s3415_s2, 256  ;;  %p4595_p1 = scmp.lt.s32.totalorder %s3415_s2, %s3415_s2 }
0x16ca   :  { %v4578_v32 = vpop.eup %4577  ;;  %p4591_p0 = scmp.ne.s32.totalorder %s3415_s2, %s4590_s5  ;;  %p4596_p2 = scmp.lt.s32.totalorder %s4590_s5, %s4590_s5 }
0x16cb   :  { %v3151_v35 = vmul.f32 %v3148_v25, %v3114_v58  ;;  %v3146_v53 = vadd.f32 1.0, %v4578_v32 }
0x16cc   :  { %p4597_p3 = por %p4596_p2, %p4595_p1 }
0x16cd   :  { %4168 = vmatmul.mubr.msk.f32.vlgmr.msra.gmra.mrb[64].mxu0 %vm1624_vm11, %v3151_v35  ;;  %v3149_v2 = vmul.f32 0.5, %v3146_v53 }
0x16ce   :  { %4170 = vmatprep.mubr.msk.f32.mxu0 %vm4616_vm0, %v4617_v10  ;;  %p4598_p4 = pnand %p4597_p3, %p4591_p0 }
0x16cf   :  { %v3152_v61 = vmul.f32 %v3149_v2, %v3119_v60  ;;  %v3313_v60 = vld [vmem:[%s5759_s0 + $0x20] sm:$0xff] }
0x16d0   :  { %v4580_v29 = vpop.eup %4579 }
0x16d1   :  { %4171 = vmatmul.mubr.msk.f32.gmra.mrb[66].mxu0 %vm1624_vm11, %v3152_v61  ;;  %v3147_v23 = vadd.f32 1.0, %v4580_v29 }
0x16d2   :  { %4173 = vmatprep.mubr.msk.f32.mxu0 %vm4616_vm0, %v4617_v10 }
0x16d3   :  { %v3150_v31 = vmul.f32 0.5, %v3147_v23 }
0x16d5   :  { %v3153_v7 = vmul.f32 %v3150_v31, %v3124_v45 }
0x16d7   :  { %4174 = vmatmul.mubr.msk.f32.gmra.mrb[68].mxu0 %vm1624_vm11, %v3153_v7 }
0x17a0   :  { %v3242_v21 = vpop.f32.mrb[64].mxu0 }
0x17a1   :  { %v3243_v34 = vadd.f32 %v3558_v8, %v3242_v21  ;;  %v4169_v52 = vpop.f32.mrb[65].mxu0 }
0x17a3   :  { %v3256_v37 = vadd.f32 %v3243_v34, %v5661_v39 }
0x17a4   :  { %v3247_v28 = vpop.f32.mrb[66].mxu0 }
0x17a5   :  { %v3248_v42 = vadd.f32 %v3558_v8, %v3247_v28  ;;  %v4172_v27 = vpop.f32.mrb[67].mxu0  ;;  %v3259_v44 = vsel %vm171_vm6, %v3256_v37, 0.0 }
0x17a6   :  { %3260 = vadd.xlane.f32.xlu1 %v3259_v44 }
0x17a7   :  { %v3257_v22 = vadd.f32 %v3248_v42, %v5667_v38 }
0x17a9   :  { %v3262_v30 = vsel %vm171_vm6, %v3257_v22, 0.0 }
0x17aa   :  { %3263 = vadd.xlane.f32.xlu0 %v3262_v30  ;;  %v3252_v33 = vpop.f32.mrb[68].mxu0 }
0x17ab   :  { %v3253_v48 = vadd.f32 %v3558_v8, %v3252_v33  ;;  %v4175_v46 = vpop.f32.mrb[69].mxu0 }
0x17ad   :  { %v3258_v41 = vadd.f32 %v3253_v48, %v5673_v47 }
0x17af   :  { %v3265_v43 = vsel %vm171_vm6, %v3258_v41, 0.0 }
0x17b0   :  { %3266 = vadd.xlane.f32.xlu1 %v3265_v43 }
0x1833   :  { %v3261_v39 = vpop.xlane.xlu1 %3260 }
0x1834   :  { %v3268_v40 = vmul.f32 0.03125, %v3261_v39 }
0x1836   :  { %v3271_v54 = vsub.f32 %v3256_v37, %v3268_v40 }
0x1837   :  { %v3264_v55 = vpop.xlane.xlu0 %3263 }
0x1838   :  { %v3269_v56 = vmul.f32 0.03125, %v3264_v55  ;;  %v3274_v59 = vmul.f32 %v3271_v54, %v3271_v54 }
0x183a   :  { %v3272_v12 = vsub.f32 %v3257_v22, %v3269_v56  ;;  %v3277_v38 = vsel %vm171_vm6, %v3274_v59, 0.0 }
0x183b   :  { %3278 = vadd.xlane.f32.xlu0 %v3277_v38 }
0x183c   :  { %v3275_v18 = vmul.f32 %v3272_v12, %v3272_v12 }
0x183d   :  { %v3267_v51 = vpop.xlane.xlu1 %3266 }
0x183e   :  { %v3270_v58 = vmul.f32 0.03125, %v3267_v51  ;;  %v3280_v11 = vsel %vm171_vm6, %v3275_v18, 0.0 }
0x183f   :  { %3281 = vadd.xlane.f32.xlu1 %v3280_v11 }
0x1840   :  { %v3273_v47 = vsub.f32 %v3258_v41, %v3270_v58 }
0x1842   :  { %v3276_v0 = vmul.f32 %v3273_v47, %v3273_v47 }
0x1844   :  { %v3283_v1 = vsel %vm171_vm6, %v3276_v0, 0.0 }
0x1845   :  { %3284 = vadd.xlane.f32.xlu0 %v3283_v1 }
0x1850   :  { %3315 = vperm.xlu1 %4348, %v3312_v9  }
0x185b   :  { %3318 = vperm.xlu0 %4347, %v3313_v60  }
0x18c8   :  { %v3279_v57 = vpop.xlane.xlu0 %3278 }
0x18c9   :  { %v3286_v36 = vmul.f32 0.03125, %v3279_v57 }
0x18cb   :  { %v3289_v50 = vadd.f32 1e-12, %v3286_v36 }
0x18cc   :  { %v3282_v14 = vpop.xlane.xlu1 %3281 }
0x18cd   :  { %4581 = vrsqrt.f32 %v3289_v50  ;;  %v3287_v20 = vmul.f32 0.03125, %v3282_v14 }
0x18cf   :  { %v3290_v5 = vadd.f32 1e-12, %v3287_v20 }
0x18d0   :  { %v3316_v3 = vpop.permute.xlu1 %3315 }
0x18d1   :  { %4583 = vrsqrt.f32 %v3290_v5  ;;  %vm3320_vm12 = vcmp.eq.s32.totalorder %v4750_v26, %v3316_v3 }
0x18d2   :  { %v3564_v63 = vsel %vm3320_vm12, 1.0, %v4617_v10  ;;  %v3285_v45 = vpop.xlane.xlu0 %3284 }
0x18d3   :  { %v3288_v6 = vmul.f32 0.03125, %v3285_v45  ;;  %4182 = vmatprep.mubr.msk.f32.mxu1 %vm437_vm9, %v3564_v63 }
0x18d5   :  { %v3291_v16 = vadd.f32 1e-12, %v3288_v6 }
0x18d7   :  { %v4582_v62 = vpop.eup %4581  ;;  %4585 = vrsqrt.f32 %v3291_v16 }
0x18d8   :  { %v3295_v13 = vmul.f32 %v4582_v62, %v3271_v54 }
0x18da   :  { %v3302_v24 = vmul.f32 %v3562_v15, %v3295_v13  ;;  %v3319_v61 = vpop.permute.xlu0 %3318 }
0x18db   :  { %v4584_v49 = vpop.eup %4583  ;;  %vm3321_vm13 = vcmp.eq.s32.totalorder %v4750_v26, %v3319_v61 }
0x18dc   :  { %v3296_v17 = vmul.f32 %v4584_v49, %v3272_v12  ;;  %v3309_v25 = vadd.f32 %v3563_v19, %v3302_v24  ;;  %v3565_v31 = vsel %vm3321_vm13, 1.0, %v4617_v10 }
0x18de   :  { %v3303_v4 = vmul.f32 %v3562_v15, %v3296_v17 }
0x18e0   :  { %v3310_v32 = vadd.f32 %v3563_v19, %v3303_v4 }
0x18e1   :  { %v4586_v35 = vpop.eup %4585 }
0x18e2   :  { %v4319_v53 = vpack.c.bf16 %v3310_v32, %v3309_v25  ;;  %v3297_v2 = vmul.f32 %v4586_v35, %v3273_v47 }
0x18e4   :  { %4320 = vmatprep.subr.bf16.mxu1 %v4319_v53  ;;  %v3304_v29 = vmul.f32 %v3562_v15, %v3297_v2 }
0x18e5   :  { %4322 = vmatpush3.bf16.msra.mxu1 %v4319_v53 }
0x18e6   :  { %v3311_v23 = vadd.f32 %v3563_v19, %v3304_v29 }
0x18e8   :  { %4180 = vmatprep.subr.mxu1 %v3311_v23 }
0x18e9   :  { %4181 = vmatpush3.msra.mxu1 %v3311_v23 }
0x18ea   :  { %4183 = vmatmul.mubr.msk.f32.vlgmr.msra.gmra.mrb[80].mxu1 %vm437_vm9, %v3565_v31 }
0x19bd   :  { %v4184_v7 = vpop.f32.mrb[80].mxu1 }
0x19be   :  { %3408 = vst.msk [vmem:[#allocation2 + $0x8] sm:$0xff] %vm171_vm6, %v4184_v7  ;;  %v3398_v8 = vpop.f32.mrb[81].mxu1 }
0x19bf   :  { %3407 = vst.msk [vmem:[#allocation2] sm:$0xff] %vm171_vm6, %v3398_v8 }
0x19c0   :  { %4601 = shalt.err (!%p4598_p4)
}
0x19c1   :  { %s4602_s12 = scalar_lea.hbm %s5769_s10, 256 }
0x19c2   :  { %p4603_p5 = scmp.ne.s32.totalorder %s5769_s10, %s4602_s12  ;;  %p4606_p6 = scmp.lt.u32.totalorder %s4602_s12, %s5769_s10 }
0x19c4   :  { %p4608_p7 = pnand %p4606_p6, %p4603_p5 }
0x19c6   :  { %4611 = shalt.err (!%p4608_p7)
}
0x19c7   :  { %s4633_s26 = smov 128  }
0x19c8   :  { %3420 = dma.vmem_to_hbm [thread:$0]  %s3415_s2, 256, %s5769_s10, [#allocation3], %s4633_s26, %s4633_s26, %s4629_s18  }
0x19c9   :  { %4612 = dma.done.wait [#allocation3], 256  }
0x19ca   :  { %4613 = vsyncadd [#allocation3], 4294967040 }
0x19cb   :  { %3424 = vsyncpa [#allocation3], 1 }

</bundles_post_ra>
